<compile_context>
chip_gen: v5e
topology: v5e:2x2
jax: 0.10.0
libtpu: 0.0.40
codegen_flags: <defaults>
</compile_context>

<pallas_src>
import jax
import jax.numpy as jnp
import numpy as np
from jax import lax
from jax.experimental import pallas as pl
from jax.experimental.pallas import tpu as pltpu

# ---- Encoder constructor args (module __init__) ----
INPUT_SIZE = 20          # vocab size (sequence-symbol count)
EMBED_DIM  = 32          # embed_dim
HIDDEN     = 32          # hidden_size
NUM_LAYERS = 1           # num_layers
DROPOUT    = 0.0         # dropout (p=0.0 -> identity)
CELL_TYPE  = "GRU"       # cell_type

SEQ_LEN = 8
BATCH   = 2

# Per-dot matmul precision (replaces the old global jax_default_matmul_precision).
PREC = jax.lax.Precision.HIGHEST

# TODO(synk): nn.Dropout with p>0 (training mode) is not implemented; the module
# is instantiated with dropout=0.0 so dropout is an identity (eval behaviour).


# --------------------------------------------------------------------------
# Fused Pallas kernel: bidirectional GRU (both directions per step via a
# block-diagonal recurrent weight) + fc+tanh on the final hidden states.
#
# Column layout of every "wide" (6H) gate tensor is gate-major / direction-
# minor:  [ r_f | r_b | z_f | z_b | n_f | n_b ],  each block H wide.
# The recurrent state h is (N, 2H) = [ h_fwd | h_bwd ].
# Row block t of the input x_ref holds [ emb[t] | emb[L-1-t] ]  (2E wide), so
# at unrolled step t the forward direction sees x[t] and the backward
# direction sees x[L-1-t].
# --------------------------------------------------------------------------
def encoder_gru_kernel(x_ref, wih_ref, bih_ref, whh_ref, bhh_ref,
                       fcw_ref, fcb_ref, out_ref, hid_ref):
    L, N, H2 = out_ref.shape          # (L, N, 2H)
    H = H2 // 2

    # (1) Hoisted input projection: one matmul for all timesteps & directions.
    gi_all = jnp.dot(x_ref[...], wih_ref[...],
                     precision=PREC, preferred_element_type=jnp.float32)
    gi_all = gi_all + bih_ref[...]                        # (L*N, 6H)

    whh = whh_ref[...]                                    # (2H, 6H) block-diag
    bhh = bhh_ref[...]                                    # (1, 6H)

    h = jnp.zeros((N, H2), jnp.float32)                   # [h_fwd | h_bwd]
    hs = []
    for t in range(L):                                    # (2) fully unrolled
        gi = gi_all[t * N:(t + 1) * N, :]                 # (N, 6H) static slice
        gh = jnp.dot(h, whh, precision=PREC,
                     preferred_element_type=jnp.float32) + bhh
        # PyTorch GRU gate order: r, z, n (each 2H wide = both directions)
        r = jax.nn.sigmoid(gi[:, 0:H2]          + gh[:, 0:H2])
        z = jax.nn.sigmoid(gi[:, H2:2 * H2]     + gh[:, H2:2 * H2])
        n = jnp.tanh(      gi[:, 2 * H2:3 * H2] + r * gh[:, 2 * H2:3 * H2])
        h = (1.0 - z) * n + z * h
        hs.append(h)

    # (3) Write the concatenated (L, N, 2H) output directly: at original time
    # position t the forward half comes from step t, the backward half from
    # step L-1-t.  All stores use static indices and are 2H (=64) lanes wide.
    lane = lax.broadcasted_iota(jnp.int32, (N, H2), 1)
    is_fwd = lane < H
    for t in range(L):
        out_ref[t] = jnp.where(is_fwd, hs[t], hs[L - 1 - t])

    # (4) Fused fc + tanh: after the last step h == [h_fwd_final | h_bwd_final]
    # == cat(hidden[-2], hidden[-1]) from the PyTorch module.
    hid_ref[...] = jnp.tanh(
        jnp.dot(h, fcw_ref[...], precision=PREC,
                preferred_element_type=jnp.float32) + fcb_ref[...])


def encoder_rnn_fc_pallas(x_cat2d, params, L, N, H):
    """Single pallas_call: bidirectional GRU over L steps + fc+tanh.

    All operands are tiny (<~150 KB total), so whole arrays are mapped into
    VMEM with no grid (the kernel itself is the loop)."""
    vspec = lambda: pl.BlockSpec(memory_space=pltpu.MemorySpace.VMEM)
    return pl.pallas_call(
        encoder_gru_kernel,
        out_shape=(jax.ShapeDtypeStruct((L, N, 2 * H), jnp.float32),
                   jax.ShapeDtypeStruct((N, H), jnp.float32)),
        in_specs=[vspec() for _ in range(7)],
        out_specs=(vspec(), vspec()),
    )(x_cat2d, params["wih_bd"], params["bih_w"], params["whh_bd"],
      params["bhh_w"], params["fc_w_t"], params["fc_b"])


# --------------------------------------------------------------------------
# Encoder forward (GRU branch of the PyTorch module).
# --------------------------------------------------------------------------
def encoder_forward(params, x_tokens):
    L, N = x_tokens.shape
    E = params["embedding"].shape[1]
    H = params["fc_w_t"].shape[1]

    # embedding (padding_idx=0 row is zero) + dropout(p=0) == identity
    emb = jnp.take(params["embedding"], x_tokens, axis=0)          # (L, N, E)

    # Row block t of the kernel input = [emb[t] | emb[L-1-t]]: tiny input-side
    # prep that fuses with the XLA gather and lets the kernel run BOTH
    # directions off one hoisted GI matmul and one recurrent matmul per step.
    x_cat = jnp.concatenate([emb, emb[::-1]], axis=-1)             # (L, N, 2E)
    x_cat2d = x_cat.reshape(L * N, 2 * E)

    output, hidden = encoder_rnn_fc_pallas(x_cat2d, params, L, N, H)
    return output, hidden


# --------------------------------------------------------------------------
# Pure-JAX reference (uses the raw PyTorch-layout weights) for correctness.
# --------------------------------------------------------------------------
def _gru_ref_dir(emb, w_ih, w_hh, b_ih, b_hh, reverse):
    H = w_hh.shape[1]
    xs = emb[::-1] if reverse else emb

    def step(h, x_t):
        gi = jnp.dot(x_t, w_ih.T, precision=PREC) + b_ih
        gh = jnp.dot(h, w_hh.T, precision=PREC) + b_hh
        r = jax.nn.sigmoid(gi[:, :H] + gh[:, :H])
        z = jax.nn.sigmoid(gi[:, H:2 * H] + gh[:, H:2 * H])
        n = jnp.tanh(gi[:, 2 * H:] + r * gh[:, 2 * H:])
        h_new = (1.0 - z) * n + z * h
        return h_new, h_new

    h0 = jnp.zeros((emb.shape[1], H), jnp.float32)
    hT, outs = lax.scan(step, h0, xs)
    if reverse:
        outs = outs[::-1]
    return outs, hT


def encoder_forward_ref(params, x_tokens):
    emb = jnp.take(params["embedding"], x_tokens, axis=0)
    o_f, h_f = _gru_ref_dir(emb, params["w_ih"][0], params["w_hh"][0],
                            params["b_ih"][0], params["b_hh"][0], reverse=False)
    o_b, h_b = _gru_ref_dir(emb, params["w_ih"][1], params["w_hh"][1],
                            params["b_ih"][1], params["b_hh"][1], reverse=True)
    output = jnp.concatenate([o_f, o_b], axis=-1)
    concated = jnp.concatenate([h_f, h_b], axis=-1)
    hidden = jnp.tanh(jnp.dot(concated, params["fc_w"].T, precision=PREC)
                      + params["fc_b"])
    return output, hidden


# --------------------------------------------------------------------------
# Deterministic parameter init (PyTorch shapes) + packing into kernel layout.
# --------------------------------------------------------------------------
def init_params(key):
    H, E, V = HIDDEN, EMBED_DIM, INPUT_SIZE
    keys = jax.random.split(key, 7)

    emb = jax.random.normal(keys[0], (V, E), jnp.float32).at[0].set(0.0)  # padding_idx=0

    k_rnn = 1.0 / np.sqrt(H)
    w_ih = jax.random.uniform(keys[1], (2, 3 * H, E), jnp.float32, -k_rnn, k_rnn)
    w_hh = jax.random.uniform(keys[2], (2, 3 * H, H), jnp.float32, -k_rnn, k_rnn)
    b_ih = jax.random.uniform(keys[3], (2, 3 * H), jnp.float32, -k_rnn, k_rnn)
    b_hh = jax.random.uniform(keys[4], (2, 3 * H), jnp.float32, -k_rnn, k_rnn)

    k_fc = 1.0 / np.sqrt(2 * H)
    fc_w = jax.random.uniform(keys[5], (H, 2 * H), jnp.float32, -k_fc, k_fc)
    fc_b = jax.random.uniform(keys[6], (1, H), jnp.float32, -k_fc, k_fc)

    # ---- pack into the kernel's gate-major / direction-minor wide layout ----
    # columns: [ r_f | r_b | z_f | z_b | n_f | n_b ]  (each block H wide)
    wih_bd = jnp.zeros((2 * E, 6 * H), jnp.float32)   # rows 0:E fwd, E:2E bwd
    whh_bd = jnp.zeros((2 * H, 6 * H), jnp.float32)   # rows 0:H fwd, H:2H bwd
    bih_w = jnp.zeros((1, 6 * H), jnp.float32)
    bhh_w = jnp.zeros((1, 6 * H), jnp.float32)
    for d in range(2):           # 0 = forward, 1 = backward
        for g in range(3):       # r, z, n (PyTorch gate order)
            c0 = g * 2 * H + d * H
            wih_bd = wih_bd.at[d * E:(d + 1) * E, c0:c0 + H].set(
                w_ih[d, g * H:(g + 1) * H, :].T)
            whh_bd = whh_bd.at[d * H:(d + 1) * H, c0:c0 + H].set(
                w_hh[d, g * H:(g + 1) * H, :].T)
            bih_w = bih_w.at[0, c0:c0 + H].set(b_ih[d, g * H:(g + 1) * H])
            bhh_w = bhh_w.at[0, c0:c0 + H].set(b_hh[d, g * H:(g + 1) * H])

    return {
        "embedding": emb,
        # packed kernel parameters
        "wih_bd": wih_bd, "bih_w": bih_w,
        "whh_bd": whh_bd, "bhh_w": bhh_w,
        "fc_w_t": fc_w.T, "fc_b": fc_b,
        # raw PyTorch-layout weights (used only by the pure-JAX reference)
        "w_ih": w_ih, "w_hh": w_hh, "b_ih": b_ih, "b_hh": b_hh, "fc_w": fc_w,
    }


if __name__ == "__main__":
    key = jax.random.PRNGKey(0)
    k_p, k_x = jax.random.split(key)
    params = init_params(k_p)

    # token ids in [1, INPUT_SIZE); shape (seq_len, batch) -- batch_first=False
    x_tokens = jax.random.randint(k_x, (SEQ_LEN, BATCH), 1, INPUT_SIZE,
                                  dtype=jnp.int32)

    output, hidden = jax.jit(encoder_forward)(params, x_tokens)
    jax.block_until_ready((output, hidden))

    out_ref, hid_ref = jax.jit(encoder_forward_ref)(params, x_tokens)
    jax.block_until_ready((out_ref, hid_ref))

    assert output.shape == (SEQ_LEN, BATCH, 2 * HIDDEN)
    assert hidden.shape == (BATCH, HIDDEN)
    np.testing.assert_allclose(np.asarray(output), np.asarray(out_ref),
                               rtol=2e-3, atol=2e-3)
    np.testing.assert_allclose(np.asarray(hidden), np.asarray(hid_ref),
                               rtol=2e-3, atol=2e-3)
    print("KERNEL_OK")
</pallas_src>

<mosaic_0001>
module attributes {stable_mosaic.version = 11 : i64} {
  func.func @encoder_gru_kernel(%arg0: memref<16x64xf32, #tpu.memory_space<vmem>>, %arg1: memref<64x192xf32, #tpu.memory_space<vmem>>, %arg2: memref<1x192xf32, #tpu.memory_space<vmem>>, %arg3: memref<64x192xf32, #tpu.memory_space<vmem>>, %arg4: memref<1x192xf32, #tpu.memory_space<vmem>>, %arg5: memref<64x32xf32, #tpu.memory_space<vmem>>, %arg6: memref<1x32xf32, #tpu.memory_space<vmem>>, %arg7: memref<8x2x64xf32, #tpu.memory_space<vmem>>, %arg8: memref<2x32xf32, #tpu.memory_space<vmem>>) attributes {dimension_semantics = [], scalar_prefetch = 0 : i64, scratch_operands = 0 : i64, tpu.core_type = #tpu.core_type<tc>} {
    %c0 = arith.constant 0 : index
    %c0_0 = arith.constant 0 : index
    %0 = vector.load %arg0[%c0, %c0_0] : memref<16x64xf32, #tpu.memory_space<vmem>>, vector<16x64xf32>
    %c0_1 = arith.constant 0 : index
    %c0_2 = arith.constant 0 : index
    %1 = vector.load %arg1[%c0_1, %c0_2] : memref<64x192xf32, #tpu.memory_space<vmem>>, vector<64x192xf32>
    %cst = arith.constant dense<0.000000e+00> : vector<16x192xf32>
    %2 = tpu.matmul %0, %1, %cst {dimension_numbers = #tpu.dot_dimension_numbers<[1], [0], [0], [1], [0, 0, 1, 1], [], []>, precision = #tpu.contract_precision<fp32>} : vector<16x64xf32>, vector<64x192xf32>, vector<16x192xf32> -> vector<16x192xf32>
    %c0_3 = arith.constant 0 : index
    %c0_4 = arith.constant 0 : index
    %3 = vector.load %arg2[%c0_3, %c0_4] : memref<1x192xf32, #tpu.memory_space<vmem>>, vector<1x192xf32>
    %4 = vector.broadcast %3 : vector<1x192xf32> to vector<16x192xf32>
    %5 = arith.addf %2, %4 : vector<16x192xf32>
    %c0_5 = arith.constant 0 : index
    %c0_6 = arith.constant 0 : index
    %6 = vector.load %arg3[%c0_5, %c0_6] : memref<64x192xf32, #tpu.memory_space<vmem>>, vector<64x192xf32>
    %c0_7 = arith.constant 0 : index
    %c0_8 = arith.constant 0 : index
    %7 = vector.load %arg4[%c0_7, %c0_8] : memref<1x192xf32, #tpu.memory_space<vmem>>, vector<1x192xf32>
    %cst_9 = arith.constant 0.000000e+00 : f32
    %8 = vector.broadcast %cst_9 : f32 to vector<2x64xf32>
    %9 = vector.extract_strided_slice %5 {offsets = [0, 0], sizes = [2, 192], strides = [1, 1]} : vector<16x192xf32> to vector<2x192xf32>
    %cst_10 = arith.constant dense<0.000000e+00> : vector<2x192xf32>
    %10 = tpu.matmul %8, %6, %cst_10 {dimension_numbers = #tpu.dot_dimension_numbers<[1], [0], [0], [1], [0, 0, 1, 1], [], []>, precision = #tpu.contract_precision<fp32>} : vector<2x64xf32>, vector<64x192xf32>, vector<2x192xf32> -> vector<2x192xf32>
    %11 = vector.broadcast %7 : vector<1x192xf32> to vector<2x192xf32>
    %12 = arith.addf %10, %11 : vector<2x192xf32>
    %13 = vector.extract_strided_slice %9 {offsets = [0, 0], sizes = [2, 64], strides = [1, 1]} : vector<2x192xf32> to vector<2x64xf32>
    %14 = vector.extract_strided_slice %12 {offsets = [0, 0], sizes = [2, 64], strides = [1, 1]} : vector<2x192xf32> to vector<2x64xf32>
    %15 = arith.addf %13, %14 : vector<2x64xf32>
    %16 = arith.negf %15 : vector<2x64xf32>
    %17 = math.exp %16 : vector<2x64xf32>
    %cst_11 = arith.constant 1.000000e+00 : f32
    %18 = vector.broadcast %cst_11 : f32 to vector<2x64xf32>
    %19 = arith.addf %18, %17 : vector<2x64xf32>
    %20 = arith.divf %18, %19 : vector<2x64xf32>
    %21 = vector.extract_strided_slice %9 {offsets = [0, 64], sizes = [2, 64], strides = [1, 1]} : vector<2x192xf32> to vector<2x64xf32>
    %22 = vector.extract_strided_slice %12 {offsets = [0, 64], sizes = [2, 64], strides = [1, 1]} : vector<2x192xf32> to vector<2x64xf32>
    %23 = arith.addf %21, %22 : vector<2x64xf32>
    %24 = arith.negf %23 : vector<2x64xf32>
    %25 = math.exp %24 : vector<2x64xf32>
    %cst_12 = arith.constant 1.000000e+00 : f32
    %26 = vector.broadcast %cst_12 : f32 to vector<2x64xf32>
    %27 = arith.addf %26, %25 : vector<2x64xf32>
    %28 = arith.divf %26, %27 : vector<2x64xf32>
    %29 = vector.extract_strided_slice %9 {offsets = [0, 128], sizes = [2, 64], strides = [1, 1]} : vector<2x192xf32> to vector<2x64xf32>
    %30 = vector.extract_strided_slice %12 {offsets = [0, 128], sizes = [2, 64], strides = [1, 1]} : vector<2x192xf32> to vector<2x64xf32>
    %31 = arith.mulf %20, %30 : vector<2x64xf32>
    %32 = arith.addf %29, %31 : vector<2x64xf32>
    %33 = math.tanh %32 : vector<2x64xf32>
    %cst_13 = arith.constant 1.000000e+00 : f32
    %34 = vector.broadcast %cst_13 : f32 to vector<2x64xf32>
    %35 = arith.subf %34, %28 : vector<2x64xf32>
    %36 = arith.mulf %35, %33 : vector<2x64xf32>
    %37 = arith.mulf %28, %8 : vector<2x64xf32>
    %38 = arith.addf %36, %37 : vector<2x64xf32>
    %39 = vector.extract_strided_slice %5 {offsets = [2, 0], sizes = [2, 192], strides = [1, 1]} : vector<16x192xf32> to vector<2x192xf32>
    %cst_14 = arith.constant dense<0.000000e+00> : vector<2x192xf32>
    %40 = tpu.matmul %38, %6, %cst_14 {dimension_numbers = #tpu.dot_dimension_numbers<[1], [0], [0], [1], [0, 0, 1, 1], [], []>, precision = #tpu.contract_precision<fp32>} : vector<2x64xf32>, vector<64x192xf32>, vector<2x192xf32> -> vector<2x192xf32>
    %41 = vector.broadcast %7 : vector<1x192xf32> to vector<2x192xf32>
    %42 = arith.addf %40, %41 : vector<2x192xf32>
    %43 = vector.extract_strided_slice %39 {offsets = [0, 0], sizes = [2, 64], strides = [1, 1]} : vector<2x192xf32> to vector<2x64xf32>
    %44 = vector.extract_strided_slice %42 {offsets = [0, 0], sizes = [2, 64], strides = [1, 1]} : vector<2x192xf32> to vector<2x64xf32>
    %45 = arith.addf %43, %44 : vector<2x64xf32>
    %46 = arith.negf %45 : vector<2x64xf32>
    %47 = math.exp %46 : vector<2x64xf32>
    %cst_15 = arith.constant 1.000000e+00 : f32
    %48 = vector.broadcast %cst_15 : f32 to vector<2x64xf32>
    %49 = arith.addf %48, %47 : vector<2x64xf32>
    %50 = arith.divf %48, %49 : vector<2x64xf32>
    %51 = vector.extract_strided_slice %39 {offsets = [0, 64], sizes = [2, 64], strides = [1, 1]} : vector<2x192xf32> to vector<2x64xf32>
    %52 = vector.extract_strided_slice %42 {offsets = [0, 64], sizes = [2, 64], strides = [1, 1]} : vector<2x192xf32> to vector<2x64xf32>
    %53 = arith.addf %51, %52 : vector<2x64xf32>
    %54 = arith.negf %53 : vector<2x64xf32>
    %55 = math.exp %54 : vector<2x64xf32>
    %cst_16 = arith.constant 1.000000e+00 : f32
    %56 = vector.broadcast %cst_16 : f32 to vector<2x64xf32>
    %57 = arith.addf %56, %55 : vector<2x64xf32>
    %58 = arith.divf %56, %57 : vector<2x64xf32>
    %59 = vector.extract_strided_slice %39 {offsets = [0, 128], sizes = [2, 64], strides = [1, 1]} : vector<2x192xf32> to vector<2x64xf32>
    %60 = vector.extract_strided_slice %42 {offsets = [0, 128], sizes = [2, 64], strides = [1, 1]} : vector<2x192xf32> to vector<2x64xf32>
    %61 = arith.mulf %50, %60 : vector<2x64xf32>
    %62 = arith.addf %59, %61 : vector<2x64xf32>
    %63 = math.tanh %62 : vector<2x64xf32>
    %cst_17 = arith.constant 1.000000e+00 : f32
    %64 = vector.broadcast %cst_17 : f32 to vector<2x64xf32>
    %65 = arith.subf %64, %58 : vector<2x64xf32>
    %66 = arith.mulf %65, %63 : vector<2x64xf32>
    %67 = arith.mulf %58, %38 : vector<2x64xf32>
    %68 = arith.addf %66, %67 : vector<2x64xf32>
    %69 = vector.extract_strided_slice %5 {offsets = [4, 0], sizes = [2, 192], strides = [1, 1]} : vector<16x192xf32> to vector<2x192xf32>
    %cst_18 = arith.constant dense<0.000000e+00> : vector<2x192xf32>
    %70 = tpu.matmul %68, %6, %cst_18 {dimension_numbers = #tpu.dot_dimension_numbers<[1], [0], [0], [1], [0, 0, 1, 1], [], []>, precision = #tpu.contract_precision<fp32>} : vector<2x64xf32>, vector<64x192xf32>, vector<2x192xf32> -> vector<2x192xf32>
    %71 = vector.broadcast %7 : vector<1x192xf32> to vector<2x192xf32>
    %72 = arith.addf %70, %71 : vector<2x192xf32>
    %73 = vector.extract_strided_slice %69 {offsets = [0, 0], sizes = [2, 64], strides = [1, 1]} : vector<2x192xf32> to vector<2x64xf32>
    %74 = vector.extract_strided_slice %72 {offsets = [0, 0], sizes = [2, 64], strides = [1, 1]} : vector<2x192xf32> to vector<2x64xf32>
    %75 = arith.addf %73, %74 : vector<2x64xf32>
    %76 = arith.negf %75 : vector<2x64xf32>
    %77 = math.exp %76 : vector<2x64xf32>
    %cst_19 = arith.constant 1.000000e+00 : f32
    %78 = vector.broadcast %cst_19 : f32 to vector<2x64xf32>
    %79 = arith.addf %78, %77 : vector<2x64xf32>
    %80 = arith.divf %78, %79 : vector<2x64xf32>
    %81 = vector.extract_strided_slice %69 {offsets = [0, 64], sizes = [2, 64], strides = [1, 1]} : vector<2x192xf32> to vector<2x64xf32>
    %82 = vector.extract_strided_slice %72 {offsets = [0, 64], sizes = [2, 64], strides = [1, 1]} : vector<2x192xf32> to vector<2x64xf32>
    %83 = arith.addf %81, %82 : vector<2x64xf32>
    %84 = arith.negf %83 : vector<2x64xf32>
    %85 = math.exp %84 : vector<2x64xf32>
    %cst_20 = arith.constant 1.000000e+00 : f32
    %86 = vector.broadcast %cst_20 : f32 to vector<2x64xf32>
    %87 = arith.addf %86, %85 : vector<2x64xf32>
    %88 = arith.divf %86, %87 : vector<2x64xf32>
    %89 = vector.extract_strided_slice %69 {offsets = [0, 128], sizes = [2, 64], strides = [1, 1]} : vector<2x192xf32> to vector<2x64xf32>
    %90 = vector.extract_strided_slice %72 {offsets = [0, 128], sizes = [2, 64], strides = [1, 1]} : vector<2x192xf32> to vector<2x64xf32>
    %91 = arith.mulf %80, %90 : vector<2x64xf32>
    %92 = arith.addf %89, %91 : vector<2x64xf32>
    %93 = math.tanh %92 : vector<2x64xf32>
    %cst_21 = arith.constant 1.000000e+00 : f32
    %94 = vector.broadcast %cst_21 : f32 to vector<2x64xf32>
    %95 = arith.subf %94, %88 : vector<2x64xf32>
    %96 = arith.mulf %95, %93 : vector<2x64xf32>
    %97 = arith.mulf %88, %68 : vector<2x64xf32>
    %98 = arith.addf %96, %97 : vector<2x64xf32>
    %99 = vector.extract_strided_slice %5 {offsets = [6, 0], sizes = [2, 192], strides = [1, 1]} : vector<16x192xf32> to vector<2x192xf32>
    %cst_22 = arith.constant dense<0.000000e+00> : vector<2x192xf32>
    %100 = tpu.matmul %98, %6, %cst_22 {dimension_numbers = #tpu.dot_dimension_numbers<[1], [0], [0], [1], [0, 0, 1, 1], [], []>, precision = #tpu.contract_precision<fp32>} : vector<2x64xf32>, vector<64x192xf32>, vector<2x192xf32> -> vector<2x192xf32>
    %101 = vector.broadcast %7 : vector<1x192xf32> to vector<2x192xf32>
    %102 = arith.addf %100, %101 : vector<2x192xf32>
    %103 = vector.extract_strided_slice %99 {offsets = [0, 0], sizes = [2, 64], strides = [1, 1]} : vector<2x192xf32> to vector<2x64xf32>
    %104 = vector.extract_strided_slice %102 {offsets = [0, 0], sizes = [2, 64], strides = [1, 1]} : vector<2x192xf32> to vector<2x64xf32>
    %105 = arith.addf %103, %104 : vector<2x64xf32>
    %106 = arith.negf %105 : vector<2x64xf32>
    %107 = math.exp %106 : vector<2x64xf32>
    %cst_23 = arith.constant 1.000000e+00 : f32
    %108 = vector.broadcast %cst_23 : f32 to vector<2x64xf32>
    %109 = arith.addf %108, %107 : vector<2x64xf32>
    %110 = arith.divf %108, %109 : vector<2x64xf32>
    %111 = vector.extract_strided_slice %99 {offsets = [0, 64], sizes = [2, 64], strides = [1, 1]} : vector<2x192xf32> to vector<2x64xf32>
    %112 = vector.extract_strided_slice %102 {offsets = [0, 64], sizes = [2, 64], strides = [1, 1]} : vector<2x192xf32> to vector<2x64xf32>
    %113 = arith.addf %111, %112 : vector<2x64xf32>
    %114 = arith.negf %113 : vector<2x64xf32>
    %115 = math.exp %114 : vector<2x64xf32>
    %cst_24 = arith.constant 1.000000e+00 : f32
    %116 = vector.broadcast %cst_24 : f32 to vector<2x64xf32>
    %117 = arith.addf %116, %115 : vector<2x64xf32>
    %118 = arith.divf %116, %117 : vector<2x64xf32>
    %119 = vector.extract_strided_slice %99 {offsets = [0, 128], sizes = [2, 64], strides = [1, 1]} : vector<2x192xf32> to vector<2x64xf32>
    %120 = vector.extract_strided_slice %102 {offsets = [0, 128], sizes = [2, 64], strides = [1, 1]} : vector<2x192xf32> to vector<2x64xf32>
    %121 = arith.mulf %110, %120 : vector<2x64xf32>
    %122 = arith.addf %119, %121 : vector<2x64xf32>
    %123 = math.tanh %122 : vector<2x64xf32>
    %cst_25 = arith.constant 1.000000e+00 : f32
    %124 = vector.broadcast %cst_25 : f32 to vector<2x64xf32>
    %125 = arith.subf %124, %118 : vector<2x64xf32>
    %126 = arith.mulf %125, %123 : vector<2x64xf32>
    %127 = arith.mulf %118, %98 : vector<2x64xf32>
    %128 = arith.addf %126, %127 : vector<2x64xf32>
    %129 = vector.extract_strided_slice %5 {offsets = [8, 0], sizes = [2, 192], strides = [1, 1]} : vector<16x192xf32> to vector<2x192xf32>
    %cst_26 = arith.constant dense<0.000000e+00> : vector<2x192xf32>
    %130 = tpu.matmul %128, %6, %cst_26 {dimension_numbers = #tpu.dot_dimension_numbers<[1], [0], [0], [1], [0, 0, 1, 1], [], []>, precision = #tpu.contract_precision<fp32>} : vector<2x64xf32>, vector<64x192xf32>, vector<2x192xf32> -> vector<2x192xf32>
    %131 = vector.broadcast %7 : vector<1x192xf32> to vector<2x192xf32>
    %132 = arith.addf %130, %131 : vector<2x192xf32>
    %133 = vector.extract_strided_slice %129 {offsets = [0, 0], sizes = [2, 64], strides = [1, 1]} : vector<2x192xf32> to vector<2x64xf32>
    %134 = vector.extract_strided_slice %132 {offsets = [0, 0], sizes = [2, 64], strides = [1, 1]} : vector<2x192xf32> to vector<2x64xf32>
    %135 = arith.addf %133, %134 : vector<2x64xf32>
    %136 = arith.negf %135 : vector<2x64xf32>
    %137 = math.exp %136 : vector<2x64xf32>
    %cst_27 = arith.constant 1.000000e+00 : f32
    %138 = vector.broadcast %cst_27 : f32 to vector<2x64xf32>
    %139 = arith.addf %138, %137 : vector<2x64xf32>
    %140 = arith.divf %138, %139 : vector<2x64xf32>
    %141 = vector.extract_strided_slice %129 {offsets = [0, 64], sizes = [2, 64], strides = [1, 1]} : vector<2x192xf32> to vector<2x64xf32>
    %142 = vector.extract_strided_slice %132 {offsets = [0, 64], sizes = [2, 64], strides = [1, 1]} : vector<2x192xf32> to vector<2x64xf32>
    %143 = arith.addf %141, %142 : vector<2x64xf32>
    %144 = arith.negf %143 : vector<2x64xf32>
    %145 = math.exp %144 : vector<2x64xf32>
    %cst_28 = arith.constant 1.000000e+00 : f32
    %146 = vector.broadcast %cst_28 : f32 to vector<2x64xf32>
    %147 = arith.addf %146, %145 : vector<2x64xf32>
    %148 = arith.divf %146, %147 : vector<2x64xf32>
    %149 = vector.extract_strided_slice %129 {offsets = [0, 128], sizes = [2, 64], strides = [1, 1]} : vector<2x192xf32> to vector<2x64xf32>
    %150 = vector.extract_strided_slice %132 {offsets = [0, 128], sizes = [2, 64], strides = [1, 1]} : vector<2x192xf32> to vector<2x64xf32>
    %151 = arith.mulf %140, %150 : vector<2x64xf32>
    %152 = arith.addf %149, %151 : vector<2x64xf32>
    %153 = math.tanh %152 : vector<2x64xf32>
    %cst_29 = arith.constant 1.000000e+00 : f32
    %154 = vector.broadcast %cst_29 : f32 to vector<2x64xf32>
    %155 = arith.subf %154, %148 : vector<2x64xf32>
    %156 = arith.mulf %155, %153 : vector<2x64xf32>
    %157 = arith.mulf %148, %128 : vector<2x64xf32>
    %158 = arith.addf %156, %157 : vector<2x64xf32>
    %159 = vector.extract_strided_slice %5 {offsets = [10, 0], sizes = [2, 192], strides = [1, 1]} : vector<16x192xf32> to vector<2x192xf32>
    %cst_30 = arith.constant dense<0.000000e+00> : vector<2x192xf32>
    %160 = tpu.matmul %158, %6, %cst_30 {dimension_numbers = #tpu.dot_dimension_numbers<[1], [0], [0], [1], [0, 0, 1, 1], [], []>, precision = #tpu.contract_precision<fp32>} : vector<2x64xf32>, vector<64x192xf32>, vector<2x192xf32> -> vector<2x192xf32>
    %161 = vector.broadcast %7 : vector<1x192xf32> to vector<2x192xf32>
    %162 = arith.addf %160, %161 : vector<2x192xf32>
    %163 = vector.extract_strided_slice %159 {offsets = [0, 0], sizes = [2, 64], strides = [1, 1]} : vector<2x192xf32> to vector<2x64xf32>
    %164 = vector.extract_strided_slice %162 {offsets = [0, 0], sizes = [2, 64], strides = [1, 1]} : vector<2x192xf32> to vector<2x64xf32>
    %165 = arith.addf %163, %164 : vector<2x64xf32>
    %166 = arith.negf %165 : vector<2x64xf32>
    %167 = math.exp %166 : vector<2x64xf32>
    %cst_31 = arith.constant 1.000000e+00 : f32
    %168 = vector.broadcast %cst_31 : f32 to vector<2x64xf32>
    %169 = arith.addf %168, %167 : vector<2x64xf32>
    %170 = arith.divf %168, %169 : vector<2x64xf32>
    %171 = vector.extract_strided_slice %159 {offsets = [0, 64], sizes = [2, 64], strides = [1, 1]} : vector<2x192xf32> to vector<2x64xf32>
    %172 = vector.extract_strided_slice %162 {offsets = [0, 64], sizes = [2, 64], strides = [1, 1]} : vector<2x192xf32> to vector<2x64xf32>
    %173 = arith.addf %171, %172 : vector<2x64xf32>
    %174 = arith.negf %173 : vector<2x64xf32>
    %175 = math.exp %174 : vector<2x64xf32>
    %cst_32 = arith.constant 1.000000e+00 : f32
    %176 = vector.broadcast %cst_32 : f32 to vector<2x64xf32>
    %177 = arith.addf %176, %175 : vector<2x64xf32>
    %178 = arith.divf %176, %177 : vector<2x64xf32>
    %179 = vector.extract_strided_slice %159 {offsets = [0, 128], sizes = [2, 64], strides = [1, 1]} : vector<2x192xf32> to vector<2x64xf32>
    %180 = vector.extract_strided_slice %162 {offsets = [0, 128], sizes = [2, 64], strides = [1, 1]} : vector<2x192xf32> to vector<2x64xf32>
    %181 = arith.mulf %170, %180 : vector<2x64xf32>
    %182 = arith.addf %179, %181 : vector<2x64xf32>
    %183 = math.tanh %182 : vector<2x64xf32>
    %cst_33 = arith.constant 1.000000e+00 : f32
    %184 = vector.broadcast %cst_33 : f32 to vector<2x64xf32>
    %185 = arith.subf %184, %178 : vector<2x64xf32>
    %186 = arith.mulf %185, %183 : vector<2x64xf32>
    %187 = arith.mulf %178, %158 : vector<2x64xf32>
    %188 = arith.addf %186, %187 : vector<2x64xf32>
    %189 = vector.extract_strided_slice %5 {offsets = [12, 0], sizes = [2, 192], strides = [1, 1]} : vector<16x192xf32> to vector<2x192xf32>
    %cst_34 = arith.constant dense<0.000000e+00> : vector<2x192xf32>
    %190 = tpu.matmul %188, %6, %cst_34 {dimension_numbers = #tpu.dot_dimension_numbers<[1], [0], [0], [1], [0, 0, 1, 1], [], []>, precision = #tpu.contract_precision<fp32>} : vector<2x64xf32>, vector<64x192xf32>, vector<2x192xf32> -> vector<2x192xf32>
    %191 = vector.broadcast %7 : vector<1x192xf32> to vector<2x192xf32>
    %192 = arith.addf %190, %191 : vector<2x192xf32>
    %193 = vector.extract_strided_slice %189 {offsets = [0, 0], sizes = [2, 64], strides = [1, 1]} : vector<2x192xf32> to vector<2x64xf32>
    %194 = vector.extract_strided_slice %192 {offsets = [0, 0], sizes = [2, 64], strides = [1, 1]} : vector<2x192xf32> to vector<2x64xf32>
    %195 = arith.addf %193, %194 : vector<2x64xf32>
    %196 = arith.negf %195 : vector<2x64xf32>
    %197 = math.exp %196 : vector<2x64xf32>
    %cst_35 = arith.constant 1.000000e+00 : f32
    %198 = vector.broadcast %cst_35 : f32 to vector<2x64xf32>
    %199 = arith.addf %198, %197 : vector<2x64xf32>
    %200 = arith.divf %198, %199 : vector<2x64xf32>
    %201 = vector.extract_strided_slice %189 {offsets = [0, 64], sizes = [2, 64], strides = [1, 1]} : vector<2x192xf32> to vector<2x64xf32>
    %202 = vector.extract_strided_slice %192 {offsets = [0, 64], sizes = [2, 64], strides = [1, 1]} : vector<2x192xf32> to vector<2x64xf32>
    %203 = arith.addf %201, %202 : vector<2x64xf32>
    %204 = arith.negf %203 : vector<2x64xf32>
    %205 = math.exp %204 : vector<2x64xf32>
    %cst_36 = arith.constant 1.000000e+00 : f32
    %206 = vector.broadcast %cst_36 : f32 to vector<2x64xf32>
    %207 = arith.addf %206, %205 : vector<2x64xf32>
    %208 = arith.divf %206, %207 : vector<2x64xf32>
    %209 = vector.extract_strided_slice %189 {offsets = [0, 128], sizes = [2, 64], strides = [1, 1]} : vector<2x192xf32> to vector<2x64xf32>
    %210 = vector.extract_strided_slice %192 {offsets = [0, 128], sizes = [2, 64], strides = [1, 1]} : vector<2x192xf32> to vector<2x64xf32>
    %211 = arith.mulf %200, %210 : vector<2x64xf32>
    %212 = arith.addf %209, %211 : vector<2x64xf32>
    %213 = math.tanh %212 : vector<2x64xf32>
    %cst_37 = arith.constant 1.000000e+00 : f32
    %214 = vector.broadcast %cst_37 : f32 to vector<2x64xf32>
    %215 = arith.subf %214, %208 : vector<2x64xf32>
    %216 = arith.mulf %215, %213 : vector<2x64xf32>
    %217 = arith.mulf %208, %188 : vector<2x64xf32>
    %218 = arith.addf %216, %217 : vector<2x64xf32>
    %219 = vector.extract_strided_slice %5 {offsets = [14, 0], sizes = [2, 192], strides = [1, 1]} : vector<16x192xf32> to vector<2x192xf32>
    %cst_38 = arith.constant dense<0.000000e+00> : vector<2x192xf32>
    %220 = tpu.matmul %218, %6, %cst_38 {dimension_numbers = #tpu.dot_dimension_numbers<[1], [0], [0], [1], [0, 0, 1, 1], [], []>, precision = #tpu.contract_precision<fp32>} : vector<2x64xf32>, vector<64x192xf32>, vector<2x192xf32> -> vector<2x192xf32>
    %221 = vector.broadcast %7 : vector<1x192xf32> to vector<2x192xf32>
    %222 = arith.addf %220, %221 : vector<2x192xf32>
    %223 = vector.extract_strided_slice %219 {offsets = [0, 0], sizes = [2, 64], strides = [1, 1]} : vector<2x192xf32> to vector<2x64xf32>
    %224 = vector.extract_strided_slice %222 {offsets = [0, 0], sizes = [2, 64], strides = [1, 1]} : vector<2x192xf32> to vector<2x64xf32>
    %225 = arith.addf %223, %224 : vector<2x64xf32>
    %226 = arith.negf %225 : vector<2x64xf32>
    %227 = math.exp %226 : vector<2x64xf32>
    %cst_39 = arith.constant 1.000000e+00 : f32
    %228 = vector.broadcast %cst_39 : f32 to vector<2x64xf32>
    %229 = arith.addf %228, %227 : vector<2x64xf32>
    %230 = arith.divf %228, %229 : vector<2x64xf32>
    %231 = vector.extract_strided_slice %219 {offsets = [0, 64], sizes = [2, 64], strides = [1, 1]} : vector<2x192xf32> to vector<2x64xf32>
    %232 = vector.extract_strided_slice %222 {offsets = [0, 64], sizes = [2, 64], strides = [1, 1]} : vector<2x192xf32> to vector<2x64xf32>
    %233 = arith.addf %231, %232 : vector<2x64xf32>
    %234 = arith.negf %233 : vector<2x64xf32>
    %235 = math.exp %234 : vector<2x64xf32>
    %cst_40 = arith.constant 1.000000e+00 : f32
    %236 = vector.broadcast %cst_40 : f32 to vector<2x64xf32>
    %237 = arith.addf %236, %235 : vector<2x64xf32>
    %238 = arith.divf %236, %237 : vector<2x64xf32>
    %239 = vector.extract_strided_slice %219 {offsets = [0, 128], sizes = [2, 64], strides = [1, 1]} : vector<2x192xf32> to vector<2x64xf32>
    %240 = vector.extract_strided_slice %222 {offsets = [0, 128], sizes = [2, 64], strides = [1, 1]} : vector<2x192xf32> to vector<2x64xf32>
    %241 = arith.mulf %230, %240 : vector<2x64xf32>
    %242 = arith.addf %239, %241 : vector<2x64xf32>
    %243 = math.tanh %242 : vector<2x64xf32>
    %cst_41 = arith.constant 1.000000e+00 : f32
    %244 = vector.broadcast %cst_41 : f32 to vector<2x64xf32>
    %245 = arith.subf %244, %238 : vector<2x64xf32>
    %246 = arith.mulf %245, %243 : vector<2x64xf32>
    %247 = arith.mulf %238, %218 : vector<2x64xf32>
    %248 = arith.addf %246, %247 : vector<2x64xf32>
    %249 = tpu.iota {dimensions = array<i32: 1>} : vector<2x64xi32>
    %c32_i32 = arith.constant 32 : i32
    %250 = vector.broadcast %c32_i32 : i32 to vector<2x64xi32>
    %251 = arith.cmpi slt, %249, %250 : vector<2x64xi32>
    %252 = arith.select %251, %38, %248 : vector<2x64xi1>, vector<2x64xf32>
    %c0_42 = arith.constant 0 : index
    %c0_43 = arith.constant 0 : index
    %c0_44 = arith.constant 0 : index
    %253 = vector.load %arg7[%c0_42, %c0_43, %c0_44] : memref<8x2x64xf32, #tpu.memory_space<vmem>>, vector<1x2x64xf32>
    %254 = vector.shape_cast %253 : vector<1x2x64xf32> to vector<2x64xf32>
    %255 = vector.shape_cast %252 : vector<2x64xf32> to vector<1x2x64xf32>
    tpu.vector_store %arg7[%c0_42, %c0_43, %c0_44], %255 {strides = array<i32>} : memref<8x2x64xf32, #tpu.memory_space<vmem>>, vector<1x2x64xf32>,
    %256 = arith.select %251, %68, %218 : vector<2x64xi1>, vector<2x64xf32>
    %c1 = arith.constant 1 : index
    %c0_45 = arith.constant 0 : index
    %c0_46 = arith.constant 0 : index
    %257 = vector.load %arg7[%c1, %c0_45, %c0_46] : memref<8x2x64xf32, #tpu.memory_space<vmem>>, vector<1x2x64xf32>
    %258 = vector.shape_cast %257 : vector<1x2x64xf32> to vector<2x64xf32>
    %259 = vector.shape_cast %256 : vector<2x64xf32> to vector<1x2x64xf32>
    tpu.vector_store %arg7[%c1, %c0_45, %c0_46], %259 {strides = array<i32>} : memref<8x2x64xf32, #tpu.memory_space<vmem>>, vector<1x2x64xf32>,
    %260 = arith.select %251, %98, %188 : vector<2x64xi1>, vector<2x64xf32>
    %c2 = arith.constant 2 : index
    %c0_47 = arith.constant 0 : index
    %c0_48 = arith.constant 0 : index
    %261 = vector.load %arg7[%c2, %c0_47, %c0_48] : memref<8x2x64xf32, #tpu.memory_space<vmem>>, vector<1x2x64xf32>
    %262 = vector.shape_cast %261 : vector<1x2x64xf32> to vector<2x64xf32>
    %263 = vector.shape_cast %260 : vector<2x64xf32> to vector<1x2x64xf32>
    tpu.vector_store %arg7[%c2, %c0_47, %c0_48], %263 {strides = array<i32>} : memref<8x2x64xf32, #tpu.memory_space<vmem>>, vector<1x2x64xf32>,
    %264 = arith.select %251, %128, %158 : vector<2x64xi1>, vector<2x64xf32>
    %c3 = arith.constant 3 : index
    %c0_49 = arith.constant 0 : index
    %c0_50 = arith.constant 0 : index
    %265 = vector.load %arg7[%c3, %c0_49, %c0_50] : memref<8x2x64xf32, #tpu.memory_space<vmem>>, vector<1x2x64xf32>
    %266 = vector.shape_cast %265 : vector<1x2x64xf32> to vector<2x64xf32>
    %267 = vector.shape_cast %264 : vector<2x64xf32> to vector<1x2x64xf32>
    tpu.vector_store %arg7[%c3, %c0_49, %c0_50], %267 {strides = array<i32>} : memref<8x2x64xf32, #tpu.memory_space<vmem>>, vector<1x2x64xf32>,
    %268 = arith.select %251, %158, %128 : vector<2x64xi1>, vector<2x64xf32>
    %c4 = arith.constant 4 : index
    %c0_51 = arith.constant 0 : index
    %c0_52 = arith.constant 0 : index
    %269 = vector.load %arg7[%c4, %c0_51, %c0_52] : memref<8x2x64xf32, #tpu.memory_space<vmem>>, vector<1x2x64xf32>
    %270 = vector.shape_cast %269 : vector<1x2x64xf32> to vector<2x64xf32>
    %271 = vector.shape_cast %268 : vector<2x64xf32> to vector<1x2x64xf32>
    tpu.vector_store %arg7[%c4, %c0_51, %c0_52], %271 {strides = array<i32>} : memref<8x2x64xf32, #tpu.memory_space<vmem>>, vector<1x2x64xf32>,
    %272 = arith.select %251, %188, %98 : vector<2x64xi1>, vector<2x64xf32>
    %c5 = arith.constant 5 : index
    %c0_53 = arith.constant 0 : index
    %c0_54 = arith.constant 0 : index
    %273 = vector.load %arg7[%c5, %c0_53, %c0_54] : memref<8x2x64xf32, #tpu.memory_space<vmem>>, vector<1x2x64xf32>
    %274 = vector.shape_cast %273 : vector<1x2x64xf32> to vector<2x64xf32>
    %275 = vector.shape_cast %272 : vector<2x64xf32> to vector<1x2x64xf32>
    tpu.vector_store %arg7[%c5, %c0_53, %c0_54], %275 {strides = array<i32>} : memref<8x2x64xf32, #tpu.memory_space<vmem>>, vector<1x2x64xf32>,
    %276 = arith.select %251, %218, %68 : vector<2x64xi1>, vector<2x64xf32>
    %c6 = arith.constant 6 : index
    %c0_55 = arith.constant 0 : index
    %c0_56 = arith.constant 0 : index
    %277 = vector.load %arg7[%c6, %c0_55, %c0_56] : memref<8x2x64xf32, #tpu.memory_space<vmem>>, vector<1x2x64xf32>
    %278 = vector.shape_cast %277 : vector<1x2x64xf32> to vector<2x64xf32>
    %279 = vector.shape_cast %276 : vector<2x64xf32> to vector<1x2x64xf32>
    tpu.vector_store %arg7[%c6, %c0_55, %c0_56], %279 {strides = array<i32>} : memref<8x2x64xf32, #tpu.memory_space<vmem>>, vector<1x2x64xf32>,
    %280 = arith.select %251, %248, %38 : vector<2x64xi1>, vector<2x64xf32>
    %c7 = arith.constant 7 : index
    %c0_57 = arith.constant 0 : index
    %c0_58 = arith.constant 0 : index
    %281 = vector.load %arg7[%c7, %c0_57, %c0_58] : memref<8x2x64xf32, #tpu.memory_space<vmem>>, vector<1x2x64xf32>
    %282 = vector.shape_cast %281 : vector<1x2x64xf32> to vector<2x64xf32>
    %283 = vector.shape_cast %280 : vector<2x64xf32> to vector<1x2x64xf32>
    tpu.vector_store %arg7[%c7, %c0_57, %c0_58], %283 {strides = array<i32>} : memref<8x2x64xf32, #tpu.memory_space<vmem>>, vector<1x2x64xf32>,
    %c0_59 = arith.constant 0 : index
    %c0_60 = arith.constant 0 : index
    %284 = vector.load %arg5[%c0_59, %c0_60] : memref<64x32xf32, #tpu.memory_space<vmem>>, vector<64x32xf32>
    %cst_61 = arith.constant dense<0.000000e+00> : vector<2x32xf32>
    %285 = tpu.matmul %248, %284, %cst_61 {dimension_numbers = #tpu.dot_dimension_numbers<[1], [0], [0], [1], [0, 0, 1, 1], [], []>, precision = #tpu.contract_precision<fp32>} : vector<2x64xf32>, vector<64x32xf32>, vector<2x32xf32> -> vector<2x32xf32>
    %c0_62 = arith.constant 0 : index
    %c0_63 = arith.constant 0 : index
    %286 = vector.load %arg6[%c0_62, %c0_63] : memref<1x32xf32, #tpu.memory_space<vmem>>, vector<1x32xf32>
    %287 = vector.broadcast %286 : vector<1x32xf32> to vector<2x32xf32>
    %288 = arith.addf %285, %287 : vector<2x32xf32>
    %289 = math.tanh %288 : vector<2x32xf32>
    %c0_64 = arith.constant 0 : index
    %c0_65 = arith.constant 0 : index
    %290 = vector.load %arg8[%c0_64, %c0_65] : memref<2x32xf32, #tpu.memory_space<vmem>>, vector<2x32xf32>
    tpu.vector_store %arg8[%c0_64, %c0_65], %289 {strides = array<i32>} : memref<2x32xf32, #tpu.memory_space<vmem>>, vector<2x32xf32>,
    return
  }
}

</mosaic_0001>

<bundles_post_ra>
// kernel: encoder_forward.1
= control target key start
LH: loop header
LB: loop body
LE: loop exit
PB: predicated region body
PF: predicated region fallthrough
CT: control target
= control target key end

     0   :  { %14 = vsyncpa [#allocation3], 0  ;;  %vm54_vm0 = vcmask 523264   ;;  %s6932_s0 = inlined_call_operand.vmem [shape: f32[16,64], index: 0, kind: input, shape index: {}]   ;;  %s6933_s1 = inlined_call_operand.vmem [shape: f32[64,192], index: 1, kind: input, shape index: {}]   ;;  %s6934_s2 = inlined_call_operand.vmem [shape: f32[1,192], index: 2, kind: input, shape index: {}]   ;;  %s6935_s3 = inlined_call_operand.vmem [shape: f32[64,192], index: 3, kind: input, shape index: {}]   ;;  %s6936_s4 = inlined_call_operand.vmem [shape: f32[1,192], index: 4, kind: input, shape index: {}]   ;;  %s6937_s5 = inlined_call_operand.vmem [shape: f32[64,32], index: 5, kind: input, shape index: {}]   ;;  %s6938_s6 = inlined_call_operand.vmem [shape: f32[1,32], index: 6, kind: input, shape index: {}]   ;;  %s6939_s7 = inlined_call_operand.hbm [shape: f32[8,2,64], index: 7, kind: output, shape index: {0}]   ;;  %s6940_s8 = inlined_call_operand.hbm [shape: f32[2,32], index: 8, kind: output, shape index: {1}]  }
   0x1   :  { %v46_v0 = vld [vmem:[%s6933_s1 + $0x70] sm:$0xff]  ;;  %v44_v1 = vld [vmem:[%s6933_s1 + $0x60] sm:$0xff] }
   0x2   :  { %v42_v2 = vld [vmem:[%s6933_s1 + $0x50] sm:$0xff]  ;;  %v5255_v3 = vand.u32 4294901760, %v46_v0  ;;  %v5257_v4 = vand.u32 4294901760, %v44_v1  ;;  %v40_v6 = vld [vmem:[%s6933_s1 + $0x40] sm:$0xff] }
   0x3   :  { %v5259_v5 = vand.u32 4294901760, %v42_v2  ;;  %v38_v7 = vld [vmem:[%s6933_s1 + $0x30] sm:$0xff]  ;;  %v36_v8 = vld [vmem:[%s6933_s1 + $0x20] sm:$0xff]  ;;  %v5270_v9 = vand.u32 4294901760, %v40_v6 }
   0x4   :  { %v5272_v10 = vand.u32 4294901760, %v38_v7  ;;  %v5274_v11 = vand.u32 4294901760, %v36_v8  ;;  %v34_v12 = vld [vmem:[%s6933_s1 + $0x10] sm:$0xff]  ;;  %v32_v13 = vld [vmem:[%s6933_s1] sm:$0xff]  ;;  %70 = vmatpush.msra.mxu0 %v5255_v3  ;;  %v5284_v14 = vsub.f32 %v46_v0, %v5255_v3  ;;  %v5287_v15 = vsub.f32 %v44_v1, %v5257_v4  ;;  %219 = vmatpush.msra.mxu3 %v5255_v3 }
   0x5   :  { %v5291_v16 = vsub.f32 %v42_v2, %v5259_v5  ;;  %v5293_v17 = vand.u32 4294901760, %v34_v12  ;;  %v30_v18 = vld [vmem:[%s6932_s0] sm:$0xff]  ;;  %v5299_v19 = vsub.f32 %v40_v6, %v5270_v9  ;;  %v5307_v22 = vand.u32 4294901760, %v32_v13 }
   0x6   :  { %v5302_v20 = vsub.f32 %v38_v7, %v5272_v10  ;;  %v5305_v21 = vsub.f32 %v36_v8, %v5274_v11  ;;  %72 = vmatpush.msra.mxu0 %v5257_v4  ;;  %177 = vmatpush.msra.mxu2 %v5284_v14  ;;  %v112_v23 = vand.u32 4294901760, %v5284_v14  ;;  %v118_v24 = vand.u32 4294901760, %v5287_v15 }
   0x7   :  { %v124_v25 = vand.u32 4294901760, %v5291_v16  ;;  %v5315_v26 = vsub.f32 %v34_v12, %v5293_v17  ;;  %221 = vmatpush.msra.mxu3 %v5257_v4  ;;  %v130_v27 = vand.u32 4294901760, %v5299_v19  ;;  %v56_v29 = vsel %vm54_vm0, %v30_v18, 0 }
   0x8   :  { %v136_v28 = vand.u32 4294901760, %v5302_v20  ;;  %v142_v30 = vand.u32 4294901760, %v5305_v21  ;;  %74 = vmatpush.msra.mxu0 %v5259_v5  ;;  %180 = vmatpush.msra.mxu2 %v5287_v15  ;;  %v113_v31 = vsub.f32 %v5284_v14, %v112_v23  ;;  %v119_v32 = vsub.f32 %v5287_v15, %v118_v24 }
   0x9   :  { %v125_v33 = vsub.f32 %v5291_v16, %v124_v25  ;;  %v5333_v34 = vand.u32 4294901760, %v56_v29 }
   0xa   :  { %15 = vsyncpa [#allocation5], 0  ;;  %223 = vmatpush.msra.mxu3 %v5259_v5  ;;  %v131_v35 = vsub.f32 %v5299_v19, %v130_v27  ;;  %v5340_v36 = vsub.f32 %v32_v13, %v5307_v22  ;;  %v47_v37 = vld [vmem:[%s6933_s1 + $0x78] sm:$0xff]  ;;  %v45_v38 = vld [vmem:[%s6933_s1 + $0x68] sm:$0xff]  ;;  %76 = vmatpush.msra.mxu0 %v5270_v9  ;;  %v114_v39 = vand.u32 4294901760, %v113_v31  ;;  %v120_v40 = vand.u32 4294901760, %v119_v32 }
   0xb   :  { %183 = vmatpush.msra.mxu2 %v5291_v16  ;;  %v5351_v41 = vsub.f32 %v56_v29, %v5333_v34  ;;  %v43_v42 = vld [vmem:[%s6933_s1 + $0x58] sm:$0xff]  ;;  %v31_v43 = vld [vmem:[%s6932_s0 + $0x8] sm:$0xff]  ;;  %v137_v44 = vsub.f32 %v5302_v20, %v136_v28  ;;  %v143_v45 = vsub.f32 %v5305_v21, %v142_v30  ;;  %v148_v46 = vand.u32 4294901760, %v5315_v26  ;;  %s5050_s20 = sshll.u32 %s6939_s7, 4  ;;  %s5197_s21 = smov [#allocation2]   ;;  %s5051_s20 = int_to_ptr.hbm [resolvable:$true] %s5050_s20 }
   0xc   :  { %225 = vmatpush.msra.mxu3 %v5270_v9  ;;  %v41_v47 = vld [vmem:[%s6933_s1 + $0x48] sm:$0xff]  ;;  %115 = vmatpush.msra.mxu1 %v114_v39  ;;  %v126_v48 = vand.u32 4294901760, %v125_v33  ;;  %v5374_v50 = vand.u32 4294901760, %v47_v37  ;;  %v5376_v51 = vand.u32 4294901760, %v45_v38  ;;  %v132_v52 = vand.u32 4294901760, %v131_v35  ;;  %v39_v56 = vld [vmem:[%s6933_s1 + $0x38] sm:$0xff] }
   0xd   :  { %78 = vmatpush.msra.mxu0 %v5272_v10  ;;  %v5372_v49 = vand.u32 4294901760, %v5351_v41  ;;  %186 = vmatpush.msra.mxu2 %v5299_v19  ;;  %v154_v53 = vand.u32 4294901760, %v5340_v36  ;;  %v5381_v54 = vand.u32 4294901760, %v43_v42  ;;  %v59_v55 = vsel %vm54_vm0, %v31_v43, 0  ;;  %v37_v8 = vld [vmem:[%s6933_s1 + $0x28] sm:$0xff]  ;;  %v35_v33 = vld [vmem:[%s6933_s1 + $0x18] sm:$0xff] }
   0xe   :  { %227 = vmatpush.msra.mxu3 %v5272_v10  ;;  %121 = vmatpush.msra.mxu1 %v120_v40  ;;  %v5391_v58 = vsub.f32 %v47_v37, %v5374_v50  ;;  %v5393_v59 = vand.u32 4294901760, %v59_v55  ;;  %v5395_v60 = vand.u32 4294901760, %v41_v47  ;;  %v138_v61 = vand.u32 4294901760, %v137_v44  ;;  %v33_v40 = vld [vmem:[%s6933_s1 + $0x8] sm:$0xff]  ;;  %s5048_s22 = sshll.u32 %s5197_s21, 4  ;;  %s5198_s23 = smov 32   ;;  %s5049_s22 = int_to_ptr.vmem [resolvable:$true] %s5048_s22 }
   0xf   :  { %80 = vmatpush.msra.mxu0 %v5274_v11  ;;  %v88_v57 = vsub.f32 %v5351_v41, %v5372_v49  ;;  %189 = vmatpush.msra.mxu2 %v5302_v20  ;;  %v149_v62 = vsub.f32 %v5315_v26, %v148_v46  ;;  %v5403_v63 = vsub.f32 %v45_v38, %v5376_v51  ;;  %v5415_v7 = vand.u32 4294901760, %v39_v56  ;;  %s5199_s24 = smov 2   ;;  %s5200_s7 = smov [#allocation4]  }
  0x10   :  { %229 = vmatpush.msra.mxu3 %v5274_v11  ;;  %v5406_v0 = vsub.f32 %v43_v42, %v5381_v54  ;;  %127 = vmatpush.msra.mxu1 %v126_v48  ;;  %v380_v2 = vand.u32 4294901760, %v5391_v58  ;;  %v5413_v6 = vsub.f32 %v59_v55, %v5393_v59  ;;  %v144_v12 = vand.u32 4294901760, %v143_v45  ;;  %s5062_s26 = sshll.u32 %s5200_s7, 4  ;;  %s5063_s26 = int_to_ptr.vmem [resolvable:$true] %s5062_s26 }
  0x11   :  { %82 = vmatpush.msra.mxu0 %v5293_v17  ;;  %v5409_v1 = vand.u32 4294901760, %v88_v57  ;;  %192 = vmatpush.msra.mxu2 %v5305_v21  ;;  %v386_v13 = vand.u32 4294901760, %v5403_v63  ;;  %v155_v18 = vsub.f32 %v5340_v36, %v154_v53  ;;  %v5434_v32 = vsub.f32 %v41_v47, %v5395_v60 }
  0x12   :  { %231 = vmatpush.msra.mxu3 %v5293_v17  ;;  %133 = vmatpush.msra.mxu1 %v132_v52  ;;  %v381_v29 = vsub.f32 %v5391_v58, %v380_v2  ;;  %v5431_v31 = vand.u32 4294901760, %v5413_v6  ;;  %v392_v35 = vand.u32 4294901760, %v5406_v0  ;;  %v5442_v37 = vand.u32 4294901760, %v37_v8 }
  0x13   :  { %84 = vmatpush.msra.mxu0 %v5307_v22  ;;  %195 = vmatpush.msra.mxu2 %v5315_v26  ;;  %v150_v38 = vand.u32 4294901760, %v149_v62  ;;  %v5447_v39 = vsub.f32 %v39_v56, %v5415_v7  ;;  %v387_v42 = vsub.f32 %v5403_v63, %v386_v13  ;;  %v156_v43 = vand.u32 4294901760, %v155_v18  ;;  %v607_v26 = vld [vmem:[%s6935_s3 + $0x50] sm:$0xff] }
  0x14   :  { %90 = vmatmul.f32.vlgmr.msra.gmra.mxu0 %v5409_v1  ;;  %139 = vmatpush.msra.mxu1 %v138_v61  ;;  %v96_v14 = vsub.f32 %v5413_v6, %v5431_v31  ;;  %v382_v44 = vand.u32 4294901760, %v381_v29  ;;  %v398_v45 = vand.u32 4294901760, %v5434_v32  ;;  %v393_v47 = vsub.f32 %v5406_v0, %v392_v35 }
  0x15   :  { %258 = vmatpush.msrb.mxu0 %v112_v23  ;;  %198 = vmatpush.msra.mxu2 %v5340_v36  ;;  %v5459_v23 = vand.u32 4294901760, %v35_v33  ;;  %v5470_v48 = vsub.f32 %v37_v8, %v5442_v37  ;;  %v5472_v52 = vand.u32 4294901760, %v33_v40  ;;  %v404_v55 = vand.u32 4294901760, %v5447_v39 }
  0x16   :  { %233 = vmatpush.msra.mxu3 %v5307_v22  ;;  %145 = vmatpush.msra.mxu1 %v144_v12  ;;  %v388_v15 = vand.u32 4294901760, %v387_v42  ;;  %v399_v57 = vsub.f32 %v5434_v32, %v398_v45  ;;  %v394_v16 = vand.u32 4294901760, %v393_v47  ;;  %v5571_v36 = vand.u32 4294901760, %v607_v26 }
  0x17   :  { %201 = vmatmul.f32.vlgmr.msra.gmra.mxu2 %v5351_v41  ;;  %262 = vmatpush.msrb.mxu0 %v118_v24  ;;  %v5479_v24 = vand.u32 4294901760, %v96_v14  ;;  %v5482_v56 = vsub.f32 %v35_v33, %v5459_v23  ;;  %v5492_v61 = vsub.f32 %v33_v40, %v5472_v52  ;;  %v405_v62 = vsub.f32 %v5447_v39, %v404_v55 }
  0x18   :  { %338 = vmatpush.msrb.mxu2 %v5374_v50  ;;  %151 = vmatpush.msra.mxu1 %v150_v38  ;;  %7041 = vst [vmem:[#allocation8_spill] sm:$0xff] %v5571_v36 }
  0x19   :  { %237 = vmatmul.f32.vlgmr.msra.gmra.mxu3 %v5372_v49  ;;  %266 = vmatpush.msrb.mxu0 %v124_v25  ;;  %v410_v25 = vand.u32 4294901760, %v5470_v48  ;;  %v416_v19 = vand.u32 4294901760, %v5482_v56  ;;  %v422_v8 = vand.u32 4294901760, %v5492_v61  ;;  %v406_v12 = vand.u32 4294901760, %v405_v62 }
  0x1a   :  { %340 = vmatpush.msrb.mxu2 %v5376_v51  ;;  %157 = vmatpush.msra.mxu1 %v156_v43 }
  0x1b   :  { %383 = vmatpush.msrb.mxu3 %v382_v44  ;;  %159 = vmatmul.f32.vlgmr.msra.gmra.mxu1 %v5333_v34 }
  0x1c   :  { %270 = vmatpush.msrb.mxu0 %v130_v27  ;;  %305 = vmatpush.msrb.mxu1 %v5255_v3  ;;  %v400_v27 = vand.u32 4294901760, %v399_v57  ;;  %v411_v3 = vsub.f32 %v5470_v48, %v410_v25 }
  0x1d   :  { %342 = vmatpush.msrb.mxu2 %v5381_v54  ;;  %389 = vmatpush.msrb.mxu3 %v388_v15 }
  0x1e   :  { %98 = vmatmul.f32.gmra.mxu0 %v5479_v24  ;;  %307 = vmatpush.msrb.mxu1 %v5257_v4  ;;  %v417_v4 = vsub.f32 %v5482_v56, %v416_v19  ;;  %v412_v20 = vand.u32 4294901760, %v411_v3 }
  0x1f   :  { %274 = vmatpush.msrb.mxu0 %v136_v28  ;;  %344 = vmatpush.msrb.mxu2 %v5395_v60  ;;  %v605_v28 = vld [vmem:[%s6935_s3 + $0x40] sm:$0xff] }
  0x20   :  { %395 = vmatpush.msrb.mxu3 %v394_v16  ;;  %206 = vmatmul.f32.gmra.mxu2 %v5413_v6  ;;  %v418_v21 = vand.u32 4294901760, %v417_v4 }
  0x21   :  { %309 = vmatpush.msrb.mxu1 %v5259_v5  ;;  %278 = vmatpush.msrb.mxu0 %v142_v30  ;;  %v423_v5 = vsub.f32 %v5492_v61, %v422_v8 }
  0x22   :  { %346 = vmatpush.msrb.mxu2 %v5415_v7  ;;  %401 = vmatpush.msrb.mxu3 %v400_v27  ;;  %v606_v27 = vld [vmem:[%s6935_s3 + $0x48] sm:$0xff] }
  0x23   :  { %311 = vmatpush.msrb.mxu1 %v5270_v9  ;;  %243 = vmatmul.f32.gmra.mxu3 %v5431_v31  ;;  %v424_v9 = vand.u32 4294901760, %v423_v5  ;;  %v602_v5 = vld [vmem:[%s6935_s3 + $0x28] sm:$0xff] }
  0x24   :  { %282 = vmatpush.msrb.mxu0 %v148_v46  ;;  %348 = vmatpush.msrb.mxu2 %v5442_v37  ;;  %v603_v46 = vld [vmem:[%s6935_s3 + $0x30] sm:$0xff] }
  0x25   :  { %407 = vmatpush.msrb.mxu3 %v406_v12  ;;  %163 = vmatmul.f32.gmra.mxu1 %v5393_v59  ;;  %v5762_v12 = vand.u32 4294901760, %v606_v27 }
  0x26   :  { %286 = vmatpush.msrb.mxu0 %v154_v53  ;;  %313 = vmatpush.msrb.mxu1 %v5272_v10  ;;  %v611_v10 = vld [vmem:[%s6935_s3 + $0x70] sm:$0xff] }
  0x27   :  { %350 = vmatpush.msrb.mxu2 %v5459_v23  ;;  %413 = vmatpush.msrb.mxu3 %v412_v20 }
  0x28   :  { %288 = vmatmul.f32.vlgmr.msrb.gmra.mxu0 %v5333_v34  ;;  %315 = vmatpush.msrb.mxu1 %v5274_v11  ;;  %v609_v11 = vld [vmem:[%s6935_s3 + $0x60] sm:$0xff] }
  0x29   :  { %352 = vmatpush.msrb.mxu2 %v5472_v52  ;;  %419 = vmatpush.msrb.mxu3 %v418_v21 }
  0x2a   :  { %445 = vmatpush.msra.mxu0 %v5391_v58  ;;  %317 = vmatpush.msrb.mxu1 %v5293_v17  ;;  %v5548_v17 = vand.u32 4294901760, %v611_v10  ;;  %v5594_v58 = vsub.f32 %v607_v26, %v5571_v36  ;;  %v5792_v26 = vand.u32 4294901760, %v602_v5 }
  0x2b   :  { %358 = vmatmul.f32.vlgmr.msrb.gmra.mxu2 %v5409_v1  ;;  %425 = vmatpush.msrb.mxu3 %v424_v9 }
  0x2c   :  { %448 = vmatpush.msra.mxu0 %v5403_v63  ;;  %526 = vmatpush.msra.mxu2 %v380_v2  ;;  %v5569_v30 = vsub.f32 %v611_v10, %v5548_v17  ;;  %7044 = vst [vmem:[#allocation11_spill] sm:$0xff] %v5594_v58  ;;  %v5596_v63 = vand.u32 4294901760, %v603_v46  ;;  %v599_v2 = vld [vmem:[%s6935_s3 + $0x10] sm:$0xff]  ;;  %v5625_v18 = vand.u32 4294901760, %v5594_v58  ;;  %v600_v10 = vld [vmem:[%s6935_s3 + $0x18] sm:$0xff] }
  0x2d   :  { %319 = vmatpush.msrb.mxu1 %v5307_v22  ;;  %427 = vmatmul.f32.vlgmr.msrb.gmra.mxu3 %v5333_v34  ;;  %v5558_v22 = vand.u32 4294901760, %v609_v11 }
  0x2e   :  { %451 = vmatpush.msra.mxu0 %v5406_v0  ;;  %530 = vmatpush.msra.mxu2 %v386_v13  ;;  %v5591_v53 = vand.u32 4294901760, %v5569_v30  ;;  %7045 = vst [vmem:[#allocation12_spill] sm:$0xff] %v5596_v63  ;;  %v601_v0 = vld [vmem:[%s6935_s3 + $0x20] sm:$0xff]  ;;  %v5628_v29 = vsub.f32 %v603_v46, %v5596_v63  ;;  %v678_v40 = vsub.f32 %v5594_v58, %v5625_v18 }
  0x2f   :  { %487 = vmatpush.msra.mxu1 %v5374_v50  ;;  %573 = vmatpush.msra.mxu3 %v5374_v50  ;;  %v5582_v50 = vsub.f32 %v609_v11, %v5558_v22  ;;  %7049 = vst [vmem:[#allocation16_spill] sm:$0xff] %v5625_v18  ;;  %v5790_v11 = vsub.f32 %v606_v27, %v5762_v12 }
  0x30   :  { %321 = vmatmul.f32.vlgmr.msrb.gmra.mxu1 %v5333_v34  ;;  %454 = vmatpush.msra.mxu0 %v5434_v32  ;;  %7043 = vst [vmem:[#allocation10_spill] sm:$0xff] %v5591_v53  ;;  %v666_v13 = vsub.f32 %v5569_v30, %v5591_v53  ;;  %v597_v32 = vld [vmem:[%s6935_s3] sm:$0xff]  ;;  %v5660_v42 = vand.u32 4294901760, %v5628_v29 }
  0x31   :  { %489 = vmatpush.msra.mxu1 %v5376_v51  ;;  %534 = vmatpush.msra.mxu2 %v392_v35  ;;  %7050 = vst [vmem:[#allocation17_spill] sm:$0xff] %v5628_v29 }
  0x32   :  { %575 = vmatpush.msra.mxu3 %v5376_v51  ;;  %292 = vmatmul.f32.gmra.mxu0 %v5393_v59  ;;  %v5584_v51 = vand.u32 4294901760, %v605_v28  ;;  %7055 = vst [vmem:[#allocation22_spill] sm:$0xff] %v5660_v42  ;;  %v690_v47 = vsub.f32 %v5628_v29, %v5660_v42 }
  0x33   :  { %491 = vmatpush.msra.mxu1 %v5381_v54  ;;  %457 = vmatpush.msra.mxu0 %v5447_v39  ;;  %v5650_v39 = vand.u32 4294901760, %v597_v32 }
  0x34   :  { %538 = vmatpush.msra.mxu2 %v398_v45  ;;  %7042 = vst [vmem:[#allocation9_spill] sm:$0xff] %v5584_v51  ;;  %577 = vmatpush.msra.mxu3 %v5381_v54  ;;  %v5607_v54 = vand.u32 4294901760, %v5582_v50  ;;  %v5610_v1 = vsub.f32 %v605_v28, %v5584_v51  ;;  %v5683_v45 = vand.u32 4294901760, %v678_v40  ;;  %v5708_v15 = vand.u32 4294901760, %v690_v47 }
  0x35   :  { %366 = vmatmul.f32.gmra.mxu2 %v5479_v24  ;;  %460 = vmatpush.msra.mxu0 %v5470_v48  ;;  %7054 = vst [vmem:[#allocation21_spill] sm:$0xff] %v5650_v39  ;;  %v5679_v44 = vsub.f32 %v597_v32, %v5650_v39  ;;  %v610_v24 = vld [vmem:[%s6935_s3 + $0x68] sm:$0xff]  ;;  %v5809_v32 = vand.u32 4294901760, %v600_v10  ;;  %v5818_v40 = vand.u32 4294901760, %v5790_v11 }
  0x36   :  { %493 = vmatpush.msra.mxu1 %v5395_v60  ;;  %542 = vmatpush.msra.mxu2 %v404_v55  ;;  %7046 = vst [vmem:[#allocation13_spill] sm:$0xff] %v5607_v54  ;;  %v672_v33 = vsub.f32 %v5582_v50, %v5607_v54  ;;  %v5643_v35 = vand.u32 4294901760, %v5610_v1  ;;  %v612_v55 = vld [vmem:[%s6935_s3 + $0x78] sm:$0xff] }
  0x37   :  { %579 = vmatpush.msra.mxu3 %v5395_v60  ;;  %463 = vmatpush.msra.mxu0 %v5482_v56  ;;  %7047 = vst [vmem:[#allocation14_spill] sm:$0xff] %v5610_v1  ;;  %v5618_v60 = vand.u32 4294901760, %v601_v0  ;;  %v5719_v56 = vand.u32 4294901760, %v612_v55 }
  0x38   :  { %431 = vmatmul.f32.gmra.mxu3 %v5393_v59  ;;  %495 = vmatpush.msra.mxu1 %v5415_v7  ;;  %7052 = vst [vmem:[#allocation19_spill] sm:$0xff] %v5643_v35  ;;  %v5669_v14 = vand.u32 4294901760, %v672_v33 }
  0x39   :  { %546 = vmatpush.msra.mxu2 %v410_v25  ;;  %7048 = vst [vmem:[#allocation15_spill] sm:$0xff] %v5618_v60  ;;  %581 = vmatpush.msra.mxu3 %v5415_v7  ;;  %v5635_v7 = vand.u32 4294901760, %v599_v2  ;;  %v5648_v38 = vsub.f32 %v601_v0, %v5618_v60  ;;  %v608_v25 = vld [vmem:[%s6935_s3 + $0x58] sm:$0xff]  ;;  %v5741_v62 = vsub.f32 %v612_v55, %v5719_v56  ;;  %v598_v0 = vld [vmem:[%s6935_s3 + $0x8] sm:$0xff] }
  0x3a   :  { %325 = vmatmul.f32.gmra.mxu1 %v5393_v59  ;;  %466 = vmatpush.msra.mxu0 %v5492_v61  ;;  %7058 = vst [vmem:[#allocation25_spill] sm:$0xff] %v5679_v44  ;;  %v5732_v61 = vand.u32 4294901760, %v610_v24  ;;  %v5823_v47 = vand.u32 4294901760, %v598_v0 }
  0x3b   :  { %497 = vmatpush.msra.mxu1 %v5442_v37  ;;  %7051 = vst [vmem:[#allocation18_spill] sm:$0xff] %v5635_v7  ;;  %550 = vmatpush.msra.mxu2 %v416_v19  ;;  %v5676_v43 = vand.u32 4294901760, %v5648_v38  ;;  %v5743_v19 = vand.u32 4294901760, %v608_v25  ;;  %v5767_v4 = vand.u32 4294901760, %v5741_v62 }
  0x3c   :  { %583 = vmatpush.msra.mxu3 %v5442_v37  ;;  %469 = vmatmul.f32.vlgmr.msra.gmra.mxu0 %v5351_v41  ;;  %7053 = vst [vmem:[#allocation20_spill] sm:$0xff] %v5648_v38  ;;  %v5655_v37 = vand.u32 4294901760, %v666_v13  ;;  %v5665_v41 = vsub.f32 %v599_v2, %v5635_v7  ;;  %v5195_v2 = vmov 0.0  }
  0x3d   :  { %499 = vmatpush.msra.mxu1 %v5459_v23  ;;  %554 = vmatpush.msra.mxu2 %v422_v8  ;;  %7057 = vst [vmem:[#allocation24_spill] sm:$0xff] %v5676_v43  ;;  %v604_v8 = vld [vmem:[%s6935_s3 + $0x38] sm:$0xff]  ;;  %v5770_v20 = vsub.f32 %v608_v25, %v5743_v19  ;;  %v903_v28 = vsub.f32 %v5741_v62, %v5767_v4 }
  0x3e   :  { %585 = vmatpush.msra.mxu3 %v5459_v23  ;;  %556 = vmatmul.f32.vlgmr.msra.gmra.mxu2 %v5333_v34  ;;  %7056 = vst [vmem:[#allocation23_spill] sm:$0xff] %v5665_v41  ;;  %v684_v23 = vsub.f32 %v5610_v1, %v5643_v35  ;;  %v5777_v21 = vand.u32 4294901760, %v604_v8  ;;  %v921_v25 = vsub.f32 %v5790_v11, %v5818_v40 }
  0x3f   :  { %631 = vmatpush.msrb.mxu0 %v5548_v17  ;;  %501 = vmatpush.msra.mxu1 %v5472_v52  ;;  %7061 = vst [vmem:[#allocation28_spill] sm:$0xff] %v5708_v15  ;;  %v5799_v46 = vand.u32 4294901760, %v5770_v20 }
  0x40   :  { %587 = vmatpush.msra.mxu3 %v5472_v52  ;;  %726 = vmatpush.msrb.mxu2 %v5569_v30  ;;  %v5694_v48 = vand.u32 4294901760, %v684_v23  ;;  %v696_v52 = vsub.f32 %v5648_v38, %v5676_v43  ;;  %v5807_v13 = vsub.f32 %v604_v8, %v5777_v21  ;;  %v5821_v23 = vsub.f32 %v602_v5, %v5792_v26 }
  0x41   :  { %589 = vmatmul.f32.vlgmr.msra.gmra.mxu3 %v5333_v34  ;;  %633 = vmatpush.msrb.mxu0 %v5558_v22  ;;  %v5690_v34 = vand.u32 4294901760, %v5665_v41  ;;  %v915_v55 = vsub.f32 %v5770_v20, %v5799_v46  ;;  %v5851_v8 = vsub.f32 %v598_v0, %v5823_v47  ;;  %v5868_v0 = vand.u32 4294901760, %v921_v25 }
  0x42   :  { %668 = vmatpush.msrb.mxu1 %v5655_v37  ;;  %729 = vmatpush.msrb.mxu2 %v5582_v50  ;;  %v5723_v57 = vand.u32 4294901760, %v696_v52  ;;  %v5827_v52 = vand.u32 4294901760, %v903_v28  ;;  %v5848_v27 = vand.u32 4294901760, %v5821_v23 }
  0x43   :  { %505 = vmatmul.f32.vlgmr.msra.gmra.mxu1 %v5372_v49  ;;  %635 = vmatpush.msrb.mxu0 %v5571_v36  ;;  %7059 = vst [vmem:[#allocation26_spill] sm:$0xff] %v5690_v34  ;;  %v5701_v49 = vand.u32 4294901760, %v5679_v44  ;;  %v5855_v5 = vand.u32 4294901760, %v915_v55  ;;  %v5873_v55 = vand.u32 4294901760, %v5851_v8 }
  0x44   :  { %674 = vmatpush.msrb.mxu1 %v5669_v14  ;;  %474 = vmatmul.f32.gmra.mxu0 %v5413_v6  ;;  %v702_v6 = vsub.f32 %v5665_v41, %v5690_v34  ;;  %7062 = vst [vmem:[#allocation29_spill] sm:$0xff] %v5723_v57 }
  0x45   :  { %763 = vmatpush.msrb.mxu3 %v5548_v17  ;;  %7060 = vst [vmem:[#allocation27_spill] sm:$0xff] %v5701_v49  ;;  %637 = vmatpush.msrb.mxu0 %v5584_v51  ;;  %v708_v16 = vsub.f32 %v5679_v44, %v5701_v49 }
  0x46   :  { %680 = vmatpush.msrb.mxu1 %v5683_v45  ;;  %560 = vmatmul.f32.gmra.mxu2 %v5393_v59  ;;  %7065 = vst [vmem:[#allocation32_spill] sm:$0xff] %v5827_v52 }
  0x47   :  { %765 = vmatpush.msrb.mxu3 %v5558_v22  ;;  %639 = vmatpush.msrb.mxu0 %v5596_v63  ;;  %v5750_v3 = vand.u32 4294901760, %v708_v16  ;;  %7067 = vst [vmem:[#allocation34_spill] sm:$0xff] %v5855_v5 }
  0x48   :  { %686 = vmatpush.msrb.mxu1 %v5694_v48  ;;  %732 = vmatpush.msrb.mxu2 %v5594_v58  ;;  %7068 = vst [vmem:[#allocation35_spill] sm:$0xff] %v5868_v0 }
  0x49   :  { %593 = vmatmul.f32.gmra.mxu3 %v5393_v59  ;;  %641 = vmatpush.msrb.mxu0 %v5618_v60  ;;  %v5736_v59 = vand.u32 4294901760, %v702_v6  ;;  %7064 = vst [vmem:[#allocation31_spill] sm:$0xff] %v5750_v3  ;;  %v5834_v6 = vand.u32 4294901760, %v5807_v13 }
  0x4a   :  { %692 = vmatpush.msrb.mxu1 %v5708_v15  ;;  %735 = vmatpush.msrb.mxu2 %v5610_v1 }
  0x4b   :  { %767 = vmatpush.msrb.mxu3 %v5571_v36  ;;  %7063 = vst [vmem:[#allocation30_spill] sm:$0xff] %v5736_v59  ;;  %511 = vmatmul.f32.gmra.mxu1 %v5431_v31  ;;  %v5755_v31 = vsub.f32 %v610_v24, %v5732_v61  ;;  %v5837_v24 = vsub.f32 %v600_v10, %v5809_v32 }
  0x4c   :  { %643 = vmatpush.msrb.mxu0 %v5635_v7  ;;  %698 = vmatpush.msrb.mxu1 %v5723_v57  ;;  %v927_v10 = vsub.f32 %v5807_v13, %v5834_v6 }
  0x4d   :  { %738 = vmatpush.msrb.mxu2 %v5628_v29  ;;  %769 = vmatpush.msrb.mxu3 %v5584_v51  ;;  %v5782_v9 = vand.u32 4294901760, %v5755_v31  ;;  %v5862_v28 = vand.u32 4294901760, %v5837_v24 }
  0x4e   :  { %645 = vmatpush.msrb.mxu0 %v5650_v39  ;;  %704 = vmatpush.msrb.mxu1 %v5736_v59 }
  0x4f   :  { %741 = vmatpush.msrb.mxu2 %v5648_v38  ;;  %771 = vmatpush.msrb.mxu3 %v5596_v63  ;;  %v909_v33 = vsub.f32 %v5755_v31, %v5782_v9 }
  0x50   :  { %796 = vmatpush.msra.mxu0 %v5591_v53  ;;  %710 = vmatpush.msrb.mxu1 %v5750_v3 }
  0x51   :  { %744 = vmatpush.msrb.mxu2 %v5665_v41  ;;  %773 = vmatpush.msrb.mxu3 %v5618_v60  ;;  %v5841_v16 = vand.u32 4294901760, %v909_v33  ;;  %v933_v33 = vsub.f32 %v5821_v23, %v5848_v27 }
  0x52   :  { %800 = vmatpush.msra.mxu0 %v5607_v54  ;;  %839 = vmatpush.msra.mxu1 %v5548_v17 }
  0x53   :  { %747 = vmatpush.msrb.mxu2 %v5679_v44  ;;  %775 = vmatpush.msrb.mxu3 %v5635_v7  ;;  %7066 = vst [vmem:[#allocation33_spill] sm:$0xff] %v5841_v16  ;;  %v5886_v25 = vand.u32 4294901760, %v933_v33 }
  0x54   :  { %804 = vmatpush.msra.mxu0 %v5625_v18  ;;  %841 = vmatpush.msra.mxu1 %v5558_v22 }
  0x55   :  { %750 = vmatmul.f32.vlgmr.msrb.gmra.mxu2 %v5195_v2  ;;  %777 = vmatpush.msrb.mxu3 %v5650_v39  ;;  %7070 = vst [vmem:[#allocation37_spill] sm:$0xff] %v5886_v25 }
  0x56   :  { %808 = vmatpush.msra.mxu0 %v5643_v35  ;;  %843 = vmatpush.msra.mxu1 %v5571_v36 }
  0x57   :  { %651 = vmatmul.f32.vlgmr.msrb.gmra.mxu0 %v5195_v2  ;;  %781 = vmatmul.f32.vlgmr.msrb.gmra.mxu3 %v5195_v2 }
  0x58   :  { %812 = vmatpush.msra.mxu0 %v5660_v42  ;;  %845 = vmatpush.msra.mxu1 %v5584_v51 }
  0x59   :  { %868 = vmatpush.msra.mxu2 %v5719_v56  ;;  %712 = vmatmul.f32.vlgmr.msrb.gmra.mxu1 %v5195_v2 }
  0x5a   :  { %816 = vmatpush.msra.mxu0 %v5676_v43  ;;  %847 = vmatpush.msra.mxu1 %v5596_v63  ;;  %v945_v43 = vsub.f32 %v5851_v8, %v5873_v55 }
  0x5b   :  { %870 = vmatpush.msra.mxu2 %v5732_v61  ;;  %905 = vmatpush.msra.mxu3 %v5827_v52 }
  0x5c   :  { %820 = vmatpush.msra.mxu0 %v5690_v34  ;;  %849 = vmatpush.msra.mxu1 %v5618_v60  ;;  %v5878_v34 = vand.u32 4294901760, %v927_v10  ;;  %v5900_v33 = vand.u32 4294901760, %v945_v43  ;;  %v7073_v43 = vld [vmem:[#allocation24_spill] sm:$0xff] }
  0x5d   :  { %872 = vmatpush.msra.mxu2 %v5743_v19  ;;  %911 = vmatpush.msra.mxu3 %v5841_v16 }
  0x5e   :  { %824 = vmatpush.msra.mxu0 %v5701_v49  ;;  %851 = vmatpush.msra.mxu1 %v5635_v7  ;;  %7069 = vst [vmem:[#allocation36_spill] sm:$0xff] %v5878_v34  ;;  %v939_v49 = vsub.f32 %v5837_v24, %v5862_v28 }
  0x5f   :  { %826 = vmatmul.f32.vlgmr.msra.gmra.mxu0 %v5195_v2  ;;  %874 = vmatpush.msra.mxu2 %v5762_v12  ;;  %7072 = vst [vmem:[#allocation39_spill] sm:$0xff] %v5900_v33 }
  0x60   :  { %917 = vmatpush.msra.mxu3 %v5855_v5  ;;  %853 = vmatpush.msra.mxu1 %v5650_v39  ;;  %v5894_v10 = vand.u32 4294901760, %v939_v49  ;;  %v7074_v49 = vld [vmem:[#allocation26_spill] sm:$0xff] }
  0x61   :  { %963 = vmatpush.msrb.mxu0 %v5741_v62  ;;  %855 = vmatmul.f32.vlgmr.msra.gmra.mxu1 %v5195_v2 }
  0x62   :  { %876 = vmatpush.msra.mxu2 %v5777_v21  ;;  %923 = vmatpush.msra.mxu3 %v5868_v0  ;;  %7071 = vst [vmem:[#allocation38_spill] sm:$0xff] %v5894_v10 }
  0x63   :  { %966 = vmatpush.msrb.mxu0 %v5755_v31  ;;  %1000 = vmatpush.msrb.mxu1 %v5719_v56 }
  0x64   :  { %878 = vmatpush.msra.mxu2 %v5792_v26  ;;  %929 = vmatpush.msra.mxu3 %v5878_v34 }
  0x65   :  { %969 = vmatpush.msrb.mxu0 %v5770_v20  ;;  %1002 = vmatpush.msrb.mxu1 %v5732_v61 }
  0x66   :  { %880 = vmatpush.msra.mxu2 %v5809_v32  ;;  %935 = vmatpush.msra.mxu3 %v5886_v25 }
  0x67   :  { %972 = vmatpush.msrb.mxu0 %v5790_v11  ;;  %1004 = vmatpush.msrb.mxu1 %v5743_v19 }
  0x68   :  { %882 = vmatpush.msra.mxu2 %v5823_v47  ;;  %941 = vmatpush.msra.mxu3 %v5894_v10 }
  0x69   :  { %888 = vmatmul.f32.vlgmr.msra.gmra.mxu2 %v5195_v2  ;;  %975 = vmatpush.msrb.mxu0 %v5807_v13 }
  0x6a   :  { %1033 = vmatpush.msrb.mxu2 %v5767_v4  ;;  %947 = vmatpush.msra.mxu3 %v5900_v33 }
  0x6b   :  { %1006 = vmatpush.msrb.mxu1 %v5762_v12  ;;  %949 = vmatmul.f32.vlgmr.msra.gmra.mxu3 %v5195_v2 }
  0x6c   :  { %1037 = vmatpush.msrb.mxu2 %v5782_v9  ;;  %1076 = vmatpush.msrb.mxu3 %v5719_v56 }
  0x6d   :  { %978 = vmatpush.msrb.mxu0 %v5821_v23  ;;  %1008 = vmatpush.msrb.mxu1 %v5777_v21 }
  0x6e   :  { %1041 = vmatpush.msrb.mxu2 %v5799_v46  ;;  %1078 = vmatpush.msrb.mxu3 %v5732_v61 }
  0x6f   :  { %981 = vmatpush.msrb.mxu0 %v5837_v24  ;;  %1010 = vmatpush.msrb.mxu1 %v5792_v26 }
  0x70   :  { %1045 = vmatpush.msrb.mxu2 %v5818_v40  ;;  %1080 = vmatpush.msrb.mxu3 %v5743_v19 }
  0x71   :  { %984 = vmatpush.msrb.mxu0 %v5851_v8  ;;  %1012 = vmatpush.msrb.mxu1 %v5809_v32 }
  0x72   :  { %1049 = vmatpush.msrb.mxu2 %v5834_v6  ;;  %1082 = vmatpush.msrb.mxu3 %v5762_v12 }
  0x73   :  { %987 = vmatmul.f32.vlgmr.msrb.gmra.mxu0 %v5195_v2  ;;  %1014 = vmatpush.msrb.mxu1 %v5823_v47 }
  0x74   :  { %1053 = vmatpush.msrb.mxu2 %v5848_v27  ;;  %1084 = vmatpush.msrb.mxu3 %v5777_v21 }
  0x75   :  { %1018 = vmatmul.f32.vlgmr.msrb.gmra.mxu1 %v5195_v2  ;;  %1141 = vmatpush.msra.mxu0 %v5548_v17 }
  0x76   :  { %1057 = vmatpush.msrb.mxu2 %v5862_v28  ;;  %1086 = vmatpush.msrb.mxu3 %v5792_v26 }
  0x77   :  { %1178 = vmatpush.msra.mxu1 %v5655_v37  ;;  %1143 = vmatpush.msra.mxu0 %v5558_v22 }
  0x78   :  { %1061 = vmatpush.msrb.mxu2 %v5873_v55  ;;  %1088 = vmatpush.msrb.mxu3 %v5809_v32 }
  0x79   :  { %1063 = vmatmul.f32.vlgmr.msrb.gmra.mxu2 %v5195_v2  ;;  %1184 = vmatpush.msra.mxu1 %v5669_v14 }
  0x7a   :  { %1236 = vmatpush.msra.mxu2 %v5569_v30  ;;  %1090 = vmatpush.msrb.mxu3 %v5823_v47 }
  0x7b   :  { %1092 = vmatmul.f32.vlgmr.msrb.gmra.mxu3 %v5195_v2  ;;  %1190 = vmatpush.msra.mxu1 %v5683_v45 }
  0x7c   :  { %1239 = vmatpush.msra.mxu2 %v5582_v50  ;;  %1273 = vmatpush.msra.mxu3 %v5548_v17 }
  0x7d   :  { %1196 = vmatpush.msra.mxu1 %v5694_v48  ;;  %1145 = vmatpush.msra.mxu0 %v5571_v36 }
  0x7e   :  { %1242 = vmatpush.msra.mxu2 %v5594_v58  ;;  %1275 = vmatpush.msra.mxu3 %v5558_v22 }
  0x7f   :  { %1202 = vmatpush.msra.mxu1 %v5708_v15  ;;  %1147 = vmatpush.msra.mxu0 %v5584_v51 }
  0x80   :  { %1245 = vmatpush.msra.mxu2 %v5610_v1  ;;  %1277 = vmatpush.msra.mxu3 %v5571_v36 }
  0x81   :  { %1208 = vmatpush.msra.mxu1 %v5723_v57  ;;  %1149 = vmatpush.msra.mxu0 %v5596_v63 }
  0x82   :  { %1248 = vmatpush.msra.mxu2 %v5628_v29  ;;  %1279 = vmatpush.msra.mxu3 %v5584_v51 }
  0x83   :  { %1214 = vmatpush.msra.mxu1 %v5736_v59  ;;  %1151 = vmatpush.msra.mxu0 %v5618_v60 }
  0x84   :  { %1251 = vmatpush.msra.mxu2 %v5648_v38  ;;  %1281 = vmatpush.msra.mxu3 %v5596_v63 }
  0x85   :  { %1220 = vmatpush.msra.mxu1 %v5750_v3  ;;  %1153 = vmatpush.msra.mxu0 %v5635_v7 }
  0x86   :  { %1254 = vmatpush.msra.mxu2 %v5665_v41  ;;  %1283 = vmatpush.msra.mxu3 %v5618_v60 }
  0x87   :  { %1349 = vmatpush.msrb.mxu1 %v5548_v17  ;;  %1155 = vmatpush.msra.mxu0 %v5650_v39 }
  0x88   :  { %1257 = vmatpush.msra.mxu2 %v5679_v44  ;;  %1285 = vmatpush.msra.mxu3 %v5635_v7 }
  0x89   :  { %1351 = vmatpush.msrb.mxu1 %v5558_v22  ;;  %1306 = vmatpush.msrb.mxu0 %v5591_v53 }
  0x8a   :  { %1378 = vmatpush.msrb.mxu2 %v5719_v56  ;;  %1287 = vmatpush.msra.mxu3 %v5650_v39 }
  0x8b   :  { %1353 = vmatpush.msrb.mxu1 %v5571_v36  ;;  %1310 = vmatpush.msrb.mxu0 %v5607_v54 }
  0x8c   :  { %1380 = vmatpush.msrb.mxu2 %v5732_v61  ;;  %1415 = vmatpush.msrb.mxu3 %v5827_v52 }
  0x8d   :  { %1355 = vmatpush.msrb.mxu1 %v5584_v51  ;;  %1314 = vmatpush.msrb.mxu0 %v5625_v18 }
  0x8e   :  { %1382 = vmatpush.msrb.mxu2 %v5743_v19  ;;  %1421 = vmatpush.msrb.mxu3 %v5841_v16 }
  0x8f   :  { %1357 = vmatpush.msrb.mxu1 %v5596_v63  ;;  %1318 = vmatpush.msrb.mxu0 %v5643_v35  ;;  %v7075_v35 = vld [vmem:[#allocation27_spill] sm:$0xff] }
  0x90   :  { %1384 = vmatpush.msrb.mxu2 %v5762_v12  ;;  %1427 = vmatpush.msrb.mxu3 %v5855_v5 }
  0x91   :  { %1359 = vmatpush.msrb.mxu1 %v5618_v60  ;;  %1322 = vmatpush.msrb.mxu0 %v5660_v42  ;;  %v91_v2 = vpop.f32.mrf.mxu0 }
  0x92   :  { %1386 = vmatpush.msrb.mxu2 %v5777_v21  ;;  %1433 = vmatpush.msrb.mxu3 %v5868_v0 }
  0x93   :  { %1361 = vmatpush.msrb.mxu1 %v5635_v7  ;;  %1326 = vmatpush.msrb.mxu0 %v7073_v43 }
  0x94   :  { %1388 = vmatpush.msrb.mxu2 %v5792_v26  ;;  %1439 = vmatpush.msrb.mxu3 %v5878_v34 }
  0x95   :  { %1363 = vmatpush.msrb.mxu1 %v5650_v39  ;;  %1330 = vmatpush.msrb.mxu0 %v7074_v49 }
  0x96   :  { %1390 = vmatpush.msrb.mxu2 %v5809_v32  ;;  %1445 = vmatpush.msrb.mxu3 %v5886_v25 }
  0x97   :  { %1334 = vmatpush.msrb.mxu0 %v7075_v35 }
  0x98   :  { %1392 = vmatpush.msrb.mxu2 %v5823_v47  ;;  %1451 = vmatpush.msrb.mxu3 %v5894_v10  ;;  %v160_v42 = vpop.f32.mrf.mxu1 }
  0x9a   :  { %1457 = vmatpush.msrb.mxu3 %v5900_v33  ;;  %v202_v34 = vpop.f32.mrf.mxu2 }
  0x9b   :  { %v6002_v0 = vpop.f32.mrf.mxu0 }
  0x9c   :  { %v238_v18 = vpop.f32.mrf.mxu3  ;;  %7076 = vst [vmem:[#allocation40_spill] sm:$0xff] %v6002_v0 }
  0xa2   :  { %v6004_v54 = vpop.f32.mrf.mxu1 }
  0xa3   :  { %7077 = vst [vmem:[#allocation41_spill] sm:$0xff] %v6004_v54  ;;  %v6006_v25 = vpop.f32.mrf.mxu2 }
  0xa4   :  { %7078 = vst [vmem:[#allocation42_spill] sm:$0xff] %v6006_v25  ;;  %v6021_v25 = vld [vmem:[%s6934_s2] sm:$0x3]  ;;  %s5196_s2 = smov 64  }
  0xa5   :  { %v289_v5 = vpop.f32.mrf.mxu0  ;;  %7084 = vst [vmem:[#allocation48_spill] sm:$0xff] %v6021_v25  ;;  %v6993_v54 = vperm.slane %v6021_v25, 0 }
  0xa6   :  { %v6008_v43 = vpop.f32.mrf.mxu3 }
  0xa7   :  { %7079 = vst [vmem:[#allocation43_spill] sm:$0xff] %v6008_v43 }
  0xad   :  { %v322_v10 = vpop.f32.mrf.mxu1 }
  0xae   :  { %v359_v53 = vpop.f32.mrf.mxu2 }
  0xaf   :  { %v6010_v16 = vpop.f32.mrf.mxu0 }
  0xb0   :  { %v428_v49 = vpop.f32.mrf.mxu3  ;;  %7080 = vst [vmem:[#allocation44_spill] sm:$0xff] %v6010_v16 }
  0xb7   :  { %v6012_v33 = vpop.f32.mrf.mxu1 }
  0xb8   :  { %7081 = vst [vmem:[#allocation45_spill] sm:$0xff] %v6012_v33  ;;  %v6014_v35 = vpop.f32.mrf.mxu2  ;;  %v92_v33 = vadd.f32 %v91_v2, %v6993_v54 }
  0xb9   :  { %7082 = vst [vmem:[#allocation46_spill] sm:$0xff] %v6014_v35  ;;  %v470_v39 = vpop.f32.mrf.mxu0 }
  0xba   :  { %v161_v3 = vadd.f32 %v160_v42, %v92_v33 }
  0xbb   :  { %v6016_v52 = vpop.f32.mrf.mxu3 }
  0xbc   :  { %7083 = vst [vmem:[#allocation47_spill] sm:$0xff] %v6016_v52  ;;  %v613_v52 = vld [vmem:[%s6936_s4] sm:$0x3]  ;;  %s5064_s4 = sshll.u32 %s6940_s8, 4  ;;  %s5065_s4 = int_to_ptr.hbm [resolvable:$true] %s5064_s4 }
  0xbd   :  { %v6037_v41 = vperm.slane %v613_v52, 0 }
  0xbf   :  { %7088 = vst [vmem:[#allocation52_spill] sm:$0xff] %v6037_v41 }
  0xc0   :  { %v506_v0 = vpop.f32.mrf.mxu1 }
  0xc1   :  { %v557_v44 = vpop.f32.mrf.mxu2  ;;  %v6026_v7 = vpop.f32.mrf.mxu0 }
  0xc2   :  { %7085 = vst [vmem:[#allocation49_spill] sm:$0xff] %v6026_v7  ;;  %v203_v7 = vadd.f32 %v202_v34, %v161_v3 }
  0xc4   :  { %v6023_v43 = vpop.f32.mrf.mxu3  ;;  %v239_v54 = vadd.f32 %v238_v18, %v203_v7 }
  0xc8   :  { %v6033_v35 = vpop.f32.mrf.mxu1 }
  0xc9   :  { %7086 = vst [vmem:[#allocation50_spill] sm:$0xff] %v6033_v35  ;;  %v6035_v16 = vpop.f32.mrf.mxu2  ;;  %v290_v35 = vadd.f32 %v289_v5, %v239_v54 }
  0xca   :  { %7087 = vst [vmem:[#allocation51_spill] sm:$0xff] %v6035_v16 }
  0xcb   :  { %v6042_v58 = vadd.f32 %v322_v10, %v290_v35 }
  0xcc   :  { %v6039_v60 = vpop.f32.mrf.mxu3 }
  0xcd   :  { %7089 = vst [vmem:[#allocation53_spill] sm:$0xff] %v6039_v60 }
  0xd4   :  { %v652_v38 = vpop.f32.mrf.mxu0 }
  0xd5   :  { %v653_v59 = vadd.f32 %v652_v38, %v6037_v41  ;;  %v6045_v38 = vperm.slane %v613_v52, 1 }
  0xd6   :  { %v713_v63 = vpop.f32.mrf.mxu1 }
  0xd7   :  { %v714_v29 = vadd.f32 %v713_v63, %v653_v59  ;;  %7090 = vst [vmem:[#allocation54_spill] sm:$0xff] %v6045_v38  ;;  %v7006_v63 = vperm.slane %v6021_v25, 1  ;;  %v7118_v25 = vld [vmem:[#allocation22_spill] sm:$0xff] }
  0xd8   :  { %v751_v2 = vpop.f32.mrf.mxu2 }
  0xd9   :  { %v752_v57 = vadd.f32 %v751_v2, %v714_v29  ;;  %v360_v54 = vadd.f32 %v359_v53, %v7006_v63  ;;  %v7116_v63 = vld [vmem:[#allocation19_spill] sm:$0xff] }
  0xda   :  { %v782_v51 = vpop.f32.mrf.mxu3 }
  0xdb   :  { %v783_v1 = vadd.f32 %v782_v51, %v752_v57  ;;  %v429_v35 = vadd.f32 %v428_v49, %v360_v54 }
  0xdc   :  { %v827_v15 = vpop.f32.mrf.mxu0 }
  0xdd   :  { %v828_v36 = vadd.f32 %v827_v15, %v783_v1  ;;  %v471_v3 = vadd.f32 %v470_v39, %v429_v35 }
  0xde   :  { %v856_v16 = vpop.f32.mrf.mxu1 }
  0xdf   :  { %v857_v42 = vadd.f32 %v856_v16, %v828_v36  ;;  %v507_v5 = vadd.f32 %v506_v0, %v471_v3 }
  0xe1   :  { %v1096_v33 = vadd.f32 %v857_v42, %v6042_v58 }
  0xe3   :  { %v5078_v60 = vmul.f32 -1.442695, %v1096_v33 }
  0xe5   :  { %5093 = vpow2.f32 %v5078_v60 }
  0xeb   :  { %v5094_v34 = vpop.eup %5093 }
  0xec   :  { %v1100_v18 = vadd.f32 1.0, %v5094_v34  ;;  %v889_v29 = vpop.f32.mrf.mxu2 }
  0xed   :  { %v890_v51 = vadd.f32 %v889_v29, %v6045_v38  ;;  %v558_v29 = vadd.f32 %v557_v44, %v507_v5 }
  0xee   :  { %5095 = vrcp.f32 %v1100_v18  ;;  %v950_v1 = vpop.f32.mrf.mxu3  ;;  %v1112_v10 = vand.u32 2147483648, %v1100_v18  ;;  %v1110_v42 = vand.u32 2147483647, %v1100_v18  ;;  %vm1106_vm2 = vweird.f32 %v1100_v18 }
  0xef   :  { %v951_v7 = vadd.f32 %v950_v1, %v890_v51  ;;  %v6052_v39 = vadd.f32 %v6023_v43, %v558_v29  ;;  %v7097_v29 = vld [vmem:[#allocation29_spill] sm:$0xff] }
  0xf0   :  { %v988_v36 = vpop.f32.mrf.mxu0  ;;  %v1113_v51 = vor.u32 1.1754944e-38, %v1112_v10  ;;  %vm1111_vm4 = vcmp.eq.f32.partialorder %v1110_v42, 8.507059e+37  ;;  %v7093_v42 = vld [vmem:[#allocation8_spill] sm:$0xff] }
  0xf1   :  { %v989_v15 = vadd.f32 %v988_v36, %v951_v7 }
  0xf2   :  { %v1019_v60 = vpop.f32.mrf.mxu1 }
  0xf3   :  { %v1020_v52 = vadd.f32 %v1019_v60, %v989_v15 }
  0xf4   :  { %v5096_v57 = vpop.eup %5095 }
  0xf5   :  { %v1102_v59 = vmul.f32 %v5096_v57, %v1100_v18  ;;  %vm1107_vm1 = vweird.f32 %v5096_v57 }
  0xf6   :  { %vm1108_vm3 = vmor %vm1106_vm2, %vm1107_vm1 }
  0xf7   :  { %v1103_v16 = vsub.f32 1.0, %v1102_v59 }
  0xf9   :  { %v1104_v2 = vmul.f32 %v5096_v57, %v1103_v16 }
  0xfb   :  { %v1105_v53 = vadd.f32 %v5096_v57, %v1104_v2  ;;  %v7092_v2 = vld [vmem:[#allocation11_spill] sm:$0xff] }
  0xfc   :  { %v1064_v33 = vpop.f32.mrf.mxu2 }
  0xfd   :  { %v1065_v34 = vadd.f32 %v1064_v33, %v1020_v52  ;;  %v1109_v54 = vsel %vm1108_vm3, %v5096_v57, %v1105_v53  ;;  %v7094_v33 = vld [vmem:[#allocation28_spill] sm:$0xff]  ;;  %v7096_v53 = vld [vmem:[#allocation9_spill] sm:$0xff] }
  0xfe   :  { %v1093_v49 = vpop.f32.mrf.mxu3  ;;  %v1114_v7 = vsel %vm1111_vm4, %v1113_v51, %v1109_v54  ;;  %v7098_v51 = vld [vmem:[#allocation17_spill] sm:$0xff]  ;;  %v7100_v54 = vld [vmem:[#allocation30_spill] sm:$0xff] }
  0xff   :  { %v1094_v1 = vadd.f32 %v1093_v49, %v1065_v34  ;;  %v1119_v18 = vsub.f32 1.0, %v1114_v7  ;;  %v1125_v15 = vmul.f32 0.0, %v1114_v7  ;;  %v7095_v34 = vld [vmem:[#allocation14_spill] sm:$0xff]  ;;  %v7099_v49 = vld [vmem:[#allocation12_spill] sm:$0xff] }
 0x101   :  { %v1116_v0 = vmul.f32 %v1114_v7, %v1094_v1  ;;  %v7101_v1 = vld [vmem:[#allocation20_spill] sm:$0xff]  ;;  %v7102_v7 = vld [vmem:[#allocation15_spill] sm:$0xff] }
 0x103   :  { %v1117_v36 = vadd.f32 %v1116_v0, %v6052_v39  ;;  %v7103_v0 = vld [vmem:[#allocation31_spill] sm:$0xff] }
 0x105   :  { %5097 = vtanh.f32 %v1117_v36  ;;  %v7104_v36 = vld [vmem:[#allocation23_spill] sm:$0xff] }
 0x10b   :  { %v5098_v35 = vpop.eup %5097 }
 0x10c   :  { %1121 = vrot.lane.b32.xlu0 %v5098_v35, %s5196_s2  ;;  %v7105_v35 = vld [vmem:[#allocation18_spill] sm:$0xff] }
 0x17e   :  { %v1122_v44 = vpop.permute.xlu0 %1121 }
 0x17f   :  { %v1124_v60 = vmul.f32 %v1122_v44, %v1119_v18  ;;  %v7106_v18 = vld [vmem:[#allocation25_spill] sm:$0xff] }
 0x180   :  { %v7107_v44 = vld [vmem:[#allocation21_spill] sm:$0xff] }
 0x181   :  { %v6056_v59 = vadd.f32 %v1125_v15, %v1124_v60  ;;  %v7108_v15 = vld [vmem:[#allocation32_spill] sm:$0xff]  ;;  %v7109_v60 = vld [vmem:[#allocation33_spill] sm:$0xff] }
 0x183   :  { %1128 = vrot.lane.b32.xlu0 %v6056_v59, %s5196_s2 }
 0x1f5   :  { %v6060_v57 = vpop.permute.xlu0 %1128 }
 0x1f6   :  { %7091 = vst [vmem:[#allocation55_spill] sm:$0xff] %v6060_v57  ;;  %v1130_v43 = vsel %vm54_vm0, %v6060_v57, 0  ;;  %v7117_v57 = vld [vmem:[#allocation37_spill] sm:$0xff] }
 0x1f7   :  { %v1156_v3 = vand.u32 4294901760, %v1130_v43 }
 0x1f9   :  { %v1157_v52 = vsub.f32 %v1130_v43, %v1156_v3  ;;  %1222 = vmatmul.f32.vlgmr.msra.gmra.mxu1 %v1156_v3  ;;  %v7110_v43 = vld [vmem:[#allocation10_spill] sm:$0xff] }
 0x1fa   :  { %1510 = vmatpush.msra.mxu1 %v5719_v56 }
 0x1fb   :  { %1260 = vmatmul.f32.vlgmr.msra.gmra.mxu2 %v1157_v52  ;;  %v1158_v16 = vand.u32 4294901760, %v1157_v52 }
 0x1fc   :  { %1512 = vmatpush.msra.mxu1 %v5732_v61  ;;  %1543 = vmatpush.msra.mxu2 %v5767_v4 }
 0x1fd   :  { %1291 = vmatmul.f32.vlgmr.msra.gmra.mxu3 %v1158_v16  ;;  %v1159_v5 = vsub.f32 %v1157_v52, %v1158_v16 }
 0x1fe   :  { %1514 = vmatpush.msra.mxu1 %v5743_v19  ;;  %1547 = vmatpush.msra.mxu2 %v5782_v9 }
 0x1ff   :  { %1586 = vmatpush.msra.mxu3 %v5719_v56  ;;  %v1160_v10 = vand.u32 4294901760, %v1159_v5  ;;  %v7114_v5 = vld [vmem:[#allocation16_spill] sm:$0xff] }
 0x200   :  { %1516 = vmatpush.msra.mxu1 %v5762_v12  ;;  %1551 = vmatpush.msra.mxu2 %v5799_v46 }
 0x201   :  { %1588 = vmatpush.msra.mxu3 %v5732_v61  ;;  %1161 = vmatmul.f32.vlgmr.msra.gmra.mxu0 %v1160_v10 }
 0x202   :  { %1365 = vmatmul.f32.vlgmr.msrb.gmra.mxu1 %v1156_v3  ;;  %1473 = vmatpush.msra.mxu0 %v5741_v62 }
 0x203   :  { %1518 = vmatpush.msra.mxu1 %v5777_v21  ;;  %1555 = vmatpush.msra.mxu2 %v5818_v40 }
 0x204   :  { %1590 = vmatpush.msra.mxu3 %v5743_v19  ;;  %1398 = vmatmul.f32.vlgmr.msrb.gmra.mxu2 %v1160_v10  ;;  %v7115_v10 = vld [vmem:[#allocation36_spill] sm:$0xff] }
 0x205   :  { %1476 = vmatpush.msra.mxu0 %v5755_v31  ;;  %1520 = vmatpush.msra.mxu1 %v5792_v26 }
 0x206   :  { %1559 = vmatpush.msra.mxu2 %v5834_v6  ;;  %1592 = vmatpush.msra.mxu3 %v5762_v12 }
 0x207   :  { %1459 = vmatmul.f32.vlgmr.msrb.gmra.mxu3 %v1156_v3  ;;  %1479 = vmatpush.msra.mxu0 %v5770_v20 }
 0x208   :  { %1522 = vmatpush.msra.mxu1 %v5809_v32  ;;  %1563 = vmatpush.msra.mxu2 %v5848_v27 }
 0x209   :  { %1594 = vmatpush.msra.mxu3 %v5777_v21  ;;  %1482 = vmatpush.msra.mxu0 %v5790_v11 }
 0x20a   :  { %1524 = vmatpush.msra.mxu1 %v5823_v47  ;;  %1567 = vmatpush.msra.mxu2 %v5862_v28 }
 0x20b   :  { %1596 = vmatpush.msra.mxu3 %v5792_v26  ;;  %1336 = vmatmul.f32.vlgmr.msrb.gmra.mxu0 %v1156_v3 }
 0x20c   :  { %1528 = vmatmul.f32.vlgmr.msra.gmra.mxu1 %v1158_v16  ;;  %1485 = vmatpush.msra.mxu0 %v5807_v13  ;;  %v7113_v16 = vld [vmem:[#allocation35_spill] sm:$0xff] }
 0x20d   :  { %1571 = vmatpush.msra.mxu2 %v5873_v55  ;;  %1598 = vmatpush.msra.mxu3 %v5809_v32 }
 0x20e   :  { %1573 = vmatmul.f32.vlgmr.msra.gmra.mxu2 %v1156_v3  ;;  %1488 = vmatpush.msra.mxu0 %v5821_v23 }
 0x20f   :  { %1600 = vmatpush.msra.mxu3 %v5823_v47  ;;  %1697 = vmatpush.msrb.mxu1 %v5655_v37 }
 0x210   :  { %1602 = vmatmul.f32.vlgmr.msra.gmra.mxu3 %v1156_v3  ;;  %1491 = vmatpush.msra.mxu0 %v5837_v24  ;;  %v7111_v3 = vld [vmem:[#allocation34_spill] sm:$0xff] }
 0x211   :  { %1703 = vmatpush.msrb.mxu1 %v5669_v14  ;;  %1755 = vmatpush.msrb.mxu2 %v5569_v30 }
 0x212   :  { %1494 = vmatpush.msra.mxu0 %v5851_v8  ;;  %1792 = vmatpush.msrb.mxu3 %v5548_v17 }
 0x213   :  { %1497 = vmatmul.f32.vlgmr.msra.gmra.mxu0 %v1157_v52  ;;  %1709 = vmatpush.msrb.mxu1 %v5683_v45  ;;  %v7112_v52 = vld [vmem:[#allocation13_spill] sm:$0xff] }
 0x214   :  { %1758 = vmatpush.msrb.mxu2 %v5582_v50  ;;  %1794 = vmatpush.msrb.mxu3 %v5558_v22 }
 0x215   :  { %1715 = vmatpush.msrb.mxu1 %v5694_v48  ;;  %1660 = vmatpush.msrb.mxu0 %v5548_v17 }
 0x216   :  { %1761 = vmatpush.msrb.mxu2 %v7092_v2  ;;  %1796 = vmatpush.msrb.mxu3 %v7093_v42 }
 0x217   :  { %1721 = vmatpush.msrb.mxu1 %v7094_v33  ;;  %1662 = vmatpush.msrb.mxu0 %v5558_v22 }
 0x218   :  { %1764 = vmatpush.msrb.mxu2 %v7095_v34  ;;  %1798 = vmatpush.msrb.mxu3 %v7096_v53 }
 0x219   :  { %1727 = vmatpush.msrb.mxu1 %v7097_v29  ;;  %1664 = vmatpush.msrb.mxu0 %v7093_v42 }
 0x21a   :  { %1767 = vmatpush.msrb.mxu2 %v7098_v51  ;;  %1800 = vmatpush.msrb.mxu3 %v7099_v49 }
 0x21b   :  { %1733 = vmatpush.msrb.mxu1 %v7100_v54  ;;  %1666 = vmatpush.msrb.mxu0 %v7096_v53 }
 0x21c   :  { %1770 = vmatpush.msrb.mxu2 %v7101_v1  ;;  %1802 = vmatpush.msrb.mxu3 %v7102_v7 }
 0x21d   :  { %1739 = vmatpush.msrb.mxu1 %v7103_v0  ;;  %1668 = vmatpush.msrb.mxu0 %v7099_v49 }
 0x21e   :  { %1773 = vmatpush.msrb.mxu2 %v7104_v36  ;;  %1804 = vmatpush.msrb.mxu3 %v7105_v35 }
 0x21f   :  { %1868 = vmatpush.msra.mxu1 %v5548_v17  ;;  %1670 = vmatpush.msrb.mxu0 %v7102_v7 }
 0x220   :  { %1776 = vmatpush.msrb.mxu2 %v7106_v18  ;;  %1806 = vmatpush.msrb.mxu3 %v7107_v44 }
 0x221   :  { %1870 = vmatpush.msra.mxu1 %v5558_v22  ;;  %1672 = vmatpush.msrb.mxu0 %v7105_v35 }
 0x222   :  { %1897 = vmatpush.msra.mxu2 %v5719_v56  ;;  %1934 = vmatpush.msra.mxu3 %v7108_v15 }
 0x223   :  { %1872 = vmatpush.msra.mxu1 %v7093_v42  ;;  %1674 = vmatpush.msrb.mxu0 %v7107_v44 }
 0x224   :  { %1899 = vmatpush.msra.mxu2 %v5732_v61  ;;  %1940 = vmatpush.msra.mxu3 %v7109_v60 }
 0x225   :  { %1874 = vmatpush.msra.mxu1 %v7096_v53  ;;  %1825 = vmatpush.msra.mxu0 %v7110_v43 }
 0x226   :  { %1901 = vmatpush.msra.mxu2 %v5743_v19  ;;  %1946 = vmatpush.msra.mxu3 %v7111_v3  ;;  %v7122_v3 = vld [vmem:[#allocation26_spill] sm:$0xff] }
 0x227   :  { %1876 = vmatpush.msra.mxu1 %v7099_v49  ;;  %1829 = vmatpush.msra.mxu0 %v7112_v52  ;;  %v7121_v52 = vld [vmem:[#allocation39_spill] sm:$0xff] }
 0x228   :  { %1903 = vmatpush.msra.mxu2 %v5762_v12  ;;  %1952 = vmatpush.msra.mxu3 %v7113_v16  ;;  %v7119_v16 = vld [vmem:[#allocation38_spill] sm:$0xff] }
 0x229   :  { %1878 = vmatpush.msra.mxu1 %v7102_v7  ;;  %1833 = vmatpush.msra.mxu0 %v7114_v5  ;;  %v7120_v5 = vld [vmem:[#allocation24_spill] sm:$0xff] }
 0x22a   :  { %1905 = vmatpush.msra.mxu2 %v5777_v21  ;;  %1958 = vmatpush.msra.mxu3 %v7115_v10  ;;  %v7123_v10 = vld [vmem:[#allocation27_spill] sm:$0xff] }
 0x22b   :  { %1880 = vmatpush.msra.mxu1 %v7105_v35  ;;  %1837 = vmatpush.msra.mxu0 %v7116_v63 }
 0x22c   :  { %1907 = vmatpush.msra.mxu2 %v5792_v26  ;;  %1964 = vmatpush.msra.mxu3 %v7117_v57 }
 0x22d   :  { %1882 = vmatpush.msra.mxu1 %v7107_v44  ;;  %1841 = vmatpush.msra.mxu0 %v7118_v25 }
 0x22e   :  { %1909 = vmatpush.msra.mxu2 %v5809_v32  ;;  %1970 = vmatpush.msra.mxu3 %v7119_v16 }
 0x22f   :  { %1845 = vmatpush.msra.mxu0 %v7120_v5 }
 0x230   :  { %1911 = vmatpush.msra.mxu2 %v5823_v47  ;;  %1976 = vmatpush.msra.mxu3 %v7121_v52 }
 0x231   :  { %1849 = vmatpush.msra.mxu0 %v7122_v3 }
 0x233   :  { %1853 = vmatpush.msra.mxu0 %v7123_v10 }
 0x276   :  { %v1223_v60 = vpop.f32.mrf.mxu1 }
 0x27e   :  { %v1162_v63 = vpop.f32.mrf.mxu0  ;;  %v1261_v57 = vpop.f32.mrf.mxu2 }
 0x27f   :  { %v1163_v43 = vadd.f32 %v1162_v63, %v6037_v41  ;;  %v1366_v16 = vpop.f32.mrf.mxu1 }
 0x280   :  { %v1292_v25 = vpop.f32.mrf.mxu3 }
 0x281   :  { %v1224_v15 = vadd.f32 %v1223_v60, %v1163_v43 }
 0x283   :  { %v1262_v44 = vadd.f32 %v1261_v57, %v1224_v15 }
 0x285   :  { %v1293_v18 = vadd.f32 %v1292_v25, %v1262_v44 }
 0x287   :  { %v1399_v3 = vpop.f32.mrf.mxu2 }
 0x288   :  { %v1337_v35 = vpop.f32.mrf.mxu0  ;;  %v1400_v10 = vadd.f32 %v1399_v3, %v6045_v38 }
 0x289   :  { %v1338_v36 = vadd.f32 %v1337_v35, %v1293_v18  ;;  %v1529_v25 = vpop.f32.mrf.mxu1 }
 0x28a   :  { %v1460_v1 = vpop.f32.mrf.mxu3 }
 0x28b   :  { %v1367_v0 = vadd.f32 %v1366_v16, %v1338_v36  ;;  %v1461_v60 = vadd.f32 %v1460_v1, %v1400_v10 }
 0x28d   :  { %v1607_v5 = vrot.slane %v1367_v0, 6 }
 0x28f   :  { %v1609_v52 = vadd.f32 %v1607_v5, %v6042_v58 }
 0x290   :  { %v1498_v63 = vpop.f32.mrf.mxu0 }
 0x291   :  { %v5079_v7 = vmul.f32 -1.442695, %v1609_v52  ;;  %v1499_v57 = vadd.f32 %v1498_v63, %v1461_v60  ;;  %v1574_v18 = vpop.f32.mrf.mxu2 }
 0x293   :  { %5099 = vpow2.f32 %v5079_v7  ;;  %v1530_v44 = vadd.f32 %v1529_v25, %v1499_v57  ;;  %v1603_v16 = vpop.f32.mrf.mxu3 }
 0x295   :  { %v1575_v36 = vadd.f32 %v1574_v18, %v1530_v44 }
 0x297   :  { %v1604_v5 = vadd.f32 %v1603_v16, %v1575_v36 }
 0x299   :  { %v5100_v41 = vpop.eup %5099  ;;  %v1630_v63 = vrot.slane %v1604_v5, 6 }
 0x29a   :  { %v1613_v43 = vadd.f32 1.0, %v5100_v41  ;;  %v1641_v41 = vrot.slane %v6056_v59, 6 }
 0x29c   :  { %5101 = vrcp.f32 %v1613_v43  ;;  %v1625_v52 = vand.u32 2147483648, %v1613_v43  ;;  %v1623_v3 = vand.u32 2147483647, %v1613_v43  ;;  %vm1619_vm6 = vweird.f32 %v1613_v43 }
 0x29e   :  { %v1626_v1 = vor.u32 1.1754944e-38, %v1625_v52  ;;  %vm1624_vm8 = vcmp.eq.f32.partialorder %v1623_v3, 8.507059e+37 }
 0x2a2   :  { %v5102_v35 = vpop.eup %5101 }
 0x2a3   :  { %v1615_v0 = vmul.f32 %v5102_v35, %v1613_v43  ;;  %vm1620_vm5 = vweird.f32 %v5102_v35 }
 0x2a4   :  { %vm1621_vm7 = vmor %vm1619_vm6, %vm1620_vm5 }
 0x2a5   :  { %v1616_v15 = vsub.f32 1.0, %v1615_v0 }
 0x2a7   :  { %v1617_v7 = vmul.f32 %v5102_v35, %v1616_v15 }
 0x2a9   :  { %v1618_v38 = vadd.f32 %v5102_v35, %v1617_v7 }
 0x2ab   :  { %v1622_v10 = vsel %vm1621_vm7, %v5102_v35, %v1618_v38  ;;  %vm4761_vm7 = vcmask 517120  }
 0x2ac   :  { %v1627_v60 = vsel %vm1624_vm8, %v1626_v1, %v1622_v10  ;;  %v7125_v1 = vld [vmem:[#allocation20_spill] sm:$0xff]  ;;  %v7127_v10 = vld [vmem:[#allocation31_spill] sm:$0xff] }
 0x2ad   :  { %v1632_v57 = vmul.f32 %v1630_v63, %v1627_v60  ;;  %v1643_v25 = vmul.f32 %v1641_v41, %v1627_v60  ;;  %v1635_v36 = vsub.f32 1.0, %v1627_v60  ;;  %v7126_v41 = vld [vmem:[#allocation15_spill] sm:$0xff]  ;;  %v7129_v60 = vld [vmem:[#allocation18_spill] sm:$0xff] }
 0x2ae   :  { %v7128_v63 = vld [vmem:[#allocation23_spill] sm:$0xff] }
 0x2af   :  { %v1633_v44 = vadd.f32 %v1632_v57, %v6052_v39  ;;  %v7130_v57 = vld [vmem:[#allocation25_spill] sm:$0xff] }
 0x2b1   :  { %5103 = vtanh.f32 %v1633_v44  ;;  %v7132_v44 = vld [vmem:[#allocation32_spill] sm:$0xff] }
 0x2b7   :  { %v5104_v18 = vpop.eup %5103 }
 0x2b8   :  { %1637 = vrot.lane.b32.xlu1 %v5104_v18, %s5196_s2  ;;  %v7133_v18 = vld [vmem:[#allocation33_spill] sm:$0xff] }
 0x32a   :  { %v1638_v0 = vpop.permute.xlu1 %1637 }
 0x32b   :  { %v1640_v15 = vmul.f32 %v1638_v0, %v1635_v36  ;;  %v7134_v36 = vld [vmem:[#allocation10_spill] sm:$0xff] }
 0x32c   :  { %v7135_v0 = vld [vmem:[#allocation34_spill] sm:$0xff] }
 0x32d   :  { %v6166_v43 = vadd.f32 %v1643_v25, %v1640_v15  ;;  %v7131_v25 = vld [vmem:[#allocation21_spill] sm:$0xff] }
 0x32e   :  { %v7136_v15 = vld [vmem:[#allocation13_spill] sm:$0xff] }
 0x32f   :  { %v1646_v16 = vrot.slane %v6166_v43, 2 }
 0x331   :  { %1647 = vrot.lane.b32.xlu1 %v1646_v16, %s5196_s2  ;;  %v7137_v16 = vld [vmem:[#allocation35_spill] sm:$0xff] }
 0x3a3   :  { %v6170_v38 = vpop.permute.xlu1 %1647 }
 0x3a4   :  { %7124 = vst [vmem:[#allocation11_spill] sm:$0xff] %v6170_v38  ;;  %v1649_v59 = vsel %vm54_vm0, %v6170_v38, 0  ;;  %v7144_v38 = vld [vmem:[#allocation24_spill] sm:$0xff] }
 0x3a5   :  { %v1675_v35 = vand.u32 4294901760, %v1649_v59 }
 0x3a7   :  { %v1676_v52 = vsub.f32 %v1649_v59, %v1675_v35  ;;  %1741 = vmatmul.f32.vlgmr.msrb.gmra.mxu1 %v1675_v35  ;;  %v7138_v59 = vld [vmem:[#allocation16_spill] sm:$0xff] }
 0x3a8   :  { %2029 = vmatpush.msrb.mxu1 %v5719_v56 }
 0x3a9   :  { %1779 = vmatmul.f32.vlgmr.msrb.gmra.mxu2 %v1676_v52  ;;  %v1677_v5 = vand.u32 4294901760, %v1676_v52 }
 0x3aa   :  { %2031 = vmatpush.msrb.mxu1 %v5732_v61  ;;  %2062 = vmatpush.msrb.mxu2 %v5767_v4 }
 0x3ab   :  { %1810 = vmatmul.f32.vlgmr.msrb.gmra.mxu3 %v1677_v5  ;;  %v1678_v7 = vsub.f32 %v1676_v52, %v1677_v5 }
 0x3ac   :  { %2033 = vmatpush.msrb.mxu1 %v5743_v19  ;;  %2066 = vmatpush.msrb.mxu2 %v5782_v9 }
 0x3ad   :  { %2105 = vmatpush.msrb.mxu3 %v5719_v56  ;;  %v1679_v3 = vand.u32 4294901760, %v1678_v7  ;;  %v7142_v7 = vld [vmem:[#allocation22_spill] sm:$0xff] }
 0x3ae   :  { %2035 = vmatpush.msrb.mxu1 %v5762_v12  ;;  %2070 = vmatpush.msrb.mxu2 %v5799_v46 }
 0x3af   :  { %2107 = vmatpush.msrb.mxu3 %v5732_v61  ;;  %1680 = vmatmul.f32.vlgmr.msrb.gmra.mxu0 %v1679_v3 }
 0x3b0   :  { %1884 = vmatmul.f32.vlgmr.msra.gmra.mxu1 %v1675_v35  ;;  %1992 = vmatpush.msrb.mxu0 %v5741_v62 }
 0x3b1   :  { %2037 = vmatpush.msrb.mxu1 %v5777_v21  ;;  %2074 = vmatpush.msrb.mxu2 %v5818_v40 }
 0x3b2   :  { %2109 = vmatpush.msrb.mxu3 %v5743_v19  ;;  %1917 = vmatmul.f32.vlgmr.msra.gmra.mxu2 %v1679_v3  ;;  %v7143_v3 = vld [vmem:[#allocation38_spill] sm:$0xff] }
 0x3b3   :  { %1995 = vmatpush.msrb.mxu0 %v5755_v31  ;;  %2039 = vmatpush.msrb.mxu1 %v5792_v26 }
 0x3b4   :  { %2078 = vmatpush.msrb.mxu2 %v5834_v6  ;;  %2111 = vmatpush.msrb.mxu3 %v5762_v12 }
 0x3b5   :  { %1978 = vmatmul.f32.vlgmr.msra.gmra.mxu3 %v1675_v35  ;;  %1998 = vmatpush.msrb.mxu0 %v5770_v20 }
 0x3b6   :  { %2041 = vmatpush.msrb.mxu1 %v5809_v32  ;;  %2082 = vmatpush.msrb.mxu2 %v5848_v27 }
 0x3b7   :  { %2113 = vmatpush.msrb.mxu3 %v5777_v21  ;;  %2001 = vmatpush.msrb.mxu0 %v5790_v11 }
 0x3b8   :  { %2043 = vmatpush.msrb.mxu1 %v5823_v47  ;;  %2086 = vmatpush.msrb.mxu2 %v5862_v28 }
 0x3b9   :  { %2115 = vmatpush.msrb.mxu3 %v5792_v26  ;;  %1855 = vmatmul.f32.vlgmr.msra.gmra.mxu0 %v1675_v35 }
 0x3ba   :  { %2047 = vmatmul.f32.vlgmr.msrb.gmra.mxu1 %v1677_v5  ;;  %2004 = vmatpush.msrb.mxu0 %v5807_v13  ;;  %v7141_v5 = vld [vmem:[#allocation37_spill] sm:$0xff] }
 0x3bb   :  { %2090 = vmatpush.msrb.mxu2 %v5873_v55  ;;  %2117 = vmatpush.msrb.mxu3 %v5809_v32 }
 0x3bc   :  { %2092 = vmatmul.f32.vlgmr.msrb.gmra.mxu2 %v1675_v35  ;;  %2007 = vmatpush.msrb.mxu0 %v5821_v23 }
 0x3bd   :  { %2119 = vmatpush.msrb.mxu3 %v5823_v47  ;;  %2216 = vmatpush.msra.mxu1 %v5655_v37 }
 0x3be   :  { %2121 = vmatmul.f32.vlgmr.msrb.gmra.mxu3 %v1675_v35  ;;  %2010 = vmatpush.msrb.mxu0 %v5837_v24  ;;  %v7139_v35 = vld [vmem:[#allocation36_spill] sm:$0xff] }
 0x3bf   :  { %2222 = vmatpush.msra.mxu1 %v5669_v14  ;;  %2274 = vmatpush.msra.mxu2 %v5569_v30 }
 0x3c0   :  { %2013 = vmatpush.msrb.mxu0 %v5851_v8  ;;  %2311 = vmatpush.msra.mxu3 %v5548_v17 }
 0x3c1   :  { %2016 = vmatmul.f32.vlgmr.msrb.gmra.mxu0 %v1676_v52  ;;  %2228 = vmatpush.msra.mxu1 %v5683_v45  ;;  %v7140_v52 = vld [vmem:[#allocation19_spill] sm:$0xff] }
 0x3c2   :  { %2277 = vmatpush.msra.mxu2 %v5582_v50  ;;  %2313 = vmatpush.msra.mxu3 %v5558_v22 }
 0x3c3   :  { %2234 = vmatpush.msra.mxu1 %v5694_v48  ;;  %2179 = vmatpush.msra.mxu0 %v5548_v17 }
 0x3c4   :  { %2280 = vmatpush.msra.mxu2 %v7092_v2  ;;  %2315 = vmatpush.msra.mxu3 %v7093_v42 }
 0x3c5   :  { %2240 = vmatpush.msra.mxu1 %v7094_v33  ;;  %2181 = vmatpush.msra.mxu0 %v5558_v22 }
 0x3c6   :  { %2283 = vmatpush.msra.mxu2 %v7095_v34  ;;  %2317 = vmatpush.msra.mxu3 %v7096_v53 }
 0x3c7   :  { %2246 = vmatpush.msra.mxu1 %v7097_v29  ;;  %2183 = vmatpush.msra.mxu0 %v7093_v42 }
 0x3c8   :  { %2286 = vmatpush.msra.mxu2 %v7098_v51  ;;  %2319 = vmatpush.msra.mxu3 %v7099_v49 }
 0x3c9   :  { %2252 = vmatpush.msra.mxu1 %v7100_v54  ;;  %2185 = vmatpush.msra.mxu0 %v7096_v53 }
 0x3ca   :  { %2289 = vmatpush.msra.mxu2 %v7125_v1  ;;  %2321 = vmatpush.msra.mxu3 %v7126_v41 }
 0x3cb   :  { %2258 = vmatpush.msra.mxu1 %v7127_v10  ;;  %2187 = vmatpush.msra.mxu0 %v7099_v49 }
 0x3cc   :  { %2292 = vmatpush.msra.mxu2 %v7128_v63  ;;  %2323 = vmatpush.msra.mxu3 %v7129_v60 }
 0x3cd   :  { %2387 = vmatpush.msrb.mxu1 %v5548_v17  ;;  %2189 = vmatpush.msra.mxu0 %v7126_v41 }
 0x3ce   :  { %2295 = vmatpush.msra.mxu2 %v7130_v57  ;;  %2325 = vmatpush.msra.mxu3 %v7131_v25 }
 0x3cf   :  { %2389 = vmatpush.msrb.mxu1 %v5558_v22  ;;  %2191 = vmatpush.msra.mxu0 %v7129_v60 }
 0x3d0   :  { %2416 = vmatpush.msrb.mxu2 %v5719_v56  ;;  %2453 = vmatpush.msrb.mxu3 %v7132_v44 }
 0x3d1   :  { %2391 = vmatpush.msrb.mxu1 %v7093_v42  ;;  %2193 = vmatpush.msra.mxu0 %v7131_v25 }
 0x3d2   :  { %2418 = vmatpush.msrb.mxu2 %v5732_v61  ;;  %2459 = vmatpush.msrb.mxu3 %v7133_v18 }
 0x3d3   :  { %2393 = vmatpush.msrb.mxu1 %v7096_v53  ;;  %2344 = vmatpush.msrb.mxu0 %v7134_v36 }
 0x3d4   :  { %2420 = vmatpush.msrb.mxu2 %v5743_v19  ;;  %2465 = vmatpush.msrb.mxu3 %v7135_v0 }
 0x3d5   :  { %2395 = vmatpush.msrb.mxu1 %v7099_v49  ;;  %2348 = vmatpush.msrb.mxu0 %v7136_v15  ;;  %v7148_v15 = vld [vmem:[#allocation52_spill] sm:$0xff] }
 0x3d6   :  { %2422 = vmatpush.msrb.mxu2 %v5762_v12  ;;  %2471 = vmatpush.msrb.mxu3 %v7137_v16  ;;  %v7146_v16 = vld [vmem:[#allocation26_spill] sm:$0xff] }
 0x3d7   :  { %2397 = vmatpush.msrb.mxu1 %v7126_v41  ;;  %2352 = vmatpush.msrb.mxu0 %v7138_v59  ;;  %v7145_v59 = vld [vmem:[#allocation39_spill] sm:$0xff] }
 0x3d8   :  { %2424 = vmatpush.msrb.mxu2 %v5777_v21  ;;  %2477 = vmatpush.msrb.mxu3 %v7139_v35  ;;  %v7147_v35 = vld [vmem:[#allocation27_spill] sm:$0xff] }
 0x3d9   :  { %2399 = vmatpush.msrb.mxu1 %v7129_v60  ;;  %2356 = vmatpush.msrb.mxu0 %v7140_v52 }
 0x3da   :  { %2426 = vmatpush.msrb.mxu2 %v5792_v26  ;;  %2483 = vmatpush.msrb.mxu3 %v7141_v5 }
 0x3db   :  { %2401 = vmatpush.msrb.mxu1 %v7131_v25  ;;  %2360 = vmatpush.msrb.mxu0 %v7142_v7 }
 0x3dc   :  { %2428 = vmatpush.msrb.mxu2 %v5809_v32  ;;  %2489 = vmatpush.msrb.mxu3 %v7143_v3 }
 0x3dd   :  { %2364 = vmatpush.msrb.mxu0 %v7144_v38 }
 0x3de   :  { %2430 = vmatpush.msrb.mxu2 %v5823_v47  ;;  %2495 = vmatpush.msrb.mxu3 %v7145_v59 }
 0x3df   :  { %2368 = vmatpush.msrb.mxu0 %v7146_v16 }
 0x3e1   :  { %2372 = vmatpush.msrb.mxu0 %v7147_v35  ;;  %v7149_v35 = vld [vmem:[#allocation54_spill] sm:$0xff] }
 0x424   :  { %v1742_v36 = vpop.f32.mrf.mxu1 }
 0x42c   :  { %v1681_v52 = vpop.f32.mrf.mxu0  ;;  %v1780_v5 = vpop.f32.mrf.mxu2 }
 0x42d   :  { %v1682_v0 = vadd.f32 %v1681_v52, %v7148_v15  ;;  %v1885_v3 = vpop.f32.mrf.mxu1 }
 0x42e   :  { %v1811_v7 = vpop.f32.mrf.mxu3 }
 0x42f   :  { %v1743_v18 = vadd.f32 %v1742_v36, %v1682_v0 }
 0x431   :  { %v1781_v44 = vadd.f32 %v1780_v5, %v1743_v18 }
 0x433   :  { %v1812_v25 = vadd.f32 %v1811_v7, %v1781_v44 }
 0x435   :  { %v1918_v16 = vpop.f32.mrf.mxu2 }
 0x436   :  { %v1856_v57 = vpop.f32.mrf.mxu0  ;;  %v1919_v41 = vadd.f32 %v1918_v16, %v7149_v35 }
 0x437   :  { %v1857_v60 = vadd.f32 %v1856_v57, %v1812_v25  ;;  %v2048_v44 = vpop.f32.mrf.mxu1 }
 0x438   :  { %v1979_v1 = vpop.f32.mrf.mxu3 }
 0x439   :  { %v1886_v63 = vadd.f32 %v1885_v3, %v1857_v60  ;;  %v1980_v36 = vadd.f32 %v1979_v1, %v1919_v41  ;;  %v2160_v41 = vrot.slane %v6166_v43, 6 }
 0x43b   :  { %v2126_v38 = vrot.slane %v1886_v63, 4 }
 0x43d   :  { %v2128_v59 = vadd.f32 %v2126_v38, %v6042_v58 }
 0x43e   :  { %v2017_v52 = vpop.f32.mrf.mxu0 }
 0x43f   :  { %v5080_v10 = vmul.f32 -1.442695, %v2128_v59  ;;  %v2018_v18 = vadd.f32 %v2017_v52, %v1980_v36  ;;  %v2093_v25 = vpop.f32.mrf.mxu2 }
 0x441   :  { %5105 = vpow2.f32 %v5080_v10  ;;  %v2049_v5 = vadd.f32 %v2048_v44, %v2018_v18  ;;  %v2122_v38 = vpop.f32.mrf.mxu3 }
 0x443   :  { %v2094_v60 = vadd.f32 %v2093_v25, %v2049_v5 }
 0x445   :  { %v2123_v3 = vadd.f32 %v2122_v38, %v2094_v60 }
 0x447   :  { %v5106_v15 = vpop.eup %5105  ;;  %v2149_v52 = vrot.slane %v2123_v3, 4 }
 0x448   :  { %v2132_v0 = vadd.f32 1.0, %v5106_v15 }
 0x44a   :  { %5107 = vrcp.f32 %v2132_v0  ;;  %v2144_v59 = vand.u32 2147483648, %v2132_v0  ;;  %v2142_v16 = vand.u32 2147483647, %v2132_v0  ;;  %vm2138_vm10 = vweird.f32 %v2132_v0 }
 0x44c   :  { %v2145_v1 = vor.u32 1.1754944e-38, %v2144_v59  ;;  %vm2143_vm12 = vcmp.eq.f32.partialorder %v2142_v16, 8.507059e+37 }
 0x450   :  { %v5108_v57 = vpop.eup %5107 }
 0x451   :  { %v2134_v63 = vmul.f32 %v5108_v57, %v2132_v0  ;;  %vm2139_vm9 = vweird.f32 %v5108_v57 }
 0x452   :  { %vm2140_vm11 = vmor %vm2138_vm10, %vm2139_vm9 }
 0x453   :  { %v2135_v7 = vsub.f32 1.0, %v2134_v63 }
 0x455   :  { %v2136_v10 = vmul.f32 %v5108_v57, %v2135_v7 }
 0x457   :  { %v2137_v35 = vadd.f32 %v5108_v57, %v2136_v10 }
 0x459   :  { %v2141_v15 = vsel %vm2140_vm11, %v5108_v57, %v2137_v35 }
 0x45a   :  { %v2146_v36 = vsel %vm2143_vm12, %v2145_v1, %v2141_v15  ;;  %v7151_v1 = vld [vmem:[#allocation20_spill] sm:$0xff]  ;;  %v7153_v15 = vld [vmem:[#allocation31_spill] sm:$0xff] }
 0x45b   :  { %v2151_v18 = vmul.f32 %v2149_v52, %v2146_v36  ;;  %v2162_v44 = vmul.f32 %v2160_v41, %v2146_v36  ;;  %v2154_v60 = vsub.f32 1.0, %v2146_v36  ;;  %v7152_v41 = vld [vmem:[#allocation15_spill] sm:$0xff]  ;;  %v7155_v36 = vld [vmem:[#allocation18_spill] sm:$0xff] }
 0x45c   :  { %v7154_v52 = vld [vmem:[#allocation23_spill] sm:$0xff] }
 0x45d   :  { %v2152_v5 = vadd.f32 %v2151_v18, %v6052_v39  ;;  %v7156_v18 = vld [vmem:[#allocation25_spill] sm:$0xff] }
 0x45f   :  { %5109 = vtanh.f32 %v2152_v5  ;;  %v7158_v5 = vld [vmem:[#allocation32_spill] sm:$0xff] }
 0x465   :  { %v5110_v25 = vpop.eup %5109 }
 0x466   :  { %2156 = vrot.lane.b32.xlu2 %v5110_v25, %s5196_s2  ;;  %v7159_v25 = vld [vmem:[#allocation33_spill] sm:$0xff] }
 0x4c0   :  { %v2157_v63 = vpop.permute.xlu2 %2156 }
 0x4c1   :  { %v2159_v7 = vmul.f32 %v2157_v63, %v2154_v60  ;;  %v7160_v60 = vld [vmem:[#allocation10_spill] sm:$0xff] }
 0x4c2   :  { %v7161_v63 = vld [vmem:[#allocation34_spill] sm:$0xff] }
 0x4c3   :  { %v6276_v0 = vadd.f32 %v2162_v44, %v2159_v7  ;;  %v7157_v44 = vld [vmem:[#allocation21_spill] sm:$0xff] }
 0x4c4   :  { %v7162_v7 = vld [vmem:[#allocation13_spill] sm:$0xff] }
 0x4c5   :  { %v2165_v38 = vrot.slane %v6276_v0, 4 }
 0x4c7   :  { %2166 = vrot.lane.b32.xlu2 %v2165_v38, %s5196_s2  ;;  %v7163_v38 = vld [vmem:[#allocation35_spill] sm:$0xff] }
 0x521   :  { %v6280_v43 = vpop.permute.xlu2 %2166 }
 0x522   :  { %7150 = vst [vmem:[#allocation8_spill] sm:$0xff] %v6280_v43  ;;  %v2168_v35 = vsel %vm54_vm0, %v6280_v43, 0  ;;  %v7170_v43 = vld [vmem:[#allocation24_spill] sm:$0xff] }
 0x523   :  { %v2194_v57 = vand.u32 4294901760, %v2168_v35 }
 0x525   :  { %v2195_v59 = vsub.f32 %v2168_v35, %v2194_v57  ;;  %2260 = vmatmul.f32.vlgmr.msra.gmra.mxu1 %v2194_v57  ;;  %v7164_v35 = vld [vmem:[#allocation16_spill] sm:$0xff] }
 0x526   :  { %2548 = vmatpush.msra.mxu1 %v5719_v56 }
 0x527   :  { %2298 = vmatmul.f32.vlgmr.msra.gmra.mxu2 %v2195_v59  ;;  %v2196_v3 = vand.u32 4294901760, %v2195_v59 }
 0x528   :  { %2550 = vmatpush.msra.mxu1 %v5732_v61  ;;  %2581 = vmatpush.msra.mxu2 %v5767_v4 }
 0x529   :  { %2329 = vmatmul.f32.vlgmr.msra.gmra.mxu3 %v2196_v3  ;;  %v2197_v10 = vsub.f32 %v2195_v59, %v2196_v3 }
 0x52a   :  { %2552 = vmatpush.msra.mxu1 %v5743_v19  ;;  %2585 = vmatpush.msra.mxu2 %v5782_v9 }
 0x52b   :  { %2624 = vmatpush.msra.mxu3 %v5719_v56  ;;  %v2198_v16 = vand.u32 4294901760, %v2197_v10  ;;  %v7168_v10 = vld [vmem:[#allocation22_spill] sm:$0xff] }
 0x52c   :  { %2554 = vmatpush.msra.mxu1 %v5762_v12  ;;  %2589 = vmatpush.msra.mxu2 %v5799_v46 }
 0x52d   :  { %2626 = vmatpush.msra.mxu3 %v5732_v61  ;;  %2199 = vmatmul.f32.vlgmr.msra.gmra.mxu0 %v2198_v16 }
 0x52e   :  { %2403 = vmatmul.f32.vlgmr.msrb.gmra.mxu1 %v2194_v57  ;;  %2511 = vmatpush.msra.mxu0 %v5741_v62 }
 0x52f   :  { %2556 = vmatpush.msra.mxu1 %v5777_v21  ;;  %2593 = vmatpush.msra.mxu2 %v5818_v40 }
 0x530   :  { %2628 = vmatpush.msra.mxu3 %v5743_v19  ;;  %2436 = vmatmul.f32.vlgmr.msrb.gmra.mxu2 %v2198_v16  ;;  %v7169_v16 = vld [vmem:[#allocation38_spill] sm:$0xff] }
 0x531   :  { %2514 = vmatpush.msra.mxu0 %v5755_v31  ;;  %2558 = vmatpush.msra.mxu1 %v5792_v26 }
 0x532   :  { %2597 = vmatpush.msra.mxu2 %v5834_v6  ;;  %2630 = vmatpush.msra.mxu3 %v5762_v12 }
 0x533   :  { %2497 = vmatmul.f32.vlgmr.msrb.gmra.mxu3 %v2194_v57  ;;  %2517 = vmatpush.msra.mxu0 %v5770_v20 }
 0x534   :  { %2560 = vmatpush.msra.mxu1 %v5809_v32  ;;  %2601 = vmatpush.msra.mxu2 %v5848_v27 }
 0x535   :  { %2632 = vmatpush.msra.mxu3 %v5777_v21  ;;  %2520 = vmatpush.msra.mxu0 %v5790_v11 }
 0x536   :  { %2562 = vmatpush.msra.mxu1 %v5823_v47  ;;  %2605 = vmatpush.msra.mxu2 %v5862_v28 }
 0x537   :  { %2634 = vmatpush.msra.mxu3 %v5792_v26  ;;  %2374 = vmatmul.f32.vlgmr.msrb.gmra.mxu0 %v2194_v57 }
 0x538   :  { %2566 = vmatmul.f32.vlgmr.msra.gmra.mxu1 %v2196_v3  ;;  %2523 = vmatpush.msra.mxu0 %v5807_v13  ;;  %v7167_v3 = vld [vmem:[#allocation37_spill] sm:$0xff] }
 0x539   :  { %2609 = vmatpush.msra.mxu2 %v5873_v55  ;;  %2636 = vmatpush.msra.mxu3 %v5809_v32 }
 0x53a   :  { %2611 = vmatmul.f32.vlgmr.msra.gmra.mxu2 %v2194_v57  ;;  %2526 = vmatpush.msra.mxu0 %v5821_v23 }
 0x53b   :  { %2638 = vmatpush.msra.mxu3 %v5823_v47  ;;  %2735 = vmatpush.msrb.mxu1 %v5655_v37 }
 0x53c   :  { %2640 = vmatmul.f32.vlgmr.msra.gmra.mxu3 %v2194_v57  ;;  %2529 = vmatpush.msra.mxu0 %v5837_v24  ;;  %v7165_v57 = vld [vmem:[#allocation36_spill] sm:$0xff] }
 0x53d   :  { %2741 = vmatpush.msrb.mxu1 %v5669_v14  ;;  %2793 = vmatpush.msrb.mxu2 %v5569_v30 }
 0x53e   :  { %2532 = vmatpush.msra.mxu0 %v5851_v8  ;;  %2830 = vmatpush.msrb.mxu3 %v5548_v17 }
 0x53f   :  { %2535 = vmatmul.f32.vlgmr.msra.gmra.mxu0 %v2195_v59  ;;  %2747 = vmatpush.msrb.mxu1 %v5683_v45  ;;  %v7166_v59 = vld [vmem:[#allocation19_spill] sm:$0xff] }
 0x540   :  { %2796 = vmatpush.msrb.mxu2 %v5582_v50  ;;  %2832 = vmatpush.msrb.mxu3 %v5558_v22 }
 0x541   :  { %2753 = vmatpush.msrb.mxu1 %v5694_v48  ;;  %2698 = vmatpush.msrb.mxu0 %v5548_v17 }
 0x542   :  { %2799 = vmatpush.msrb.mxu2 %v7092_v2  ;;  %2834 = vmatpush.msrb.mxu3 %v7093_v42 }
 0x543   :  { %2759 = vmatpush.msrb.mxu1 %v7094_v33  ;;  %2700 = vmatpush.msrb.mxu0 %v5558_v22 }
 0x544   :  { %2802 = vmatpush.msrb.mxu2 %v7095_v34  ;;  %2836 = vmatpush.msrb.mxu3 %v7096_v53 }
 0x545   :  { %2765 = vmatpush.msrb.mxu1 %v7097_v29  ;;  %2702 = vmatpush.msrb.mxu0 %v7093_v42 }
 0x546   :  { %2805 = vmatpush.msrb.mxu2 %v7098_v51  ;;  %2838 = vmatpush.msrb.mxu3 %v7099_v49 }
 0x547   :  { %2771 = vmatpush.msrb.mxu1 %v7100_v54  ;;  %2704 = vmatpush.msrb.mxu0 %v7096_v53 }
 0x548   :  { %2808 = vmatpush.msrb.mxu2 %v7151_v1  ;;  %2840 = vmatpush.msrb.mxu3 %v7152_v41 }
 0x549   :  { %2777 = vmatpush.msrb.mxu1 %v7153_v15  ;;  %2706 = vmatpush.msrb.mxu0 %v7099_v49 }
 0x54a   :  { %2811 = vmatpush.msrb.mxu2 %v7154_v52  ;;  %2842 = vmatpush.msrb.mxu3 %v7155_v36 }
 0x54b   :  { %2906 = vmatpush.msra.mxu1 %v5548_v17  ;;  %2708 = vmatpush.msrb.mxu0 %v7152_v41 }
 0x54c   :  { %2814 = vmatpush.msrb.mxu2 %v7156_v18  ;;  %2844 = vmatpush.msrb.mxu3 %v7157_v44 }
 0x54d   :  { %2908 = vmatpush.msra.mxu1 %v5558_v22  ;;  %2710 = vmatpush.msrb.mxu0 %v7155_v36 }
 0x54e   :  { %2935 = vmatpush.msra.mxu2 %v5719_v56  ;;  %2972 = vmatpush.msra.mxu3 %v7158_v5 }
 0x54f   :  { %2910 = vmatpush.msra.mxu1 %v7093_v42  ;;  %2712 = vmatpush.msrb.mxu0 %v7157_v44 }
 0x550   :  { %2937 = vmatpush.msra.mxu2 %v5732_v61  ;;  %2978 = vmatpush.msra.mxu3 %v7159_v25 }
 0x551   :  { %2912 = vmatpush.msra.mxu1 %v7096_v53  ;;  %2863 = vmatpush.msra.mxu0 %v7160_v60 }
 0x552   :  { %2939 = vmatpush.msra.mxu2 %v5743_v19  ;;  %2984 = vmatpush.msra.mxu3 %v7161_v63 }
 0x553   :  { %2914 = vmatpush.msra.mxu1 %v7099_v49  ;;  %2867 = vmatpush.msra.mxu0 %v7162_v7  ;;  %v7174_v7 = vld [vmem:[#allocation52_spill] sm:$0xff] }
 0x554   :  { %2941 = vmatpush.msra.mxu2 %v5762_v12  ;;  %2990 = vmatpush.msra.mxu3 %v7163_v38  ;;  %v7172_v38 = vld [vmem:[#allocation26_spill] sm:$0xff] }
 0x555   :  { %2916 = vmatpush.msra.mxu1 %v7152_v41  ;;  %2871 = vmatpush.msra.mxu0 %v7164_v35  ;;  %v7171_v35 = vld [vmem:[#allocation39_spill] sm:$0xff] }
 0x556   :  { %2943 = vmatpush.msra.mxu2 %v5777_v21  ;;  %2996 = vmatpush.msra.mxu3 %v7165_v57  ;;  %v7173_v57 = vld [vmem:[#allocation27_spill] sm:$0xff] }
 0x557   :  { %2918 = vmatpush.msra.mxu1 %v7155_v36  ;;  %2875 = vmatpush.msra.mxu0 %v7166_v59 }
 0x558   :  { %2945 = vmatpush.msra.mxu2 %v5792_v26  ;;  %3002 = vmatpush.msra.mxu3 %v7167_v3 }
 0x559   :  { %2920 = vmatpush.msra.mxu1 %v7157_v44  ;;  %2879 = vmatpush.msra.mxu0 %v7168_v10 }
 0x55a   :  { %2947 = vmatpush.msra.mxu2 %v5809_v32  ;;  %3008 = vmatpush.msra.mxu3 %v7169_v16 }
 0x55b   :  { %2883 = vmatpush.msra.mxu0 %v7170_v43 }
 0x55c   :  { %2949 = vmatpush.msra.mxu2 %v5823_v47  ;;  %3014 = vmatpush.msra.mxu3 %v7171_v35 }
 0x55d   :  { %2887 = vmatpush.msra.mxu0 %v7172_v38 }
 0x55f   :  { %2891 = vmatpush.msra.mxu0 %v7173_v57  ;;  %v7175_v57 = vld [vmem:[#allocation54_spill] sm:$0xff] }
 0x5a2   :  { %v2261_v60 = vpop.f32.mrf.mxu1 }
 0x5aa   :  { %v2200_v59 = vpop.f32.mrf.mxu0  ;;  %v2299_v3 = vpop.f32.mrf.mxu2 }
 0x5ab   :  { %v2201_v63 = vadd.f32 %v2200_v59, %v7174_v7  ;;  %v2404_v16 = vpop.f32.mrf.mxu1 }
 0x5ac   :  { %v2330_v10 = vpop.f32.mrf.mxu3 }
 0x5ad   :  { %v2262_v25 = vadd.f32 %v2261_v60, %v2201_v63 }
 0x5af   :  { %v2300_v5 = vadd.f32 %v2299_v3, %v2262_v25 }
 0x5b1   :  { %v2331_v44 = vadd.f32 %v2330_v10, %v2300_v5 }
 0x5b3   :  { %v2437_v38 = vpop.f32.mrf.mxu2 }
 0x5b4   :  { %v2375_v18 = vpop.f32.mrf.mxu0  ;;  %v2438_v41 = vadd.f32 %v2437_v38, %v7175_v57 }
 0x5b5   :  { %v2376_v36 = vadd.f32 %v2375_v18, %v2331_v44  ;;  %v2567_v5 = vpop.f32.mrf.mxu1 }
 0x5b6   :  { %v2498_v1 = vpop.f32.mrf.mxu3 }
 0x5b7   :  { %v2405_v52 = vadd.f32 %v2404_v16, %v2376_v36  ;;  %v2499_v60 = vadd.f32 %v2498_v1, %v2438_v41  ;;  %v2679_v41 = vrot.slane %v6276_v0, 6 }
 0x5b9   :  { %v2645_v43 = vrot.slane %v2405_v52, 2 }
 0x5bb   :  { %v2647_v35 = vadd.f32 %v2645_v43, %v6042_v58 }
 0x5bc   :  { %v2536_v59 = vpop.f32.mrf.mxu0 }
 0x5bd   :  { %v5081_v15 = vmul.f32 -1.442695, %v2647_v35  ;;  %v2537_v25 = vadd.f32 %v2536_v59, %v2499_v60  ;;  %v2612_v44 = vpop.f32.mrf.mxu2 }
 0x5bf   :  { %5111 = vpow2.f32 %v5081_v15  ;;  %v2568_v3 = vadd.f32 %v2567_v5, %v2537_v25  ;;  %v2641_v58 = vpop.f32.mrf.mxu3 }
 0x5c1   :  { %v2613_v36 = vadd.f32 %v2612_v44, %v2568_v3 }
 0x5c3   :  { %v2642_v35 = vadd.f32 %v2641_v58, %v2613_v36 }
 0x5c5   :  { %v5112_v7 = vpop.eup %5111  ;;  %v2668_v59 = vrot.slane %v2642_v35, 2 }
 0x5c6   :  { %v2651_v63 = vadd.f32 1.0, %v5112_v7 }
 0x5c8   :  { %5113 = vrcp.f32 %v2651_v63  ;;  %v2663_v43 = vand.u32 2147483648, %v2651_v63  ;;  %v2661_v38 = vand.u32 2147483647, %v2651_v63  ;;  %vm2657_vm14 = vweird.f32 %v2651_v63 }
 0x5ca   :  { %v2664_v1 = vor.u32 1.1754944e-38, %v2663_v43  ;;  %vm2662_vm1 = vcmp.eq.f32.partialorder %v2661_v38, 8.507059e+37 }
 0x5ce   :  { %v5114_v18 = vpop.eup %5113 }
 0x5cf   :  { %v2653_v52 = vmul.f32 %v5114_v18, %v2651_v63  ;;  %vm2658_vm13 = vweird.f32 %v5114_v18 }
 0x5d0   :  { %vm2659_vm15 = vmor %vm2657_vm14, %vm2658_vm13 }
 0x5d1   :  { %v2654_v10 = vsub.f32 1.0, %v2653_v52 }
 0x5d3   :  { %v2655_v15 = vmul.f32 %v5114_v18, %v2654_v10 }
 0x5d5   :  { %v2656_v16 = vadd.f32 %v5114_v18, %v2655_v15 }
 0x5d7   :  { %v2660_v7 = vsel %vm2659_vm15, %v5114_v18, %v2656_v16  ;;  %v7176_v16 = vld [vmem:[#allocation20_spill] sm:$0xff] }
 0x5d8   :  { %v2665_v60 = vsel %vm2662_vm1, %v2664_v1, %v2660_v7  ;;  %v7177_v1 = vld [vmem:[#allocation15_spill] sm:$0xff] }
 0x5d9   :  { %v2670_v25 = vmul.f32 %v2668_v59, %v2665_v60  ;;  %v2681_v5 = vmul.f32 %v2679_v41, %v2665_v60  ;;  %v2673_v36 = vsub.f32 1.0, %v2665_v60  ;;  %v7178_v41 = vld [vmem:[#allocation31_spill] sm:$0xff]  ;;  %v7180_v59 = vld [vmem:[#allocation18_spill] sm:$0xff]  ;;  %v7181_v60 = vld [vmem:[#allocation25_spill] sm:$0xff] }
 0x5da   :  { %v7179_v7 = vld [vmem:[#allocation23_spill] sm:$0xff] }
 0x5db   :  { %v2671_v3 = vadd.f32 %v2670_v25, %v6052_v39  ;;  %v7182_v25 = vld [vmem:[#allocation21_spill] sm:$0xff] }
 0x5dd   :  { %5115 = vtanh.f32 %v2671_v3  ;;  %v7184_v3 = vld [vmem:[#allocation33_spill] sm:$0xff] }
 0x5e3   :  { %v5116_v44 = vpop.eup %5115 }
 0x5e4   :  { %2675 = vrot.lane.b32.xlu0 %v5116_v44, %s5196_s2  ;;  %v7185_v44 = vld [vmem:[#allocation10_spill] sm:$0xff] }
 0x656   :  { %v2676_v52 = vpop.permute.xlu0 %2675 }
 0x657   :  { %v2678_v10 = vmul.f32 %v2676_v52, %v2673_v36  ;;  %v7186_v36 = vld [vmem:[#allocation34_spill] sm:$0xff]  ;;  %v7187_v52 = vld [vmem:[#allocation13_spill] sm:$0xff] }
 0x659   :  { %v6386_v63 = vadd.f32 %v2681_v5, %v2678_v10  ;;  %v7183_v5 = vld [vmem:[#allocation32_spill] sm:$0xff]  ;;  %v7188_v10 = vld [vmem:[#allocation35_spill] sm:$0xff] }
 0x65b   :  { %v7028_v58 = vrot.slane %v6386_v63, 6 }
 0x65d   :  { %2685 = vrot.lane.b32.xlu1 %v7028_v58, %s5196_s2  ;;  %v7195_v58 = vld [vmem:[#allocation24_spill] sm:$0xff] }
 0x6cf   :  { %v6392_v0 = vpop.permute.xlu1 %2685 }
 0x6d0   :  { %v2687_v39 = vsel %vm54_vm0, %v6392_v0, 0 }
 0x6d1   :  { %v2713_v18 = vand.u32 4294901760, %v2687_v39 }
 0x6d3   :  { %v2714_v43 = vsub.f32 %v2687_v39, %v2713_v18  ;;  %2779 = vmatmul.f32.vlgmr.msrb.gmra.mxu1 %v2713_v18  ;;  %v7189_v39 = vld [vmem:[#allocation16_spill] sm:$0xff] }
 0x6d4   :  { %3067 = vmatpush.msrb.mxu1 %v5719_v56 }
 0x6d5   :  { %2817 = vmatmul.f32.vlgmr.msrb.gmra.mxu2 %v2714_v43  ;;  %v2715_v35 = vand.u32 4294901760, %v2714_v43 }
 0x6d6   :  { %3069 = vmatpush.msrb.mxu1 %v5732_v61  ;;  %3100 = vmatpush.msrb.mxu2 %v5767_v4 }
 0x6d7   :  { %2848 = vmatmul.f32.vlgmr.msrb.gmra.mxu3 %v2715_v35  ;;  %v2716_v15 = vsub.f32 %v2714_v43, %v2715_v35 }
 0x6d8   :  { %3071 = vmatpush.msrb.mxu1 %v5743_v19  ;;  %3104 = vmatpush.msrb.mxu2 %v5782_v9 }
 0x6d9   :  { %3143 = vmatpush.msrb.mxu3 %v5719_v56  ;;  %v2717_v38 = vand.u32 4294901760, %v2716_v15  ;;  %v7193_v15 = vld [vmem:[#allocation22_spill] sm:$0xff] }
 0x6da   :  { %3073 = vmatpush.msrb.mxu1 %v5762_v12  ;;  %3108 = vmatpush.msrb.mxu2 %v5799_v46 }
 0x6db   :  { %3145 = vmatpush.msrb.mxu3 %v5732_v61  ;;  %2718 = vmatmul.f32.vlgmr.msrb.gmra.mxu0 %v2717_v38 }
 0x6dc   :  { %2922 = vmatmul.f32.vlgmr.msra.gmra.mxu1 %v2713_v18  ;;  %3030 = vmatpush.msrb.mxu0 %v5741_v62 }
 0x6dd   :  { %3075 = vmatpush.msrb.mxu1 %v5777_v21  ;;  %3112 = vmatpush.msrb.mxu2 %v5818_v40 }
 0x6de   :  { %3147 = vmatpush.msrb.mxu3 %v5743_v19  ;;  %2955 = vmatmul.f32.vlgmr.msra.gmra.mxu2 %v2717_v38  ;;  %v7194_v38 = vld [vmem:[#allocation38_spill] sm:$0xff] }
 0x6df   :  { %3033 = vmatpush.msrb.mxu0 %v5755_v31  ;;  %3077 = vmatpush.msrb.mxu1 %v5792_v26 }
 0x6e0   :  { %3116 = vmatpush.msrb.mxu2 %v5834_v6  ;;  %3149 = vmatpush.msrb.mxu3 %v5762_v12 }
 0x6e1   :  { %3016 = vmatmul.f32.vlgmr.msra.gmra.mxu3 %v2713_v18  ;;  %3036 = vmatpush.msrb.mxu0 %v5770_v20 }
 0x6e2   :  { %3079 = vmatpush.msrb.mxu1 %v5809_v32  ;;  %3120 = vmatpush.msrb.mxu2 %v5848_v27 }
 0x6e3   :  { %3151 = vmatpush.msrb.mxu3 %v5777_v21  ;;  %3039 = vmatpush.msrb.mxu0 %v5790_v11 }
 0x6e4   :  { %3081 = vmatpush.msrb.mxu1 %v5823_v47  ;;  %3124 = vmatpush.msrb.mxu2 %v5862_v28 }
 0x6e5   :  { %3153 = vmatpush.msrb.mxu3 %v5792_v26  ;;  %2893 = vmatmul.f32.vlgmr.msra.gmra.mxu0 %v2713_v18 }
 0x6e6   :  { %3085 = vmatmul.f32.vlgmr.msrb.gmra.mxu1 %v2715_v35  ;;  %3042 = vmatpush.msrb.mxu0 %v5807_v13  ;;  %v7192_v35 = vld [vmem:[#allocation37_spill] sm:$0xff] }
 0x6e7   :  { %3128 = vmatpush.msrb.mxu2 %v5873_v55  ;;  %3155 = vmatpush.msrb.mxu3 %v5809_v32 }
 0x6e8   :  { %3130 = vmatmul.f32.vlgmr.msrb.gmra.mxu2 %v2713_v18  ;;  %3045 = vmatpush.msrb.mxu0 %v5821_v23 }
 0x6e9   :  { %3157 = vmatpush.msrb.mxu3 %v5823_v47  ;;  %3246 = vmatpush.msra.mxu1 %v5655_v37 }
 0x6ea   :  { %3159 = vmatmul.f32.vlgmr.msrb.gmra.mxu3 %v2713_v18  ;;  %3048 = vmatpush.msrb.mxu0 %v5837_v24  ;;  %v7190_v18 = vld [vmem:[#allocation36_spill] sm:$0xff] }
 0x6eb   :  { %3252 = vmatpush.msra.mxu1 %v5669_v14  ;;  %3304 = vmatpush.msra.mxu2 %v5569_v30 }
 0x6ec   :  { %3051 = vmatpush.msrb.mxu0 %v5851_v8  ;;  %3341 = vmatpush.msra.mxu3 %v5548_v17 }
 0x6ed   :  { %3054 = vmatmul.f32.vlgmr.msrb.gmra.mxu0 %v2714_v43  ;;  %3258 = vmatpush.msra.mxu1 %v5683_v45  ;;  %v7191_v43 = vld [vmem:[#allocation19_spill] sm:$0xff] }
 0x6ee   :  { %3307 = vmatpush.msra.mxu2 %v5582_v50  ;;  %3343 = vmatpush.msra.mxu3 %v5558_v22 }
 0x6ef   :  { %3264 = vmatpush.msra.mxu1 %v5694_v48  ;;  %3209 = vmatpush.msra.mxu0 %v5548_v17 }
 0x6f0   :  { %3310 = vmatpush.msra.mxu2 %v7092_v2  ;;  %3345 = vmatpush.msra.mxu3 %v7093_v42 }
 0x6f1   :  { %3270 = vmatpush.msra.mxu1 %v7094_v33  ;;  %3211 = vmatpush.msra.mxu0 %v5558_v22 }
 0x6f2   :  { %3313 = vmatpush.msra.mxu2 %v7095_v34  ;;  %3347 = vmatpush.msra.mxu3 %v7096_v53 }
 0x6f3   :  { %3276 = vmatpush.msra.mxu1 %v7097_v29  ;;  %3213 = vmatpush.msra.mxu0 %v7093_v42 }
 0x6f4   :  { %3316 = vmatpush.msra.mxu2 %v7098_v51  ;;  %3349 = vmatpush.msra.mxu3 %v7099_v49 }
 0x6f5   :  { %3282 = vmatpush.msra.mxu1 %v7100_v54  ;;  %3215 = vmatpush.msra.mxu0 %v7096_v53  ;;  %v7206_v54 = vld [vmem:[#allocation44_spill] sm:$0xff] }
 0x6f6   :  { %3319 = vmatpush.msra.mxu2 %v7176_v16  ;;  %3351 = vmatpush.msra.mxu3 %v7177_v1 }
 0x6f7   :  { %3288 = vmatpush.msra.mxu1 %v7178_v41  ;;  %3217 = vmatpush.msra.mxu0 %v7099_v49 }
 0x6f8   :  { %3322 = vmatpush.msra.mxu2 %v7179_v7  ;;  %3353 = vmatpush.msra.mxu3 %v7180_v59 }
 0x6f9   :  { %3417 = vmatpush.msrb.mxu1 %v5548_v17  ;;  %3219 = vmatpush.msra.mxu0 %v7177_v1 }
 0x6fa   :  { %3325 = vmatpush.msra.mxu2 %v7181_v60  ;;  %3355 = vmatpush.msra.mxu3 %v7182_v25 }
 0x6fb   :  { %3419 = vmatpush.msrb.mxu1 %v5558_v22  ;;  %3221 = vmatpush.msra.mxu0 %v7180_v59 }
 0x6fc   :  { %3446 = vmatpush.msrb.mxu2 %v5719_v56  ;;  %3483 = vmatpush.msrb.mxu3 %v7183_v5 }
 0x6fd   :  { %3421 = vmatpush.msrb.mxu1 %v7093_v42  ;;  %3223 = vmatpush.msra.mxu0 %v7182_v25 }
 0x6fe   :  { %3448 = vmatpush.msrb.mxu2 %v5732_v61  ;;  %3489 = vmatpush.msrb.mxu3 %v7184_v3  ;;  %v7202_v3 = vld [vmem:[#allocation41_spill] sm:$0xff] }
 0x6ff   :  { %3423 = vmatpush.msrb.mxu1 %v7096_v53  ;;  %3374 = vmatpush.msrb.mxu0 %v7185_v44 }
 0x700   :  { %3450 = vmatpush.msrb.mxu2 %v5743_v19  ;;  %3495 = vmatpush.msrb.mxu3 %v7186_v36  ;;  %v7201_v36 = vld [vmem:[#allocation40_spill] sm:$0xff] }
 0x701   :  { %3425 = vmatpush.msrb.mxu1 %v7099_v49  ;;  %3378 = vmatpush.msrb.mxu0 %v7187_v52 }
 0x702   :  { %3452 = vmatpush.msrb.mxu2 %v5762_v12  ;;  %3501 = vmatpush.msrb.mxu3 %v7188_v10  ;;  %v7197_v10 = vld [vmem:[#allocation26_spill] sm:$0xff] }
 0x703   :  { %3427 = vmatpush.msrb.mxu1 %v7177_v1  ;;  %3382 = vmatpush.msrb.mxu0 %v7189_v39  ;;  %v7196_v39 = vld [vmem:[#allocation39_spill] sm:$0xff] }
 0x704   :  { %3454 = vmatpush.msrb.mxu2 %v5777_v21  ;;  %3507 = vmatpush.msrb.mxu3 %v7190_v18  ;;  %v7198_v18 = vld [vmem:[#allocation27_spill] sm:$0xff] }
 0x705   :  { %3429 = vmatpush.msrb.mxu1 %v7180_v59  ;;  %3386 = vmatpush.msrb.mxu0 %v7191_v43  ;;  %v7199_v43 = vld [vmem:[#allocation48_spill] sm:$0xff]  ;;  %v7204_v59 = vld [vmem:[#allocation42_spill] sm:$0xff]  ;;  %v7205_v1 = vld [vmem:[#allocation43_spill] sm:$0xff] }
 0x706   :  { %3456 = vmatpush.msrb.mxu2 %v5792_v26  ;;  %3513 = vmatpush.msrb.mxu3 %v7192_v35  ;;  %v7200_v52 = vperm.slane %v7199_v43, 0 }
 0x707   :  { %3431 = vmatpush.msrb.mxu1 %v7182_v25  ;;  %3390 = vmatpush.msrb.mxu0 %v7193_v15  ;;  %v7203_v15 = vld [vmem:[#allocation52_spill] sm:$0xff] }
 0x708   :  { %3458 = vmatpush.msrb.mxu2 %v5809_v32  ;;  %3519 = vmatpush.msrb.mxu3 %v7194_v38  ;;  %v100_v44 = vadd.f32 %v7201_v36, %v7200_v52  ;;  %v7207_v52 = vld [vmem:[#allocation45_spill] sm:$0xff] }
 0x709   :  { %3394 = vmatpush.msrb.mxu0 %v7195_v58 }
 0x70a   :  { %3460 = vmatpush.msrb.mxu2 %v5823_v47  ;;  %3525 = vmatpush.msrb.mxu3 %v7196_v39  ;;  %v165_v35 = vadd.f32 %v7202_v3, %v100_v44 }
 0x70b   :  { %3398 = vmatpush.msrb.mxu0 %v7197_v10 }
 0x70c   :  { %v208_v38 = vadd.f32 %v7204_v59, %v165_v35 }
 0x70d   :  { %3402 = vmatpush.msrb.mxu0 %v7198_v18 }
 0x70e   :  { %v245_v10 = vadd.f32 %v7205_v1, %v208_v38  ;;  %v7212_v38 = vld [vmem:[#allocation49_spill] sm:$0xff] }
 0x710   :  { %v294_v49 = vadd.f32 %v7206_v54, %v245_v10 }
 0x712   :  { %v6501_v3 = vadd.f32 %v7207_v52, %v294_v49  ;;  %v7211_v49 = vld [vmem:[#allocation47_spill] sm:$0xff] }
 0x714   :  { %7208 = vst [vmem:[#allocation28_spill] sm:$0xff] %v6501_v3 }
 0x750   :  { %v2780_v60 = vpop.f32.mrf.mxu1 }
 0x758   :  { %v2719_v5 = vpop.f32.mrf.mxu0  ;;  %v2818_v58 = vpop.f32.mrf.mxu2 }
 0x759   :  { %v2720_v25 = vadd.f32 %v2719_v5, %v7203_v15  ;;  %v2923_v36 = vpop.f32.mrf.mxu1 }
 0x75a   :  { %v2849_v39 = vpop.f32.mrf.mxu3 }
 0x75b   :  { %v2781_v7 = vadd.f32 %v2780_v60, %v2720_v25  ;;  %v7210_v25 = vld [vmem:[#allocation46_spill] sm:$0xff] }
 0x75d   :  { %v2819_v41 = vadd.f32 %v2818_v58, %v2781_v7 }
 0x75f   :  { %v2850_v16 = vadd.f32 %v2849_v39, %v2819_v41  ;;  %v7209_v41 = vperm.slane %v7199_v43, 1 }
 0x761   :  { %v2956_v59 = vpop.f32.mrf.mxu2  ;;  %v368_v54 = vadd.f32 %v7210_v25, %v7209_v41  ;;  %v7214_v25 = vld [vmem:[#allocation51_spill] sm:$0xff] }
 0x762   :  { %v2894_v18 = vpop.f32.mrf.mxu0  ;;  %v2957_v58 = vadd.f32 %v2956_v59, %v7175_v57 }
 0x763   :  { %v2895_v51 = vadd.f32 %v2894_v18, %v2850_v16  ;;  %v433_v39 = vadd.f32 %v7211_v49, %v368_v54  ;;  %v3086_v35 = vpop.f32.mrf.mxu1 }
 0x764   :  { %v3017_v1 = vpop.f32.mrf.mxu3 }
 0x765   :  { %v2924_v44 = vadd.f32 %v2923_v36, %v2895_v51  ;;  %v3018_v10 = vadd.f32 %v3017_v1, %v2957_v58 }
 0x767   :  { %v3163_v5 = vadd.f32 %v2924_v44, %v6501_v3  ;;  %v7213_v44 = vld [vmem:[#allocation50_spill] sm:$0xff] }
 0x769   :  { %v5082_v15 = vmul.f32 -1.442695, %v3163_v5 }
 0x76a   :  { %v3055_v16 = vpop.f32.mrf.mxu0 }
 0x76b   :  { %5117 = vpow2.f32 %v5082_v15  ;;  %v3056_v51 = vadd.f32 %v3055_v16, %v3018_v10  ;;  %v476_v15 = vadd.f32 %v7212_v38, %v433_v39 }
 0x76d   :  { %v3087_v36 = vadd.f32 %v3086_v35, %v3056_v51  ;;  %v513_v5 = vadd.f32 %v7213_v44, %v476_v15  ;;  %v3160_v54 = vpop.f32.mrf.mxu3  ;;  %v7215_v51 = vld [vmem:[#allocation53_spill] sm:$0xff] }
 0x76f   :  { %v562_v58 = vadd.f32 %v7214_v25, %v513_v5 }
 0x771   :  { %v5118_v60 = vpop.eup %5117  ;;  %v6513_v35 = vadd.f32 %v7215_v51, %v562_v58  ;;  %v7221_v51 = vld [vmem:[#allocation15_spill] sm:$0xff] }
 0x772   :  { %v3167_v7 = vadd.f32 1.0, %v5118_v60  ;;  %v3131_v60 = vpop.f32.mrf.mxu2 }
 0x773   :  { %v3132_v43 = vadd.f32 %v3131_v60, %v3087_v36 }
 0x774   :  { %5119 = vrcp.f32 %v3167_v7  ;;  %v3179_v57 = vand.u32 2147483648, %v3167_v7  ;;  %v3177_v41 = vand.u32 2147483647, %v3167_v7  ;;  %vm3173_vm3 = vweird.f32 %v3167_v7 }
 0x775   :  { %v3161_v10 = vadd.f32 %v3160_v54, %v3132_v43 }
 0x776   :  { %v3180_v16 = vor.u32 1.1754944e-38, %v3179_v57  ;;  %vm3178_vm5 = vcmp.eq.f32.partialorder %v3177_v41, 8.507059e+37 }
 0x77a   :  { %v5120_v18 = vpop.eup %5119 }
 0x77b   :  { %v3169_v52 = vmul.f32 %v5120_v18, %v3167_v7  ;;  %vm3174_vm2 = vweird.f32 %v5120_v18  ;;  %v7216_v7 = vrot.slane %v6386_v63, 6 }
 0x77c   :  { %vm3175_vm4 = vmor %vm3173_vm3, %vm3174_vm2 }
 0x77d   :  { %v3170_v59 = vsub.f32 1.0, %v3169_v52 }
 0x77f   :  { %v3171_v3 = vmul.f32 %v5120_v18, %v3170_v59 }
 0x781   :  { %v3172_v1 = vadd.f32 %v5120_v18, %v3171_v3 }
 0x783   :  { %v3176_v49 = vsel %vm3175_vm4, %v5120_v18, %v3172_v1  ;;  %v4751_v18 = vlaneseq }
 0x784   :  { %v3181_v39 = vsel %vm3178_vm5, %v3180_v16, %v3176_v49  ;;  %v7217_v16 = vld [vmem:[#allocation17_spill] sm:$0xff]  ;;  %v7219_v49 = vld [vmem:[#allocation30_spill] sm:$0xff] }
 0x785   :  { %v3183_v38 = vmul.f32 %v3181_v39, %v3161_v10  ;;  %v3186_v52 = vsub.f32 1.0, %v3181_v39  ;;  %v3193_v44 = vmul.f32 %v3181_v39, %v7216_v7  ;;  %v6523_v59 = vand.u32 127, %v4751_v18  ;;  %v7218_v10 = vld [vmem:[#allocation12_spill] sm:$0xff]  ;;  %v7230_v18 = vld [vmem:[#allocation34_spill] sm:$0xff] }
 0x786   :  { %v7220_v39 = vld [vmem:[#allocation20_spill] sm:$0xff] }
 0x787   :  { %v3184_v15 = vadd.f32 %v3183_v38, %v6513_v35  ;;  %vm4753_vm6 = vcmp.lt.s32.totalorder %v6523_v59, 32  ;;  %v7222_v38 = vld [vmem:[#allocation31_spill] sm:$0xff]  ;;  %v7227_v7 = vld [vmem:[#allocation32_spill] sm:$0xff]  ;;  %v5092_v59 = vld [vmem:[%s6938_s6] ss:$0 sm:$0xff] }
 0x789   :  { %5121 = vtanh.f32 %v3184_v15  ;;  %v7223_v15 = vld [vmem:[#allocation23_spill] sm:$0xff] }
 0x78f   :  { %v5122_v36 = vpop.eup %5121 }
 0x790   :  { %3188 = vrot.lane.b32.xlu2 %v5122_v36, %s5196_s2  ;;  %v7224_v36 = vld [vmem:[#allocation18_spill] sm:$0xff] }
 0x7ea   :  { %v3189_v3 = vpop.permute.xlu2 %3188 }
 0x7eb   :  { %v3191_v57 = vmul.f32 %v3189_v3, %v3186_v52  ;;  %v7225_v52 = vld [vmem:[#allocation25_spill] sm:$0xff] }
 0x7ec   :  { %v7226_v3 = vld [vmem:[#allocation21_spill] sm:$0xff] }
 0x7ed   :  { %v6519_v5 = vadd.f32 %v3193_v44, %v3191_v57  ;;  %v7228_v44 = vld [vmem:[#allocation33_spill] sm:$0xff]  ;;  %v7229_v57 = vld [vmem:[#allocation10_spill] sm:$0xff] }
 0x7ef   :  { %3196 = vrot.lane.b32.xlu0 %v6519_v5, %s5196_s2 }
 0x861   :  { %v3197_v60 = vpop.permute.xlu0 %3196 }
 0x862   :  { %v3198_v43 = vsel %vm54_vm0, %v3197_v60, 0  ;;  %v4775_v63 = vsel %vm4753_vm6, %v6392_v0, %v3197_v60  ;;  %v4778_v41 = vsel %vm4753_vm6, %v3197_v60, %v6392_v0  ;;  %v7231_v60 = vld [vmem:[#allocation13_spill] sm:$0xff] }
 0x863   :  { %v3224_v25 = vand.u32 4294901760, %v3198_v43  ;;  %4777 = vst.msk [vmem:[#allocation2 + $0x6] sm:$0x3] %vm4761_vm7, %v4775_v63  ;;  %v7233_v63 = vld [vmem:[#allocation16_spill] sm:$0xff] }
 0x864   :  { %4780 = vst.msk [vmem:[#allocation2 + $0x8] sm:$0x3] %vm4761_vm7, %v4778_v41  ;;  %v7234_v41 = vld [vmem:[#allocation36_spill] sm:$0xff] }
 0x865   :  { %v3225_v58 = vsub.f32 %v3198_v43, %v3224_v25  ;;  %3290 = vmatmul.f32.vlgmr.msra.gmra.mxu1 %v3224_v25  ;;  %v7232_v43 = vld [vmem:[#allocation35_spill] sm:$0xff] }
 0x866   :  { %3578 = vmatpush.msra.mxu1 %v5719_v56 }
 0x867   :  { %3328 = vmatmul.f32.vlgmr.msra.gmra.mxu2 %v3225_v58  ;;  %v3226_v1 = vand.u32 4294901760, %v3225_v58 }
 0x868   :  { %3580 = vmatpush.msra.mxu1 %v5732_v61  ;;  %3611 = vmatpush.msra.mxu2 %v5767_v4 }
 0x869   :  { %3359 = vmatmul.f32.vlgmr.msra.gmra.mxu3 %v3226_v1  ;;  %v3227_v54 = vsub.f32 %v3225_v58, %v3226_v1 }
 0x86a   :  { %3582 = vmatpush.msra.mxu1 %v5743_v19  ;;  %3615 = vmatpush.msra.mxu2 %v5782_v9 }
 0x86b   :  { %3654 = vmatpush.msra.mxu3 %v5719_v56  ;;  %v3228_v0 = vand.u32 4294901760, %v3227_v54  ;;  %v7238_v54 = vld [vmem:[#allocation38_spill] sm:$0xff] }
 0x86c   :  { %3584 = vmatpush.msra.mxu1 %v5762_v12  ;;  %3619 = vmatpush.msra.mxu2 %v5799_v46 }
 0x86d   :  { %3656 = vmatpush.msra.mxu3 %v5732_v61  ;;  %3229 = vmatmul.f32.vlgmr.msra.gmra.mxu0 %v3228_v0 }
 0x86e   :  { %3433 = vmatmul.f32.vlgmr.msrb.gmra.mxu1 %v3224_v25  ;;  %3541 = vmatpush.msra.mxu0 %v5741_v62 }
 0x86f   :  { %3586 = vmatpush.msra.mxu1 %v5777_v21  ;;  %3623 = vmatpush.msra.mxu2 %v5818_v40 }
 0x870   :  { %3658 = vmatpush.msra.mxu3 %v5743_v19  ;;  %3466 = vmatmul.f32.vlgmr.msrb.gmra.mxu2 %v3228_v0  ;;  %v7239_v0 = vld [vmem:[#allocation24_spill] sm:$0xff] }
 0x871   :  { %3544 = vmatpush.msra.mxu0 %v5755_v31  ;;  %3588 = vmatpush.msra.mxu1 %v5792_v26 }
 0x872   :  { %3627 = vmatpush.msra.mxu2 %v5834_v6  ;;  %3660 = vmatpush.msra.mxu3 %v5762_v12 }
 0x873   :  { %3527 = vmatmul.f32.vlgmr.msrb.gmra.mxu3 %v3224_v25  ;;  %3547 = vmatpush.msra.mxu0 %v5770_v20 }
 0x874   :  { %3590 = vmatpush.msra.mxu1 %v5809_v32  ;;  %3631 = vmatpush.msra.mxu2 %v5848_v27 }
 0x875   :  { %3662 = vmatpush.msra.mxu3 %v5777_v21  ;;  %3550 = vmatpush.msra.mxu0 %v5790_v11 }
 0x876   :  { %3592 = vmatpush.msra.mxu1 %v5823_v47  ;;  %3635 = vmatpush.msra.mxu2 %v5862_v28 }
 0x877   :  { %3664 = vmatpush.msra.mxu3 %v5792_v26  ;;  %3404 = vmatmul.f32.vlgmr.msrb.gmra.mxu0 %v3224_v25 }
 0x878   :  { %3596 = vmatmul.f32.vlgmr.msra.gmra.mxu1 %v3226_v1  ;;  %3553 = vmatpush.msra.mxu0 %v5807_v13  ;;  %v7237_v1 = vld [vmem:[#allocation22_spill] sm:$0xff] }
 0x879   :  { %3639 = vmatpush.msra.mxu2 %v5873_v55  ;;  %3666 = vmatpush.msra.mxu3 %v5809_v32 }
 0x87a   :  { %3641 = vmatmul.f32.vlgmr.msra.gmra.mxu2 %v3224_v25  ;;  %3556 = vmatpush.msra.mxu0 %v5821_v23 }
 0x87b   :  { %3668 = vmatpush.msra.mxu3 %v5823_v47  ;;  %3765 = vmatpush.msrb.mxu1 %v5655_v37 }
 0x87c   :  { %3670 = vmatmul.f32.vlgmr.msra.gmra.mxu3 %v3224_v25  ;;  %3559 = vmatpush.msra.mxu0 %v5837_v24  ;;  %v7235_v25 = vld [vmem:[#allocation19_spill] sm:$0xff] }
 0x87d   :  { %3771 = vmatpush.msrb.mxu1 %v5669_v14  ;;  %3823 = vmatpush.msrb.mxu2 %v5569_v30 }
 0x87e   :  { %3562 = vmatpush.msra.mxu0 %v5851_v8  ;;  %3860 = vmatpush.msrb.mxu3 %v5548_v17 }
 0x87f   :  { %3565 = vmatmul.f32.vlgmr.msra.gmra.mxu0 %v3225_v58  ;;  %3777 = vmatpush.msrb.mxu1 %v5683_v45  ;;  %v7236_v58 = vld [vmem:[#allocation37_spill] sm:$0xff] }
 0x880   :  { %3826 = vmatpush.msrb.mxu2 %v5582_v50  ;;  %3862 = vmatpush.msrb.mxu3 %v5558_v22 }
 0x881   :  { %3783 = vmatpush.msrb.mxu1 %v5694_v48  ;;  %3728 = vmatpush.msrb.mxu0 %v5548_v17 }
 0x882   :  { %3829 = vmatpush.msrb.mxu2 %v7092_v2  ;;  %3864 = vmatpush.msrb.mxu3 %v7093_v42 }
 0x883   :  { %3789 = vmatpush.msrb.mxu1 %v7094_v33  ;;  %3730 = vmatpush.msrb.mxu0 %v5558_v22 }
 0x884   :  { %3832 = vmatpush.msrb.mxu2 %v7095_v34  ;;  %3866 = vmatpush.msrb.mxu3 %v7096_v53 }
 0x885   :  { %3795 = vmatpush.msrb.mxu1 %v7097_v29  ;;  %3732 = vmatpush.msrb.mxu0 %v7093_v42 }
 0x886   :  { %3835 = vmatpush.msrb.mxu2 %v7217_v16  ;;  %3868 = vmatpush.msrb.mxu3 %v7218_v10 }
 0x887   :  { %3801 = vmatpush.msrb.mxu1 %v7219_v49  ;;  %3734 = vmatpush.msrb.mxu0 %v7096_v53 }
 0x888   :  { %3838 = vmatpush.msrb.mxu2 %v7220_v39  ;;  %3870 = vmatpush.msrb.mxu3 %v7221_v51 }
 0x889   :  { %3807 = vmatpush.msrb.mxu1 %v7222_v38  ;;  %3736 = vmatpush.msrb.mxu0 %v7218_v10  ;;  %v7244_v38 = vld [vmem:[#allocation28_spill] sm:$0xff] }
 0x88a   :  { %3841 = vmatpush.msrb.mxu2 %v7223_v15  ;;  %3872 = vmatpush.msrb.mxu3 %v7224_v36 }
 0x88b   :  { %3936 = vmatpush.msra.mxu1 %v5548_v17  ;;  %3738 = vmatpush.msrb.mxu0 %v7221_v51 }
 0x88c   :  { %3844 = vmatpush.msrb.mxu2 %v7225_v52  ;;  %3874 = vmatpush.msrb.mxu3 %v7226_v3 }
 0x88d   :  { %3938 = vmatpush.msra.mxu1 %v5558_v22  ;;  %3740 = vmatpush.msrb.mxu0 %v7224_v36 }
 0x88e   :  { %3965 = vmatpush.msra.mxu2 %v5719_v56  ;;  %4002 = vmatpush.msra.mxu3 %v7227_v7 }
 0x88f   :  { %3940 = vmatpush.msra.mxu1 %v7093_v42  ;;  %3742 = vmatpush.msrb.mxu0 %v7226_v3 }
 0x890   :  { %3967 = vmatpush.msra.mxu2 %v5732_v61  ;;  %4008 = vmatpush.msra.mxu3 %v7228_v44 }
 0x891   :  { %3942 = vmatpush.msra.mxu1 %v7096_v53  ;;  %3893 = vmatpush.msra.mxu0 %v7229_v57 }
 0x892   :  { %3969 = vmatpush.msra.mxu2 %v5743_v19  ;;  %4014 = vmatpush.msra.mxu3 %v7230_v18 }
 0x893   :  { %3944 = vmatpush.msra.mxu1 %v7218_v10  ;;  %3897 = vmatpush.msra.mxu0 %v7231_v60  ;;  %v7243_v60 = vld [vmem:[#allocation52_spill] sm:$0xff] }
 0x894   :  { %3971 = vmatpush.msra.mxu2 %v5762_v12  ;;  %4020 = vmatpush.msra.mxu3 %v7232_v43  ;;  %v7241_v43 = vld [vmem:[#allocation26_spill] sm:$0xff] }
 0x895   :  { %3946 = vmatpush.msra.mxu1 %v7221_v51  ;;  %3901 = vmatpush.msra.mxu0 %v7233_v63  ;;  %v7240_v63 = vld [vmem:[#allocation39_spill] sm:$0xff] }
 0x896   :  { %3973 = vmatpush.msra.mxu2 %v5777_v21  ;;  %4026 = vmatpush.msra.mxu3 %v7234_v41  ;;  %v7242_v41 = vld [vmem:[#allocation27_spill] sm:$0xff] }
 0x897   :  { %3948 = vmatpush.msra.mxu1 %v7224_v36  ;;  %3905 = vmatpush.msra.mxu0 %v7235_v25 }
 0x898   :  { %3975 = vmatpush.msra.mxu2 %v5792_v26  ;;  %4032 = vmatpush.msra.mxu3 %v7236_v58 }
 0x899   :  { %3950 = vmatpush.msra.mxu1 %v7226_v3  ;;  %3909 = vmatpush.msra.mxu0 %v7237_v1 }
 0x89a   :  { %3977 = vmatpush.msra.mxu2 %v5809_v32  ;;  %4038 = vmatpush.msra.mxu3 %v7238_v54 }
 0x89b   :  { %3913 = vmatpush.msra.mxu0 %v7239_v0 }
 0x89c   :  { %3979 = vmatpush.msra.mxu2 %v5823_v47  ;;  %4044 = vmatpush.msra.mxu3 %v7240_v63 }
 0x89d   :  { %3917 = vmatpush.msra.mxu0 %v7241_v43 }
 0x89f   :  { %3921 = vmatpush.msra.mxu0 %v7242_v41  ;;  %v7245_v41 = vld [vmem:[#allocation54_spill] sm:$0xff] }
 0x8e2   :  { %v3291_v57 = vpop.f32.mrf.mxu1 }
 0x8ea   :  { %v3230_v25 = vpop.f32.mrf.mxu0  ;;  %v3329_v58 = vpop.f32.mrf.mxu2 }
 0x8eb   :  { %v3231_v18 = vadd.f32 %v3230_v25, %v7243_v60  ;;  %v3434_v54 = vpop.f32.mrf.mxu1 }
 0x8ec   :  { %v3360_v1 = vpop.f32.mrf.mxu3 }
 0x8ed   :  { %v3292_v44 = vadd.f32 %v3291_v57, %v3231_v18 }
 0x8ef   :  { %v3330_v7 = vadd.f32 %v3329_v58, %v3292_v44 }
 0x8f1   :  { %v3361_v3 = vadd.f32 %v3360_v1, %v3330_v7 }
 0x8f3   :  { %v3467_v43 = vpop.f32.mrf.mxu2 }
 0x8f4   :  { %v3405_v52 = vpop.f32.mrf.mxu0  ;;  %v3468_v39 = vadd.f32 %v3467_v43, %v7245_v41 }
 0x8f5   :  { %v3406_v36 = vadd.f32 %v3405_v52, %v3361_v3  ;;  %v3597_v7 = vpop.f32.mrf.mxu1 }
 0x8f6   :  { %v3528_v49 = vpop.f32.mrf.mxu3 }
 0x8f7   :  { %v3435_v15 = vadd.f32 %v3434_v54, %v3406_v36  ;;  %v3529_v57 = vadd.f32 %v3528_v49, %v3468_v39  ;;  %v3709_v39 = vrot.slane %v6519_v5, 6 }
 0x8f9   :  { %v3675_v0 = vrot.slane %v3435_v15, 6 }
 0x8fb   :  { %v3677_v63 = vadd.f32 %v3675_v0, %v7244_v38 }
 0x8fc   :  { %v3566_v25 = vpop.f32.mrf.mxu0 }
 0x8fd   :  { %v5083_v51 = vmul.f32 -1.442695, %v3677_v63  ;;  %v3567_v44 = vadd.f32 %v3566_v25, %v3529_v57  ;;  %v3642_v3 = vpop.f32.mrf.mxu2 }
 0x8ff   :  { %5123 = vpow2.f32 %v5083_v51  ;;  %v3598_v58 = vadd.f32 %v3597_v7, %v3567_v44  ;;  %v3671_v54 = vpop.f32.mrf.mxu3 }
 0x901   :  { %v3643_v36 = vadd.f32 %v3642_v3, %v3598_v58 }
 0x903   :  { %v3672_v0 = vadd.f32 %v3671_v54, %v3643_v36 }
 0x905   :  { %v5124_v60 = vpop.eup %5123  ;;  %v3698_v25 = vrot.slane %v3672_v0, 6 }
 0x906   :  { %v3681_v18 = vadd.f32 1.0, %v5124_v60 }
 0x908   :  { %5125 = vrcp.f32 %v3681_v18  ;;  %v3693_v63 = vand.u32 2147483648, %v3681_v18  ;;  %v3691_v43 = vand.u32 2147483647, %v3681_v18  ;;  %vm3687_vm9 = vweird.f32 %v3681_v18 }
 0x90a   :  { %v3694_v49 = vor.u32 1.1754944e-38, %v3693_v63  ;;  %vm3692_vm11 = vcmp.eq.f32.partialorder %v3691_v43, 8.507059e+37 }
 0x90e   :  { %v5126_v52 = vpop.eup %5125 }
 0x90f   :  { %v3683_v15 = vmul.f32 %v5126_v52, %v3681_v18  ;;  %vm3688_vm8 = vweird.f32 %v5126_v52 }
 0x910   :  { %vm3689_vm10 = vmor %vm3687_vm9, %vm3688_vm8 }
 0x911   :  { %v3684_v1 = vsub.f32 1.0, %v3683_v15 }
 0x913   :  { %v3685_v51 = vmul.f32 %v5126_v52, %v3684_v1 }
 0x915   :  { %v3686_v41 = vadd.f32 %v5126_v52, %v3685_v51 }
 0x917   :  { %v3690_v60 = vsel %vm3689_vm10, %v5126_v52, %v3686_v41  ;;  %v7246_v52 = vld [vmem:[#allocation8_spill] sm:$0xff] }
 0x918   :  { %v3695_v57 = vsel %vm3692_vm11, %v3694_v49, %v3690_v60 }
 0x919   :  { %v3700_v44 = vmul.f32 %v3698_v25, %v3695_v57  ;;  %v3711_v7 = vmul.f32 %v3709_v39, %v3695_v57  ;;  %v3703_v36 = vsub.f32 1.0, %v3695_v57  ;;  %v7262_v25 = vld [vmem:[#allocation36_spill] sm:$0xff]  ;;  %v7264_v57 = vld [vmem:[#allocation37_spill] sm:$0xff] }
 0x91b   :  { %v3701_v58 = vadd.f32 %v3700_v44, %v6513_v35  ;;  %v7265_v44 = vld [vmem:[#allocation22_spill] sm:$0xff] }
 0x91d   :  { %5127 = vtanh.f32 %v3701_v58  ;;  %v7267_v58 = vld [vmem:[#allocation24_spill] sm:$0xff] }
 0x923   :  { %v5128_v3 = vpop.eup %5127 }
 0x924   :  { %3705 = vrot.lane.b32.xlu1 %v5128_v3, %s5196_s2  ;;  %v7268_v3 = vld [vmem:[#allocation39_spill] sm:$0xff] }
 0x996   :  { %v3706_v15 = vpop.permute.xlu1 %3705 }
 0x997   :  { %v3708_v1 = vmul.f32 %v3706_v15, %v3703_v36  ;;  %v7269_v36 = vld [vmem:[#allocation26_spill] sm:$0xff]  ;;  %v7270_v15 = vld [vmem:[#allocation27_spill] sm:$0xff] }
 0x999   :  { %v6637_v18 = vadd.f32 %v3711_v7, %v3708_v1  ;;  %v7266_v7 = vld [vmem:[#allocation38_spill] sm:$0xff] }
 0x99b   :  { %v3714_v54 = vrot.slane %v6637_v18, 2 }
 0x99d   :  { %3715 = vrot.lane.b32.xlu2 %v3714_v54, %s5196_s2  ;;  %v7271_v54 = vld [vmem:[#allocation52_spill] sm:$0xff] }
 0x9f7   :  { %v3716_v5 = vpop.permute.xlu2 %3715 }
 0x9f8   :  { %v3717_v41 = vsel %vm54_vm0, %v3716_v5, 0  ;;  %v4770_v63 = vsel %vm4753_vm6, %v7246_v52, %v3716_v5  ;;  %v4781_v0 = vsel %vm4753_vm6, %v3716_v5, %v7246_v52 }
 0x9f9   :  { %v3743_v51 = vand.u32 4294901760, %v3717_v41  ;;  %4772 = vst.msk [vmem:[#allocation2 + $0x4] sm:$0x3] %vm4761_vm7, %v4770_v63 }
 0x9fa   :  { %4783 = vst.msk [vmem:[#allocation2 + $0xa] sm:$0x3] %vm4761_vm7, %v4781_v0 }
 0x9fb   :  { %v3744_v43 = vsub.f32 %v3717_v41, %v3743_v51  ;;  %3809 = vmatmul.f32.vlgmr.msrb.gmra.mxu1 %v3743_v51 }
 0x9fc   :  { %4097 = vmatpush.msrb.mxu1 %v5719_v56 }
 0x9fd   :  { %3847 = vmatmul.f32.vlgmr.msrb.gmra.mxu2 %v3744_v43  ;;  %v3745_v49 = vand.u32 4294901760, %v3744_v43 }
 0x9fe   :  { %4099 = vmatpush.msrb.mxu1 %v5732_v61  ;;  %4130 = vmatpush.msrb.mxu2 %v5767_v4 }
 0x9ff   :  { %3878 = vmatmul.f32.vlgmr.msrb.gmra.mxu3 %v3745_v49  ;;  %v3746_v39 = vsub.f32 %v3744_v43, %v3745_v49 }
 0xa00   :  { %4101 = vmatpush.msrb.mxu1 %v5743_v19  ;;  %4134 = vmatpush.msrb.mxu2 %v5782_v9 }
 0xa01   :  { %4173 = vmatpush.msrb.mxu3 %v5719_v56  ;;  %v3747_v60 = vand.u32 4294901760, %v3746_v39 }
 0xa02   :  { %4103 = vmatpush.msrb.mxu1 %v5762_v12  ;;  %4138 = vmatpush.msrb.mxu2 %v5799_v46 }
 0xa03   :  { %4175 = vmatpush.msrb.mxu3 %v5732_v61  ;;  %3748 = vmatmul.f32.vlgmr.msrb.gmra.mxu0 %v3747_v60 }
 0xa04   :  { %3952 = vmatmul.f32.vlgmr.msra.gmra.mxu1 %v3743_v51  ;;  %4060 = vmatpush.msrb.mxu0 %v5741_v62 }
 0xa05   :  { %4105 = vmatpush.msrb.mxu1 %v5777_v21  ;;  %4142 = vmatpush.msrb.mxu2 %v5818_v40 }
 0xa06   :  { %4177 = vmatpush.msrb.mxu3 %v5743_v19  ;;  %3985 = vmatmul.f32.vlgmr.msra.gmra.mxu2 %v3747_v60 }
 0xa07   :  { %4063 = vmatpush.msrb.mxu0 %v5755_v31  ;;  %4107 = vmatpush.msrb.mxu1 %v5792_v26 }
 0xa08   :  { %4146 = vmatpush.msrb.mxu2 %v5834_v6  ;;  %4179 = vmatpush.msrb.mxu3 %v5762_v12 }
 0xa09   :  { %4046 = vmatmul.f32.vlgmr.msra.gmra.mxu3 %v3743_v51  ;;  %4066 = vmatpush.msrb.mxu0 %v5770_v20 }
 0xa0a   :  { %4109 = vmatpush.msrb.mxu1 %v5809_v32  ;;  %4150 = vmatpush.msrb.mxu2 %v5848_v27 }
 0xa0b   :  { %4181 = vmatpush.msrb.mxu3 %v5777_v21  ;;  %4069 = vmatpush.msrb.mxu0 %v5790_v11 }
 0xa0c   :  { %4111 = vmatpush.msrb.mxu1 %v5823_v47  ;;  %4154 = vmatpush.msrb.mxu2 %v5862_v28 }
 0xa0d   :  { %4183 = vmatpush.msrb.mxu3 %v5792_v26  ;;  %3923 = vmatmul.f32.vlgmr.msra.gmra.mxu0 %v3743_v51 }
 0xa0e   :  { %4115 = vmatmul.f32.vlgmr.msrb.gmra.mxu1 %v3745_v49  ;;  %4072 = vmatpush.msrb.mxu0 %v5807_v13 }
 0xa0f   :  { %4158 = vmatpush.msrb.mxu2 %v5873_v55  ;;  %4185 = vmatpush.msrb.mxu3 %v5809_v32 }
 0xa10   :  { %4160 = vmatmul.f32.vlgmr.msrb.gmra.mxu2 %v3743_v51  ;;  %4075 = vmatpush.msrb.mxu0 %v5821_v23 }
 0xa11   :  { %4187 = vmatpush.msrb.mxu3 %v5823_v47  ;;  %4284 = vmatpush.msra.mxu1 %v5655_v37  ;;  %v7249_v37 = vld [vmem:[#allocation15_spill] sm:$0xff] }
 0xa12   :  { %4189 = vmatmul.f32.vlgmr.msrb.gmra.mxu3 %v3743_v51  ;;  %4078 = vmatpush.msrb.mxu0 %v5837_v24 }
 0xa13   :  { %4290 = vmatpush.msra.mxu1 %v5669_v14  ;;  %4342 = vmatpush.msra.mxu2 %v5569_v30  ;;  %v7247_v30 = vld [vmem:[#allocation30_spill] sm:$0xff]  ;;  %v7250_v14 = vld [vmem:[#allocation31_spill] sm:$0xff] }
 0xa14   :  { %4081 = vmatpush.msrb.mxu0 %v5851_v8  ;;  %4379 = vmatpush.msra.mxu3 %v5548_v17 }
 0xa15   :  { %4084 = vmatmul.f32.vlgmr.msrb.gmra.mxu0 %v3744_v43  ;;  %4296 = vmatpush.msra.mxu1 %v5683_v45  ;;  %v7251_v45 = vld [vmem:[#allocation23_spill] sm:$0xff] }
 0xa16   :  { %4345 = vmatpush.msra.mxu2 %v5582_v50  ;;  %4381 = vmatpush.msra.mxu3 %v5558_v22  ;;  %v7248_v50 = vld [vmem:[#allocation20_spill] sm:$0xff] }
 0xa17   :  { %4302 = vmatpush.msra.mxu1 %v5694_v48  ;;  %4247 = vmatpush.msra.mxu0 %v5548_v17  ;;  %v7252_v48 = vld [vmem:[#allocation18_spill] sm:$0xff] }
 0xa18   :  { %4348 = vmatpush.msra.mxu2 %v7092_v2  ;;  %4383 = vmatpush.msra.mxu3 %v7093_v42  ;;  %v7253_v2 = vld [vmem:[#allocation25_spill] sm:$0xff] }
 0xa19   :  { %4308 = vmatpush.msra.mxu1 %v7094_v33  ;;  %4249 = vmatpush.msra.mxu0 %v5558_v22  ;;  %v7254_v33 = vld [vmem:[#allocation21_spill] sm:$0xff] }
 0xa1a   :  { %4351 = vmatpush.msra.mxu2 %v7095_v34  ;;  %4385 = vmatpush.msra.mxu3 %v7096_v53  ;;  %v7255_v34 = vld [vmem:[#allocation32_spill] sm:$0xff] }
 0xa1b   :  { %4314 = vmatpush.msra.mxu1 %v7097_v29  ;;  %4251 = vmatpush.msra.mxu0 %v7093_v42  ;;  %v7259_v29 = vld [vmem:[#allocation13_spill] sm:$0xff] }
 0xa1c   :  { %4354 = vmatpush.msra.mxu2 %v7217_v16  ;;  %4387 = vmatpush.msra.mxu3 %v7218_v10  ;;  %v7261_v16 = vld [vmem:[#allocation16_spill] sm:$0xff] }
 0xa1d   :  { %4320 = vmatpush.msra.mxu1 %v7247_v30  ;;  %4253 = vmatpush.msra.mxu0 %v7096_v53 }
 0xa1e   :  { %4357 = vmatpush.msra.mxu2 %v7248_v50  ;;  %4389 = vmatpush.msra.mxu3 %v7249_v37 }
 0xa1f   :  { %4326 = vmatpush.msra.mxu1 %v7250_v14  ;;  %4255 = vmatpush.msra.mxu0 %v7218_v10 }
 0xa20   :  { %4360 = vmatpush.msra.mxu2 %v7251_v45  ;;  %4391 = vmatpush.msra.mxu3 %v7252_v48 }
 0xa21   :  { %4455 = vmatpush.msrb.mxu1 %v5548_v17  ;;  %4257 = vmatpush.msra.mxu0 %v7249_v37  ;;  %v7256_v17 = vld [vmem:[#allocation33_spill] sm:$0xff] }
 0xa22   :  { %4363 = vmatpush.msra.mxu2 %v7253_v2  ;;  %4393 = vmatpush.msra.mxu3 %v7254_v33 }
 0xa23   :  { %4457 = vmatpush.msrb.mxu1 %v5558_v22  ;;  %4259 = vmatpush.msra.mxu0 %v7252_v48  ;;  %v7257_v22 = vld [vmem:[#allocation10_spill] sm:$0xff] }
 0xa24   :  { %4484 = vmatpush.msrb.mxu2 %v5719_v56  ;;  %4521 = vmatpush.msrb.mxu3 %v7255_v34 }
 0xa25   :  { %4459 = vmatpush.msrb.mxu1 %v7093_v42  ;;  %4261 = vmatpush.msra.mxu0 %v7254_v33  ;;  %v7258_v42 = vld [vmem:[#allocation34_spill] sm:$0xff] }
 0xa26   :  { %4486 = vmatpush.msrb.mxu2 %v5732_v61  ;;  %4527 = vmatpush.msrb.mxu3 %v7256_v17 }
 0xa27   :  { %4461 = vmatpush.msrb.mxu1 %v7096_v53  ;;  %4412 = vmatpush.msrb.mxu0 %v7257_v22  ;;  %v7260_v53 = vld [vmem:[#allocation35_spill] sm:$0xff] }
 0xa28   :  { %4488 = vmatpush.msrb.mxu2 %v5743_v19  ;;  %4533 = vmatpush.msrb.mxu3 %v7258_v42 }
 0xa29   :  { %4463 = vmatpush.msrb.mxu1 %v7218_v10  ;;  %4416 = vmatpush.msrb.mxu0 %v7259_v29  ;;  %v7263_v10 = vld [vmem:[#allocation19_spill] sm:$0xff] }
 0xa2a   :  { %4490 = vmatpush.msrb.mxu2 %v5762_v12  ;;  %4539 = vmatpush.msrb.mxu3 %v7260_v53 }
 0xa2b   :  { %4465 = vmatpush.msrb.mxu1 %v7249_v37  ;;  %4420 = vmatpush.msrb.mxu0 %v7261_v16 }
 0xa2c   :  { %4492 = vmatpush.msrb.mxu2 %v5777_v21  ;;  %4545 = vmatpush.msrb.mxu3 %v7262_v25 }
 0xa2d   :  { %4467 = vmatpush.msrb.mxu1 %v7252_v48  ;;  %4424 = vmatpush.msrb.mxu0 %v7263_v10  ;;  %v7272_v48 = vld [vmem:[#allocation54_spill] sm:$0xff] }
 0xa2e   :  { %4494 = vmatpush.msrb.mxu2 %v5792_v26  ;;  %4551 = vmatpush.msrb.mxu3 %v7264_v57 }
 0xa2f   :  { %4469 = vmatpush.msrb.mxu1 %v7254_v33  ;;  %4428 = vmatpush.msrb.mxu0 %v7265_v44 }
 0xa30   :  { %4496 = vmatpush.msrb.mxu2 %v5809_v32  ;;  %4557 = vmatpush.msrb.mxu3 %v7266_v7 }
 0xa31   :  { %4432 = vmatpush.msrb.mxu0 %v7267_v58 }
 0xa32   :  { %4498 = vmatpush.msrb.mxu2 %v5823_v47  ;;  %4563 = vmatpush.msrb.mxu3 %v7268_v3 }
 0xa33   :  { %4436 = vmatpush.msrb.mxu0 %v7269_v36 }
 0xa35   :  { %4440 = vmatpush.msrb.mxu0 %v7270_v15 }
 0xa78   :  { %v3810_v41 = vpop.f32.mrf.mxu1 }
 0xa80   :  { %v3749_v1 = vpop.f32.mrf.mxu0  ;;  %v3848_v63 = vpop.f32.mrf.mxu2 }
 0xa81   :  { %v3750_v5 = vadd.f32 %v3749_v1, %v7271_v54  ;;  %v3953_v60 = vpop.f32.mrf.mxu1 }
 0xa82   :  { %v3879_v51 = vpop.f32.mrf.mxu3 }
 0xa83   :  { %v3811_v52 = vadd.f32 %v3810_v41, %v3750_v5 }
 0xa85   :  { %v3849_v0 = vadd.f32 %v3848_v63, %v3811_v52  ;;  %v4228_v52 = vrot.slane %v6637_v18, 6 }
 0xa87   :  { %v3880_v43 = vadd.f32 %v3879_v51, %v3849_v0 }
 0xa89   :  { %v3986_v45 = vpop.f32.mrf.mxu2 }
 0xa8a   :  { %v3924_v49 = vpop.f32.mrf.mxu0  ;;  %v3987_v2 = vadd.f32 %v3986_v45, %v7272_v48 }
 0xa8b   :  { %v3925_v39 = vadd.f32 %v3924_v49, %v3880_v43  ;;  %v4116_v53 = vpop.f32.mrf.mxu1 }
 0xa8c   :  { %v4047_v33 = vpop.f32.mrf.mxu3 }
 0xa8d   :  { %v3954_v30 = vadd.f32 %v3953_v60, %v3925_v39  ;;  %v4048_v22 = vadd.f32 %v4047_v33, %v3987_v2  ;;  %v7273_v33 = vld [vmem:[#allocation11_spill] sm:$0xff] }
 0xa8f   :  { %v4194_v50 = vrot.slane %v3954_v30, 4 }
 0xa91   :  { %v4196_v37 = vadd.f32 %v4194_v50, %v7244_v38 }
 0xa92   :  { %v4085_v34 = vpop.f32.mrf.mxu0 }
 0xa93   :  { %v5084_v14 = vmul.f32 -1.442695, %v4196_v37  ;;  %v4086_v29 = vadd.f32 %v4085_v34, %v4048_v22  ;;  %v4161_v10 = vpop.f32.mrf.mxu2 }
 0xa95   :  { %5129 = vpow2.f32 %v5084_v14  ;;  %v4117_v16 = vadd.f32 %v4116_v53, %v4086_v29  ;;  %v4190_v58 = vpop.f32.mrf.mxu3 }
 0xa97   :  { %v4162_v57 = vadd.f32 %v4161_v10, %v4117_v16 }
 0xa99   :  { %v4191_v36 = vadd.f32 %v4190_v58, %v4162_v57 }
 0xa9b   :  { %v5130_v17 = vpop.eup %5129  ;;  %v4217_v0 = vrot.slane %v4191_v36, 4 }
 0xa9c   :  { %v4200_v42 = vadd.f32 1.0, %v5130_v17 }
 0xa9e   :  { %5131 = vrcp.f32 %v4200_v42  ;;  %v4212_v3 = vand.u32 2147483648, %v4200_v42  ;;  %v4210_v1 = vand.u32 2147483647, %v4200_v42  ;;  %vm4206_vm13 = vweird.f32 %v4200_v42 }
 0xaa0   :  { %v4213_v41 = vor.u32 1.1754944e-38, %v4212_v3  ;;  %vm4211_vm15 = vcmp.eq.f32.partialorder %v4210_v1, 8.507059e+37 }
 0xaa4   :  { %v5132_v25 = vpop.eup %5131 }
 0xaa5   :  { %v4202_v44 = vmul.f32 %v5132_v25, %v4200_v42  ;;  %vm4207_vm12 = vweird.f32 %v5132_v25 }
 0xaa6   :  { %vm4208_vm14 = vmor %vm4206_vm13, %vm4207_vm12 }
 0xaa7   :  { %v4203_v7 = vsub.f32 1.0, %v4202_v44 }
 0xaa9   :  { %v4204_v15 = vmul.f32 %v5132_v25, %v4203_v7 }
 0xaab   :  { %v4205_v5 = vadd.f32 %v5132_v25, %v4204_v15 }
 0xaad   :  { %v4209_v63 = vsel %vm4208_vm14, %v5132_v25, %v4205_v5 }
 0xaae   :  { %v4214_v51 = vsel %vm4211_vm15, %v4213_v41, %v4209_v63 }
 0xaaf   :  { %v4219_v43 = vmul.f32 %v4217_v0, %v4214_v51  ;;  %v4230_v49 = vmul.f32 %v4228_v52, %v4214_v51  ;;  %v4222_v30 = vsub.f32 1.0, %v4214_v51 }
 0xab1   :  { %v4220_v39 = vadd.f32 %v4219_v43, %v6513_v35 }
 0xab3   :  { %5133 = vtanh.f32 %v4220_v39  ;;  %v4797_v39 = vld [vmem:[%s6937_s5 + $0x38] sm:$0xff] }
 0xab9   :  { %v5134_v60 = vpop.eup %5133 }
 0xaba   :  { %4224 = vrot.lane.b32.xlu0 %v5134_v60, %s5196_s2  ;;  %v4796_v60 = vld [vmem:[%s6937_s5 + $0x30] sm:$0xff] }
 0xb2c   :  { %v4225_v50 = vpop.permute.xlu0 %4224 }
 0xb2d   :  { %v4227_v37 = vmul.f32 %v4225_v50, %v4222_v30  ;;  %v4795_v30 = vld [vmem:[%s6937_s5 + $0x28] sm:$0xff]  ;;  %v6818_v50 = vand.u32 4294901760, %v4797_v39 }
 0xb2f   :  { %v6752_v14 = vadd.f32 %v4230_v49, %v4227_v37  ;;  %v6820_v37 = vand.u32 4294901760, %v4796_v60 }
 0xb31   :  { %v4233_v45 = vrot.slane %v6752_v14, 4  ;;  %v4747_v5 = vrot.slane %v6752_v14, 6  ;;  %v4794_v14 = vld [vmem:[%s6937_s5 + $0x20] sm:$0xff] }
 0xb33   :  { %4234 = vrot.lane.b32.xlu1 %v4233_v45, %s5196_s2  ;;  %v4793_v45 = vld [vmem:[%s6937_s5 + $0x18] sm:$0xff] }
 0xba5   :  { %v4235_v18 = vpop.permute.xlu1 %4234 }
 0xba6   :  { %v4236_v2 = vsel %vm54_vm0, %v4235_v18, 0  ;;  %v4765_v34 = vsel %vm4753_vm6, %v7273_v33, %v4235_v18  ;;  %v4784_v17 = vsel %vm4753_vm6, %v4235_v18, %v7273_v33  ;;  %v4792_v18 = vld [vmem:[%s6937_s5 + $0x10] sm:$0xff]  ;;  %v6835_v33 = vand.u32 4294901760, %v4793_v45 }
 0xba7   :  { %v4262_v22 = vand.u32 4294901760, %v4236_v2  ;;  %4767 = vst.msk [vmem:[#allocation2 + $0x2] sm:$0x3] %vm4761_vm7, %v4765_v34  ;;  %v6837_v34 = vand.u32 4294901760, %v4792_v18 }
 0xba8   :  { %4786 = vst.msk [vmem:[#allocation2 + $0xc] sm:$0x3] %vm4761_vm7, %v4784_v17  ;;  %v4791_v17 = vld [vmem:[%s6937_s5 + $0x8] sm:$0xff] }
 0xba9   :  { %v4263_v42 = vsub.f32 %v4236_v2, %v4262_v22  ;;  %4328 = vmatmul.f32.vlgmr.msra.gmra.mxu1 %v4262_v22  ;;  %v6833_v2 = vand.u32 4294901760, %v4794_v14 }
 0xbaa   :  { %4616 = vmatpush.msra.mxu1 %v5719_v56 }
 0xbab   :  { %v4264_v29 = vand.u32 4294901760, %v4263_v42  ;;  %4366 = vmatmul.f32.vlgmr.msra.gmra.mxu2 %v4263_v42 }
 0xbac   :  { %4618 = vmatpush.msra.mxu1 %v5732_v61  ;;  %4649 = vmatpush.msra.mxu2 %v5767_v4 }
 0xbad   :  { %v4265_v53 = vsub.f32 %v4263_v42, %v4264_v29  ;;  %4397 = vmatmul.f32.vlgmr.msra.gmra.mxu3 %v4264_v29 }
 0xbae   :  { %4620 = vmatpush.msra.mxu1 %v5743_v19  ;;  %4653 = vmatpush.msra.mxu2 %v5782_v9 }
 0xbaf   :  { %v4266_v16 = vand.u32 4294901760, %v4265_v53  ;;  %4692 = vmatpush.msra.mxu3 %v5719_v56 }
 0xbb0   :  { %4622 = vmatpush.msra.mxu1 %v5762_v12  ;;  %4657 = vmatpush.msra.mxu2 %v5799_v46 }
 0xbb1   :  { %4694 = vmatpush.msra.mxu3 %v5732_v61  ;;  %4267 = vmatmul.f32.vlgmr.msra.gmra.mxu0 %v4266_v16 }
 0xbb2   :  { %4471 = vmatmul.f32.vlgmr.msrb.gmra.mxu1 %v4262_v22  ;;  %4579 = vmatpush.msra.mxu0 %v5741_v62 }
 0xbb3   :  { %4624 = vmatpush.msra.mxu1 %v5777_v21  ;;  %4661 = vmatpush.msra.mxu2 %v5818_v40 }
 0xbb4   :  { %4696 = vmatpush.msra.mxu3 %v5743_v19  ;;  %4504 = vmatmul.f32.vlgmr.msrb.gmra.mxu2 %v4266_v16  ;;  %v6854_v16 = vand.u32 4294901760, %v4791_v17 }
 0xbb5   :  { %4582 = vmatpush.msra.mxu0 %v5755_v31  ;;  %4626 = vmatpush.msra.mxu1 %v5792_v26 }
 0xbb6   :  { %4665 = vmatpush.msra.mxu2 %v5834_v6  ;;  %4698 = vmatpush.msra.mxu3 %v5762_v12 }
 0xbb7   :  { %4565 = vmatmul.f32.vlgmr.msrb.gmra.mxu3 %v4262_v22  ;;  %4585 = vmatpush.msra.mxu0 %v5770_v20 }
 0xbb8   :  { %4628 = vmatpush.msra.mxu1 %v5809_v32  ;;  %4669 = vmatpush.msra.mxu2 %v5848_v27 }
 0xbb9   :  { %4700 = vmatpush.msra.mxu3 %v5777_v21  ;;  %4588 = vmatpush.msra.mxu0 %v5790_v11 }
 0xbba   :  { %4630 = vmatpush.msra.mxu1 %v5823_v47  ;;  %4673 = vmatpush.msra.mxu2 %v5862_v28 }
 0xbbb   :  { %4702 = vmatpush.msra.mxu3 %v5792_v26  ;;  %4442 = vmatmul.f32.vlgmr.msrb.gmra.mxu0 %v4262_v22 }
 0xbbc   :  { %4634 = vmatmul.f32.vlgmr.msra.gmra.mxu1 %v4264_v29  ;;  %4591 = vmatpush.msra.mxu0 %v5807_v13  ;;  %v6847_v29 = vsub.f32 %v4796_v60, %v6820_v37 }
 0xbbd   :  { %4677 = vmatpush.msra.mxu2 %v5873_v55  ;;  %4704 = vmatpush.msra.mxu3 %v5809_v32 }
 0xbbe   :  { %4679 = vmatmul.f32.vlgmr.msra.gmra.mxu2 %v4262_v22  ;;  %4594 = vmatpush.msra.mxu0 %v5821_v23 }
 0xbbf   :  { %4706 = vmatpush.msra.mxu3 %v5823_v47 }
 0xbc0   :  { %4708 = vmatmul.f32.vlgmr.msra.gmra.mxu3 %v4262_v22  ;;  %4597 = vmatpush.msra.mxu0 %v5837_v24  ;;  %v4790_v22 = vld [vmem:[%s6937_s5] sm:$0xff] }
 0xbc1   :  { %4945 = vmatpush.msrb.mxu3 %v6818_v50 }
 0xbc2   :  { %4600 = vmatpush.msra.mxu0 %v5851_v8 }
 0xbc3   :  { %4603 = vmatmul.f32.vlgmr.msra.gmra.mxu0 %v4263_v42  ;;  %v4846_v42 = vsub.f32 %v4797_v39, %v6818_v50  ;;  %4947 = vmatpush.msrb.mxu3 %v6820_v37 }
 0xbc4   :  { %4813 = vmatpush.msrb.mxu0 %v6818_v50 }
 0xbc5   :  { %4908 = vmatpush.msrb.mxu2 %v4846_v42 }
 0xbc6   :  { %4815 = vmatpush.msrb.mxu0 %v6820_v37 }
 0xbc7   :  { %4911 = vmatpush.msrb.mxu2 %v6847_v29 }
 0xc26   :  { %v4329_v62 = vpop.f32.mrf.mxu1 }
 0xc2e   :  { %v4268_v56 = vpop.f32.mrf.mxu0  ;;  %v4367_v31 = vpop.f32.mrf.mxu2 }
 0xc2f   :  { %v4269_v61 = vadd.f32 %v4268_v56, %v7271_v54  ;;  %v4472_v11 = vpop.f32.mrf.mxu1  ;;  %v6857_v56 = vsub.f32 %v4794_v14, %v6833_v2 }
 0xc30   :  { %v4398_v4 = vpop.f32.mrf.mxu3 }
 0xc31   :  { %v4330_v19 = vadd.f32 %v4329_v62, %v4269_v61  ;;  %v6860_v61 = vsub.f32 %v4793_v45, %v6835_v33  ;;  %v6863_v62 = vsub.f32 %v4792_v18, %v6837_v34 }
 0xc33   :  { %v4368_v12 = vadd.f32 %v4367_v31, %v4330_v19  ;;  %v4847_v19 = vand.u32 4294901760, %v4846_v42  ;;  %v4853_v31 = vand.u32 4294901760, %v6847_v29 }
 0xc35   :  { %v4399_v20 = vadd.f32 %v4398_v4, %v4368_v12  ;;  %v6868_v4 = vand.u32 4294901760, %v4790_v22 }
 0xc37   :  { %v4505_v40 = vpop.f32.mrf.mxu2 }
 0xc38   :  { %v4443_v21 = vpop.f32.mrf.mxu0  ;;  %v4506_v23 = vadd.f32 %v4505_v40, %v7272_v48 }
 0xc39   :  { %v4444_v9 = vadd.f32 %v4443_v21, %v4399_v20  ;;  %v4635_v55 = vpop.f32.mrf.mxu1  ;;  %v4865_v20 = vand.u32 4294901760, %v6857_v56  ;;  %v6872_v21 = vsub.f32 %v4791_v17, %v6854_v16 }
 0xc3a   :  { %v4566_v47 = vpop.f32.mrf.mxu3 }
 0xc3b   :  { %v4473_v26 = vadd.f32 %v4472_v11, %v4444_v9  ;;  %v4567_v27 = vadd.f32 %v4566_v47, %v4506_v23  ;;  %v4848_v9 = vsub.f32 %v4846_v42, %v4847_v19  ;;  %v4854_v11 = vsub.f32 %v6847_v29, %v4853_v31 }
 0xc3c   :  { %v4866_v23 = vsub.f32 %v6857_v56, %v4865_v20  ;;  %v4888_v47 = vsub.f32 %v4790_v22, %v6868_v4 }
 0xc3d   :  { %v4713_v46 = vrot.slane %v4473_v26, 2  ;;  %v4855_v40 = vand.u32 4294901760, %v4854_v11 }
 0xc3f   :  { %v4715_v13 = vadd.f32 %v4713_v46, %v7244_v38  ;;  %v4871_v46 = vand.u32 4294901760, %v6860_v61 }
 0xc40   :  { %v4604_v6 = vpop.f32.mrf.mxu0 }
 0xc41   :  { %v5085_v32 = vmul.f32 -1.442695, %v4715_v13  ;;  %v4605_v28 = vadd.f32 %v4604_v6, %v4567_v27  ;;  %v4680_v10 = vpop.f32.mrf.mxu2  ;;  %v4877_v13 = vand.u32 4294901760, %v6863_v62  ;;  %v4883_v27 = vand.u32 4294901760, %v6872_v21 }
 0xc43   :  { %5135 = vpow2.f32 %v5085_v32  ;;  %v4636_v54 = vadd.f32 %v4635_v55, %v4605_v28  ;;  %v4709_v38 = vpop.f32.mrf.mxu3  ;;  %v4849_v32 = vand.u32 4294901760, %v4848_v9  ;;  %v4878_v28 = vsub.f32 %v6863_v62, %v4877_v13 }
 0xc44   :  { %v4889_v55 = vand.u32 4294901760, %v4888_v47 }
 0xc45   :  { %v4681_v57 = vadd.f32 %v4680_v10, %v4636_v54  ;;  %4850 = vmatpush.msrb.mxu1 %v4849_v32  ;;  %v4879_v10 = vand.u32 4294901760, %v4878_v28 }
 0xc47   :  { %v4710_v3 = vadd.f32 %v4709_v38, %v4681_v57  ;;  %4856 = vmatpush.msrb.mxu1 %v4855_v40  ;;  %v4890_v57 = vsub.f32 %v4888_v47, %v4889_v55 }
 0xc49   :  { %v5136_v24 = vpop.eup %5135  ;;  %v4736_v52 = vrot.slane %v4710_v3, 2 }
 0xc4a   :  { %v4719_v8 = vadd.f32 1.0, %v5136_v24  ;;  %v4872_v24 = vsub.f32 %v6860_v61, %v4871_v46 }
 0xc4c   :  { %5137 = vrcp.f32 %v4719_v8  ;;  %v4731_v58 = vand.u32 2147483648, %v4719_v8  ;;  %v4729_v48 = vand.u32 2147483647, %v4719_v8  ;;  %vm4725_vm2 = vweird.f32 %v4719_v8 }
 0xc4d   :  { %v4873_v54 = vand.u32 4294901760, %v4872_v24 }
 0xc4e   :  { %v4732_v1 = vor.u32 1.1754944e-38, %v4731_v58  ;;  %vm4730_vm4 = vcmp.eq.f32.partialorder %v4729_v48, 8.507059e+37 }
 0xc52   :  { %v5138_v25 = vpop.eup %5137 }
 0xc53   :  { %v4721_v44 = vmul.f32 %v5138_v25, %v4719_v8  ;;  %vm4726_vm1 = vweird.f32 %v5138_v25  ;;  %v4867_v8 = vand.u32 4294901760, %v4866_v23 }
 0xc54   :  { %vm4727_vm3 = vmor %vm4725_vm2, %vm4726_vm1 }
 0xc55   :  { %v4722_v7 = vsub.f32 1.0, %v4721_v44 }
 0xc57   :  { %v4723_v36 = vmul.f32 %v5138_v25, %v4722_v7  ;;  %v4891_v7 = vand.u32 4294901760, %v4890_v57 }
 0xc59   :  { %v4724_v15 = vadd.f32 %v5138_v25, %v4723_v36 }
 0xc5b   :  { %v4728_v41 = vsel %vm4727_vm3, %v5138_v25, %v4724_v15  ;;  %v4884_v25 = vsub.f32 %v6872_v21, %v4883_v27 }
 0xc5c   :  { %v6801_v63 = vsel %vm4730_vm4, %v4732_v1, %v4728_v41  ;;  %v7274_v1 = vld [vmem:[#allocation55_spill] sm:$0xff] }
 0xc5d   :  { %v4738_v0 = vmul.f32 %v4736_v52, %v6801_v63  ;;  %v6805_v51 = vmul.f32 %v4747_v5, %v6801_v63  ;;  %v4885_v44 = vand.u32 4294901760, %v4884_v25  ;;  %v4741_v38 = vsub.f32 1.0, %v6801_v63 }
 0xc5f   :  { %v4739_v43 = vadd.f32 %v4738_v0, %v6513_v35  ;;  %v6822_v35 = vand.u32 4294901760, %v4795_v30 }
 0xc61   :  { %5139 = vtanh.f32 %v4739_v43  ;;  %v6850_v53 = vsub.f32 %v4795_v30, %v6822_v35  ;;  %4817 = vmatpush.msrb.mxu0 %v6822_v35  ;;  %4949 = vmatpush.msrb.mxu3 %v6822_v35 }
 0xc63   :  { %v4859_v12 = vand.u32 4294901760, %v6850_v53  ;;  %4914 = vmatpush.msrb.mxu2 %v6850_v53  ;;  %4819 = vmatpush.msrb.mxu0 %v6833_v2 }
 0xc64   :  { %4951 = vmatpush.msrb.mxu3 %v6833_v2 }
 0xc65   :  { %v4860_v26 = vsub.f32 %v6850_v53, %v4859_v12  ;;  %4917 = vmatpush.msrb.mxu2 %v6857_v56  ;;  %4821 = vmatpush.msrb.mxu0 %v6835_v33 }
 0xc66   :  { %4953 = vmatpush.msrb.mxu3 %v6835_v33 }
 0xc67   :  { %v5140_v49 = vpop.eup %5139  ;;  %v4861_v6 = vand.u32 4294901760, %v4860_v26  ;;  %4920 = vmatpush.msrb.mxu2 %v6860_v61  ;;  %4823 = vmatpush.msrb.mxu0 %v6837_v34 }
 0xc68   :  { %4743 = vrot.lane.b32.xlu2 %v5140_v49, %s5196_s2  ;;  %4955 = vmatpush.msrb.mxu3 %v6837_v34 }
 0xc69   :  { %4862 = vmatpush.msrb.mxu1 %v4861_v6  ;;  %4923 = vmatpush.msrb.mxu2 %v6863_v62 }
 0xc6a   :  { %4825 = vmatpush.msrb.mxu0 %v6854_v16  ;;  %4957 = vmatpush.msrb.mxu3 %v6854_v16 }
 0xc6b   :  { %4868 = vmatpush.msrb.mxu1 %v4867_v8  ;;  %4926 = vmatpush.msrb.mxu2 %v6872_v21 }
 0xc6c   :  { %4827 = vmatpush.msrb.mxu0 %v6868_v4  ;;  %4959 = vmatpush.msrb.mxu3 %v6868_v4 }
 0xc6d   :  { %4874 = vmatpush.msrb.mxu1 %v4873_v54  ;;  %4929 = vmatpush.msrb.mxu2 %v4888_v47 }
 0xc6e   :  { %4978 = vmatpush.msra.mxu0 %v4847_v19 }
 0xc6f   :  { %4880 = vmatpush.msrb.mxu1 %v4879_v10 }
 0xc70   :  { %4982 = vmatpush.msra.mxu0 %v4853_v31 }
 0xc71   :  { %4886 = vmatpush.msrb.mxu1 %v4885_v44 }
 0xc72   :  { %4986 = vmatpush.msra.mxu0 %v4859_v12 }
 0xc73   :  { %4892 = vmatpush.msrb.mxu1 %v4891_v7 }
 0xc74   :  { %4990 = vmatpush.msra.mxu0 %v4865_v20 }
 0xc75   :  { %5021 = vmatpush.msra.mxu1 %v6818_v50 }
 0xc76   :  { %4994 = vmatpush.msra.mxu0 %v4871_v46 }
 0xc77   :  { %5023 = vmatpush.msra.mxu1 %v6820_v37 }
 0xc78   :  { %4998 = vmatpush.msra.mxu0 %v4877_v13 }
 0xc79   :  { %5025 = vmatpush.msra.mxu1 %v6822_v35 }
 0xc7a   :  { %5002 = vmatpush.msra.mxu0 %v4883_v27 }
 0xc7b   :  { %5027 = vmatpush.msra.mxu1 %v6833_v2 }
 0xc7c   :  { %5006 = vmatpush.msra.mxu0 %v4889_v55 }
 0xc7d   :  { %5029 = vmatpush.msra.mxu1 %v6835_v33 }
 0xc7f   :  { %5031 = vmatpush.msra.mxu1 %v6837_v34 }
 0xc81   :  { %5033 = vmatpush.msra.mxu1 %v6854_v16 }
 0xc83   :  { %5035 = vmatpush.msra.mxu1 %v6868_v4 }
 0xcc2   :  { %v4744_v58 = vpop.permute.xlu2 %4743 }
 0xcc3   :  { %v4746_v3 = vmul.f32 %v4744_v58, %v4741_v38 }
 0xcc5   :  { %v4750_v36 = vadd.f32 %v6805_v51, %v4746_v3 }
 0xcc7   :  { %v4756_v48 = vrot.slane %v4750_v36, 6 }
 0xcc9   :  { %4757 = vrot.lane.b32.xlu0 %v4756_v48, %s5196_s2 }
 0xd3b   :  { %v4758_v15 = vpop.permute.xlu0 %4757 }
 0xd3c   :  { %v4760_v5 = vsel %vm4753_vm6, %v7274_v1, %v4758_v15  ;;  %v4787_v41 = vsel %vm4753_vm6, %v4758_v15, %v7274_v1  ;;  %v4802_v52 = vsel %vm54_vm0, %v4758_v15, 0  ;;  %vm5042_vm0 = vcmask 254976  }
 0xd3d   :  { %4762 = vst.msk [vmem:[#allocation2] sm:$0x3] %vm4761_vm7, %v4760_v5  ;;  %v4828_v63 = vand.u32 4294901760, %v4802_v52 }
 0xd3e   :  { %4789 = vst.msk [vmem:[#allocation2 + $0xe] sm:$0x3] %vm4761_vm7, %v4787_v41 }
 0xd3f   :  { %v4829_v0 = vsub.f32 %v4802_v52, %v4828_v63  ;;  %4894 = vmatmul.f32.vlgmr.msrb.gmra.mxu1 %v4828_v63  ;;  %5056 = dma.vmem_to_hbm [thread:$0]  %s5049_s22, 256, %s5051_s20, [#allocation3], %s5198_s23, %s5198_s23, %s5199_s24  }
 0xd41   :  { %v4830_v51 = vand.u32 4294901760, %v4829_v0  ;;  %4932 = vmatmul.f32.vlgmr.msrb.gmra.mxu2 %v4829_v0 }
 0xd43   :  { %v4831_v43 = vsub.f32 %v4829_v0, %v4830_v51  ;;  %4963 = vmatmul.f32.vlgmr.msrb.gmra.mxu3 %v4830_v51 }
 0xd45   :  { %v4832_v49 = vand.u32 4294901760, %v4831_v43 }
 0xd47   :  { %4833 = vmatmul.f32.vlgmr.msrb.gmra.mxu0 %v4832_v49  ;;  %5037 = vmatmul.f32.vlgmr.msra.gmra.mxu1 %v4828_v63 }
 0xd4f   :  { %5008 = vmatmul.f32.vlgmr.msra.gmra.mxu0 %v4828_v63 }
 0xdbc   :  { %v4895_v39 = vpop.f32.mrf.mxu1 }
 0xdc4   :  { %v4834_v60 = vpop.f32.mrf.mxu0  ;;  %v4933_v37 = vpop.f32.mrf.mxu2 }
 0xdc5   :  { %v4835_v30 = vadd.f32 %v5092_v59, %v4834_v60  ;;  %v5038_v33 = vpop.f32.mrf.mxu1 }
 0xdc6   :  { %v4964_v14 = vpop.f32.mrf.mxu3 }
 0xdc7   :  { %v4896_v50 = vadd.f32 %v4895_v39, %v4835_v30 }
 0xdc9   :  { %v4934_v35 = vadd.f32 %v4933_v37, %v4896_v50 }
 0xdcb   :  { %v4965_v45 = vadd.f32 %v4964_v14, %v4934_v35 }
 0xdcc   :  { %v5009_v18 = vpop.f32.mrf.mxu0 }
 0xdcd   :  { %v5010_v2 = vadd.f32 %v5009_v18, %v4965_v45 }
 0xdcf   :  { %v5039_v34 = vadd.f32 %v5038_v33, %v5010_v2 }
 0xdd1   :  { %5141 = vtanh.f32 %v5039_v34 }
 0xdd7   :  { %v5142_v17 = vpop.eup %5141 }
 0xdd8   :  { %5043 = vst.msk [vmem:[#allocation4] sm:$0x3] %vm5042_vm0, %v5142_v17 }
 0xdd9   :  { %5067 = dma.vmem_to_hbm [thread:$0]  %s5063_s26, 32, %s5065_s4, [#allocation5]  }
 0xdda   :  { %5191 = dma.done.wait [#allocation3], 256  }
 0xddb   :  { %5192 = vsyncadd [#allocation3], 4294967040 }
 0xddc   :  { %5193 = dma.done.wait [#allocation5], 32  }
 0xddd   :  { %5194 = vsyncadd [#allocation5], 4294967264 }
 0xdde   :  { %5076 = vsyncpa [#allocation3], 1 }
 0xddf   :  { %5077 = vsyncpa [#allocation5], 1 }

</bundles_post_ra>
